<compile_context>
chip_gen: v7x
topology: tpu7x:2x2x1
jax: 0.10.0
libtpu: 0.0.40
codegen_flags: <defaults>
</compile_context>

<pallas_src>
import functools
import itertools
from dataclasses import dataclass

import numpy as np
import jax
import jax.numpy as jnp
from jax.experimental import pallas as pl
from jax.experimental.pallas import tpu as pltpu


# ----------------------------------------------------------------------------- dims
@dataclass
class ModelDimensions:
    n_mels: int
    n_audio_ctx: int
    n_audio_state: int
    n_audio_head: int
    n_audio_layer: int
    n_vocab: int
    n_text_ctx: int
    n_text_state: int
    n_text_head: int
    n_text_layer: int


def _round_up(x, m):
    return ((x + m - 1) // m) * m


# ----------------------------------------------------------------------------- in-kernel math
def _erf(x):
    # Abramowitz & Stegun 7.1.26 rational approximation (|err| <= 1.5e-7).  Built only
    # from mul/add/exp + an EUP reciprocal so it lowers cleanly in Mosaic and keeps the
    # GELU epilogue off the VALU critical path.
    a1, a2, a3, a4, a5 = 0.254829592, -0.284496736, 1.421413741, -1.453152027, 1.061405429
    p = 0.3275911
    sign = jnp.where(x < 0.0, -1.0, 1.0)
    ax = jnp.abs(x)
    t = pl.reciprocal(1.0 + p * ax, approx=True)
    poly = ((((a5 * t + a4) * t + a3) * t + a2) * t + a1) * t
    return sign * (1.0 - poly * jnp.exp(-ax * ax))


def _gelu(x):
    return 0.5 * x * (1.0 + _erf(x * (1.0 / np.sqrt(2.0))))


# ----------------------------------------------------------------------------- kernels
def _linear_kernel(x_ref, w_ref, b_ref, *rest, activation, has_ln, has_res, eps):
    # x: (TM, K) f32, w: (K, TN) bf16, b: (1, TN) f32 -> o: (TM, TN) f32
    o_ref = rest[-1]
    pos = 0
    if has_ln:
        g_ref, bb_ref = rest[0], rest[1]
        pos = 2
    if has_res:
        res_ref = rest[pos]

    x = x_ref[...].astype(jnp.float32)
    if has_ln:  # fused LayerNorm prologue (f32 reduction, as in the torch module)
        mean = jnp.mean(x, axis=-1, keepdims=True)
        xc = x - mean
        var = jnp.mean(xc * xc, axis=-1, keepdims=True)
        x = xc * jax.lax.rsqrt(var + eps) * g_ref[...] + bb_ref[...]

    y = jnp.dot(x.astype(jnp.bfloat16), w_ref[...], preferred_element_type=jnp.float32)
    y = y + b_ref[...]
    if activation == "gelu":
        y = _gelu(y)
    if has_res:  # fused residual add (saves a full HBM round trip of the activations)
        y = y + res_ref[...].astype(jnp.float32)
    o_ref[...] = y


def _layernorm_kernel(x_ref, g_ref, b_ref, o_ref, *, eps):
    x = x_ref[...].astype(jnp.float32)
    mean = jnp.mean(x, axis=-1, keepdims=True)
    xc = x - mean
    var = jnp.mean(xc * xc, axis=-1, keepdims=True)
    o_ref[...] = xc * jax.lax.rsqrt(var + eps) * g_ref[...] + b_ref[...]


def _attention_kernel(q_ref, k_ref, v_ref, *rest, scale, has_mask):
    # one block of `hb` (batch, head) pairs per grid step; q/k/v blocks are (hb, T, Dh)
    o_ref = rest[-1]
    q = (q_ref[...].astype(jnp.float32) * scale).astype(jnp.bfloat16)  # scale applied once
    k = k_ref[...].astype(jnp.bfloat16)
    s = jnp.einsum("hqd,hkd->hqk", q, k, preferred_element_type=jnp.float32)
    if has_mask:
        s = s + rest[0][...][None, :, :]
    m = jnp.max(s, axis=-1, keepdims=True)
    e = jnp.exp(s - m)
    p = e * pl.reciprocal(jnp.sum(e, axis=-1, keepdims=True), approx=True)
    o_ref[...] = jnp.einsum("hqk,hkd->hqd", p.astype(jnp.bfloat16),
                            v_ref[...].astype(jnp.bfloat16),
                            preferred_element_type=jnp.float32)


# ----------------------------------------------------------------------------- wrappers
def linear(x2d, w_t, b=None, activation=None, residual=None, ln=None,
           tile_m=256, tile_n=512, eps=1e-5):
    """y = act(LN?(x) @ w_t + b) [+ residual]; x2d: (M, K) f32, w_t: (K, N) bf16."""
    M, K = x2d.shape
    Kw, N = w_t.shape
    assert K == Kw

    # ---- M tiling: large aligned tiles, pad M instead of falling back to tm=M
    Mp = _round_up(M, 8)
    if Mp > tile_m:
        Mp = _round_up(Mp, tile_m)
        tm = tile_m
    else:
        tm = Mp
    x = jnp.pad(x2d, ((0, Mp - M), (0, 0))) if Mp != M else x2d

    # ---- N tiling: keep huge output dims (e.g. vocab logits) out of resident VMEM
    if N > tile_n:
        Np = _round_up(N, tile_n)
        tn = tile_n
    else:
        Np, tn = N, N
    w = jnp.pad(w_t, ((0, 0), (0, Np - N))) if Np != N else w_t
    b_arr = jnp.zeros((N,), jnp.float32) if b is None else b.astype(jnp.float32)
    if Np != N:
        b_arr = jnp.pad(b_arr, (0, Np - N))
    b2 = b_arr.reshape(1, Np)

    in_specs = [
        pl.BlockSpec((tm, K), lambda i, j: (i, 0)),
        pl.BlockSpec((K, tn), lambda i, j: (0, j)),
        pl.BlockSpec((1, tn), lambda i, j: (0, j)),
    ]
    args = [x, w, b2]

    has_ln = ln is not None
    if has_ln:
        g, bb = ln
        in_specs += [pl.BlockSpec((1, K), lambda i, j: (0, 0)),
                     pl.BlockSpec((1, K), lambda i, j: (0, 0))]
        args += [g.reshape(1, K).astype(jnp.float32), bb.reshape(1, K).astype(jnp.float32)]

    has_res = residual is not None
    if has_res:
        r = residual
        if Mp != M:
            r = jnp.pad(r, ((0, Mp - M), (0, 0)))
        if Np != N:
            r = jnp.pad(r, ((0, 0), (0, Np - N)))
        in_specs.append(pl.BlockSpec((tm, tn), lambda i, j: (i, j)))
        args.append(r.astype(jnp.float32))

    out = pl.pallas_call(
        functools.partial(_linear_kernel, activation=activation,
                          has_ln=has_ln, has_res=has_res, eps=eps),
        out_shape=jax.ShapeDtypeStruct((Mp, Np), jnp.float32),
        grid=(Mp // tm, Np // tn),
        in_specs=in_specs,
        out_specs=pl.BlockSpec((tm, tn), lambda i, j: (i, j)),
        compiler_params=pltpu.CompilerParams(dimension_semantics=("parallel", "parallel")),
    )(*args)
    if Mp != M or Np != N:
        out = out[:M, :N]
    return out


def layernorm(x2d, g, b, eps=1e-5, tile_m=1024):
    M, D = x2d.shape
    Mp = _round_up(M, 8)
    if Mp > tile_m:
        Mp = _round_up(Mp, tile_m)
        tm = tile_m
    else:
        tm = Mp
    x = jnp.pad(x2d, ((0, Mp - M), (0, 0))) if Mp != M else x2d
    out = pl.pallas_call(
        functools.partial(_layernorm_kernel, eps=eps),
        out_shape=jax.ShapeDtypeStruct((Mp, D), jnp.float32),
        grid=(Mp // tm,),
        in_specs=[
            pl.BlockSpec((tm, D), lambda i: (i, 0)),
            pl.BlockSpec((1, D), lambda i: (0, 0)),
            pl.BlockSpec((1, D), lambda i: (0, 0)),
        ],
        out_specs=pl.BlockSpec((tm, D), lambda i: (i, 0)),
        compiler_params=pltpu.CompilerParams(dimension_semantics=("parallel",)),
    )(x, g.reshape(1, D).astype(jnp.float32), b.reshape(1, D).astype(jnp.float32))
    return out[:M] if Mp != M else out


def mha_attention(q, k, v, n_head, mask=None):
    """q: (B, Tq, D); k, v: (B, Tk, D); mask: additive (>=Tq, >=Tk) or None."""
    B, Tq, D = q.shape
    Tk = k.shape[1]
    Dh = D // n_head
    scale = float(Dh) ** -0.5   # == (Dh**-0.25 on q) * (Dh**-0.25 on k) of the torch code

    def split(t, T):
        return t.reshape(B, T, n_head, Dh).transpose(0, 2, 1, 3).reshape(B * n_head, T, Dh)

    qh, kh, vh = split(q, Tq), split(k, Tk), split(v, Tk)
    BH = B * n_head

    # Heads per grid step: largest divisor of B*H whose f32 score block stays ~<= 4 MiB
    # (keeps VMEM pressure bounded at long audio contexts, batches matmuls at toy sizes).
    budget = max(1, (4 * 1024 * 1024) // max(1, Tq * Tk * 4))
    hb = 1
    for d in range(1, BH + 1):
        if BH % d == 0 and d <= budget:
            hb = d

    has_mask = mask is not None
    in_specs = [
        pl.BlockSpec((hb, Tq, Dh), lambda i: (i, 0, 0)),
        pl.BlockSpec((hb, Tk, Dh), lambda i: (i, 0, 0)),
        pl.BlockSpec((hb, Tk, Dh), lambda i: (i, 0, 0)),
    ]
    args = [qh, kh, vh]
    if has_mask:
        # torch adds mask[:n_ctx, :n_ctx]; masked attention is self-attention (Tq == Tk)
        in_specs.append(pl.BlockSpec((Tq, Tk), lambda i: (0, 0)))
        args.append(mask[:Tq, :Tk].astype(jnp.float32))

    out = pl.pallas_call(
        functools.partial(_attention_kernel, scale=scale, has_mask=has_mask),
        out_shape=jax.ShapeDtypeStruct((BH, Tq, Dh), jnp.float32),
        grid=(BH // hb,),
        in_specs=in_specs,
        out_specs=pl.BlockSpec((hb, Tq, Dh), lambda i: (i, 0, 0)),
        compiler_params=pltpu.CompilerParams(dimension_semantics=("parallel",)),
    )(*args)
    return out.reshape(B, n_head, Tq, Dh).transpose(0, 2, 1, 3).reshape(B, Tq, D)


def conv1d_gelu(x_nct, w_t, b, *, stride, padding):
    """PyTorch-semantics Conv1d + GELU: im2col (plain-JAX gather) + Pallas matmul with
    a fused exact-GELU epilogue.  Input NCT, output NTC.  w_t: (Cin*K, Cout) bf16."""
    B, Cin, T = x_nct.shape
    CinK, Cout = w_t.shape
    K = CinK // Cin
    xp = jnp.pad(x_nct, ((0, 0), (0, 0), (padding, padding)))
    Tout = (T + 2 * padding - K) // stride + 1
    cols = (jnp.arange(Tout) * stride)[:, None] + jnp.arange(K)[None, :]     # (Tout, K)
    patches = xp[:, :, cols]                                                  # (B, Cin, Tout, K)
    patches = patches.transpose(0, 2, 1, 3).reshape(B * Tout, Cin * K)
    y = linear(patches, w_t, b, activation="gelu")
    return y.reshape(B, Tout, Cout)


# ----------------------------------------------------------------------------- model forward
def self_attention(p, ln_p, x2d, B, T, D, n_head, mask):
    # fused: LayerNorm -> QKV projection (one weight read of x)
    qkv = linear(x2d, p["qkv_w"], p["qkv_b"], ln=(ln_p["g"], ln_p["b"]))
    q = qkv[:, :D].reshape(B, T, D)
    k = qkv[:, D:2 * D].reshape(B, T, D)
    v = qkv[:, 2 * D:].reshape(B, T, D)
    a = mha_attention(q, k, v, n_head, mask)
    # fused: out projection + residual add
    return linear(a.reshape(B * T, D), p["out_w"], p["out_b"], residual=x2d)


def cross_attention(p, ln_p, x2d, xa, B, T, D, n_head):
    q = linear(x2d, p["q_w"], p["q_b"], ln=(ln_p["g"], ln_p["b"])).reshape(B, T, D)
    Bx, Tx, Dx = xa.shape
    kv = linear(xa.reshape(Bx * Tx, Dx), p["kv_w"], p["kv_b"])
    k = kv[:, :D].reshape(Bx, Tx, D)
    v = kv[:, D:].reshape(Bx, Tx, D)
    a = mha_attention(q, k, v, n_head, None)
    return linear(a.reshape(B * T, D), p["out_w"], p["out_b"], residual=x2d)


def block_forward(p, x, xa, n_head, mask, cross):
    B, T, D = x.shape
    x2 = x.reshape(B * T, D)
    x2 = self_attention(p["attn"], p["attn_ln"], x2, B, T, D, n_head, mask)
    if cross:
        x2 = cross_attention(p["cross_attn"], p["cross_attn_ln"], x2, xa, B, T, D, n_head)
    # fused: LayerNorm -> MLP1 + GELU, then MLP2 + residual
    m = linear(x2, p["mlp1_w"], p["mlp1_b"], activation="gelu",
               ln=(p["mlp_ln"]["g"], p["mlp_ln"]["b"]))
    x2 = linear(m, p["mlp2_w"], p["mlp2_b"], residual=x2)
    return x2.reshape(B, T, D)


def embed_position(length, dims, max_scale=10000):
    assert dims % 2 == 0
    half = dims // 2
    scaled = (jnp.arange(length, dtype=jnp.float32)[:, None]
              * jnp.exp(-np.log(max_scale) / (half - 1) * jnp.arange(half, dtype=jnp.float32))[None, :])
    return jnp.concatenate([jnp.sin(scaled), jnp.cos(scaled)], axis=1)


def encoder_forward(p, mel, dims):
    # mel: (B, n_mels, T) NCT, like the PyTorch module
    h = conv1d_gelu(mel, p["conv1_w"], p["conv1_b"], stride=1, padding=1)                   # (B, T,   ns)
    h = conv1d_gelu(h.transpose(0, 2, 1), p["conv2_w"], p["conv2_b"], stride=2, padding=1)  # (B, T/2, ns)
    x = h + p["pos"]                                                                        # == permute(0,2,1)+pos
    for bp in p["blocks"]:
        x = block_forward(bp, x, None, dims.n_audio_head, None, cross=False)
    B, T, D = x.shape
    return layernorm(x.reshape(B * T, D), p["ln_post"]["g"], p["ln_post"]["b"]).reshape(B, T, D)


def decoder_forward(p, tokens, xa, dims):
    # TODO(synk): kv_cache / install_cache hook machinery is inference-time state, not
    #             part of this forward (offset == 0), so it is not implemented.
    B, Ttok = tokens.shape
    x = p["tok_emb"][tokens] + p["pos"][:Ttok]
    for bp in p["blocks"]:
        x = block_forward(bp, x, xa, dims.n_text_head, p["mask"], cross=True)
    D = x.shape[-1]
    # fused: final LayerNorm -> ln(x) @ token_embedding.T (N-tiled if vocab is large)
    logits = linear(x.reshape(B * Ttok, D), p["logits_w"], None,
                    ln=(p["ln"]["g"], p["ln"]["b"]))
    return logits.reshape(B, Ttok, dims.n_vocab)


def talk_forward(params, mel, tokens, dims):
    audio = encoder_forward(params["encoder"], mel, dims)
    return decoder_forward(params["decoder"], tokens, audio, dims)


# ----------------------------------------------------------------------------- params
def init_talk_params(dims, key):
    """Raw parameters in the PyTorch layouts (Linear: (out, in); Conv1d: (Cout, Cin, K))."""
    counter = itertools.count()

    def rnd(shape, scale=0.02):
        return scale * jax.random.normal(jax.random.fold_in(key, next(counter)), shape, dtype=jnp.float32)

    def linear_p(out_f, in_f, bias=True):
        return {"w": rnd((out_f, in_f)), "b": rnd((out_f,)) if bias else None}

    def mha_p(d):
        return {"query": linear_p(d, d), "key": linear_p(d, d, bias=False),
                "value": linear_p(d, d), "out": linear_p(d, d)}

    def ln_p(d):
        return {"g": jnp.ones((d,), jnp.float32), "b": jnp.zeros((d,), jnp.float32)}

    def block_p(d, cross):
        p = {"attn": mha_p(d), "attn_ln": ln_p(d),
             "mlp1": linear_p(4 * d, d), "mlp2": linear_p(d, 4 * d), "mlp_ln": ln_p(d)}
        if cross:
            p["cross_attn"] = mha_p(d)
            p["cross_attn_ln"] = ln_p(d)
        return p

    enc = {
        "conv1_w": rnd((dims.n_audio_state, dims.n_mels, 3)),
        "conv1_b": rnd((dims.n_audio_state,)),
        "conv2_w": rnd((dims.n_audio_state, dims.n_audio_state, 3)),
        "conv2_b": rnd((dims.n_audio_state,)),
        "pos": embed_position(dims.n_audio_ctx, dims.n_audio_state),
        "blocks": [block_p(dims.n_audio_state, False) for _ in range(dims.n_audio_layer)],
        "ln_post": ln_p(dims.n_audio_state),
    }
    dec = {
        "tok_emb": rnd((dims.n_vocab, dims.n_text_state)),
        "pos": rnd((dims.n_text_ctx, dims.n_text_state)),   # nn.Parameter(torch.empty) -> deterministic init
        "mask": jnp.triu(jnp.full((dims.n_text_ctx, dims.n_text_ctx), -jnp.inf, jnp.float32), 1),
        "blocks": [block_p(dims.n_text_state, True) for _ in range(dims.n_text_layer)],
        "ln": ln_p(dims.n_text_state),
    }
    return {"encoder": enc, "decoder": dec}


def prepare_talk_params(raw, dims):
    """One-time prep: transpose every matmul weight to (K, N), cast to bf16, and fuse
    Q/K/V (and K/V for cross-attn) weights into single concatenated matrices."""
    def wt(lin):
        return lin["w"].T.astype(jnp.bfloat16)

    def bias(lin, out_f):
        return lin["b"] if lin["b"] is not None else jnp.zeros((out_f,), jnp.float32)

    def prep_self_attn(p, d):
        return {"qkv_w": jnp.concatenate([wt(p["query"]), wt(p["key"]), wt(p["value"])], axis=1),
                "qkv_b": jnp.concatenate([bias(p["query"], d), jnp.zeros((d,), jnp.float32), bias(p["value"], d)]),
                "out_w": wt(p["out"]), "out_b": bias(p["out"], d)}

    def prep_cross_attn(p, d):
        return {"q_w": wt(p["query"]), "q_b": bias(p["query"], d),
                "kv_w": jnp.concatenate([wt(p["key"]), wt(p["value"])], axis=1),
                "kv_b": jnp.concatenate([jnp.zeros((d,), jnp.float32), bias(p["value"], d)]),
                "out_w": wt(p["out"]), "out_b": bias(p["out"], d)}

    def prep_block(p, d, cross):
        out = {"attn": prep_self_attn(p["attn"], d), "attn_ln": p["attn_ln"],
               "mlp1_w": wt(p["mlp1"]), "mlp1_b": bias(p["mlp1"], 4 * d),
               "mlp2_w": wt(p["mlp2"]), "mlp2_b": bias(p["mlp2"], d),
               "mlp_ln": p["mlp_ln"]}
        if cross:
            out["cross_attn"] = prep_cross_attn(p["cross_attn"], d)
            out["cross_attn_ln"] = p["cross_attn_ln"]
        return out

    def prep_conv(w):  # (Cout, Cin, K) -> (Cin*K, Cout) bf16, matches im2col patch order
        cout = w.shape[0]
        return w.reshape(cout, -1).T.astype(jnp.bfloat16)

    das, dts = dims.n_audio_state, dims.n_text_state
    enc, dec = raw["encoder"], raw["decoder"]
    enc_p = {
        "conv1_w": prep_conv(enc["conv1_w"]), "conv1_b": enc["conv1_b"],
        "conv2_w": prep_conv(enc["conv2_w"]), "conv2_b": enc["conv2_b"],
        "pos": enc["pos"],
        "blocks": [prep_block(bp, das, False) for bp in enc["blocks"]],
        "ln_post": enc["ln_post"],
    }
    dec_p = {
        "tok_emb": dec["tok_emb"],                                   # f32, for embedding gather
        "logits_w": dec["tok_emb"].T.astype(jnp.bfloat16),           # (D, V) for the logits matmul
        "pos": dec["pos"], "mask": dec["mask"],
        "blocks": [prep_block(bp, dts, True) for bp in dec["blocks"]],
        "ln": dec["ln"],
    }
    return {"encoder": enc_p, "decoder": dec_p}


# ----------------------------------------------------------------------------- main
if __name__ == "__main__":
    dims = ModelDimensions(
        n_mels=8, n_audio_ctx=8, n_audio_state=32, n_audio_head=4, n_audio_layer=2,
        n_vocab=64, n_text_ctx=8, n_text_state=32, n_text_head=4, n_text_layer=2,
    )
    root = jax.random.PRNGKey(0)
    raw_params = init_talk_params(dims, jax.random.fold_in(root, 1))
    params = prepare_talk_params(raw_params, dims)

    # mel: (B, n_mels, T) with T = 2 * n_audio_ctx (stride-2 conv halves it)
    mel = jax.random.normal(jax.random.fold_in(root, 2), (2, dims.n_mels, 2 * dims.n_audio_ctx), jnp.float32)
    tokens = jax.random.randint(jax.random.fold_in(root, 3), (2, dims.n_text_ctx), 0, dims.n_vocab)

    fwd = jax.jit(functools.partial(talk_forward, dims=dims))
    logits = jax.block_until_ready(fwd(params, mel, tokens))

    assert logits.shape == (2, dims.n_text_ctx, dims.n_vocab), logits.shape
    assert bool(jnp.all(jnp.isfinite(logits)))
    print("KERNEL_OK")
</pallas_src>

<mosaic_0001>
module attributes {stable_mosaic.version = 11 : i64} {
  func.func @_linear_kernel(%arg0: i32, %arg1: i32, %arg2: memref<16x32xf32, #tpu.memory_space<vmem>>, %arg3: memref<32x96xbf16, #tpu.memory_space<vmem>>, %arg4: memref<1x96xf32, #tpu.memory_space<vmem>>, %arg5: memref<1x32xf32, #tpu.memory_space<vmem>>, %arg6: memref<1x32xf32, #tpu.memory_space<vmem>>, %arg7: memref<16x96xf32, #tpu.memory_space<vmem>>) attributes {dimension_semantics = [#tpu.dimension_semantics<parallel>, #tpu.dimension_semantics<parallel>], iteration_bounds = array<i64: 1, 1>, scalar_prefetch = 0 : i64, scratch_operands = 0 : i64, tpu.core_type = #tpu.core_type<tc>, window_params = [{transform_indices = @transform_0, window_bounds = array<i64: 16, 32>}, {transform_indices = @transform_1, window_bounds = array<i64: 32, 96>}, {transform_indices = @transform_2, window_bounds = array<i64: 1, 96>}, {pipeline_mode = #tpu.pipeline_mode<synchronous>, transform_indices = @transform_3, window_bounds = array<i64: 1, 32>}, {pipeline_mode = #tpu.pipeline_mode<synchronous>, transform_indices = @transform_4, window_bounds = array<i64: 1, 32>}, {transform_indices = @transform_5, window_bounds = array<i64: 16, 96>}]} {
    %c0 = arith.constant 0 : index
    %c0_0 = arith.constant 0 : index
    %0 = vector.load %arg2[%c0, %c0_0] : memref<16x32xf32, #tpu.memory_space<vmem>>, vector<16x32xf32>
    %cst = arith.constant dense<0.000000e+00> : vector<16xf32>
    %1 = vector.multi_reduction <add>, %0, %cst [1] : vector<16x32xf32> to vector<16xf32>
    %2 = vector.shape_cast %1 : vector<16xf32> to vector<16x1xf32>
    %cst_1 = arith.constant 3.200000e+01 : f32
    %3 = vector.broadcast %cst_1 : f32 to vector<16x1xf32>
    %4 = arith.divf %2, %3 : vector<16x1xf32>
    %5 = vector.broadcast %4 : vector<16x1xf32> to vector<16x32xf32>
    %6 = arith.subf %0, %5 : vector<16x32xf32>
    %7 = arith.mulf %6, %6 : vector<16x32xf32>
    %cst_2 = arith.constant dense<0.000000e+00> : vector<16xf32>
    %8 = vector.multi_reduction <add>, %7, %cst_2 [1] : vector<16x32xf32> to vector<16xf32>
    %9 = vector.shape_cast %8 : vector<16xf32> to vector<16x1xf32>
    %cst_3 = arith.constant 3.200000e+01 : f32
    %10 = vector.broadcast %cst_3 : f32 to vector<16x1xf32>
    %11 = arith.divf %9, %10 : vector<16x1xf32>
    %cst_4 = arith.constant 9.99999974E-6 : f32
    %12 = vector.broadcast %cst_4 : f32 to vector<16x1xf32>
    %13 = arith.addf %11, %12 : vector<16x1xf32>
    %14 = math.rsqrt %13 : vector<16x1xf32>
    %15 = vector.broadcast %14 : vector<16x1xf32> to vector<16x32xf32>
    %16 = arith.mulf %6, %15 : vector<16x32xf32>
    %c0_5 = arith.constant 0 : index
    %c0_6 = arith.constant 0 : index
    %17 = vector.load %arg5[%c0_5, %c0_6] : memref<1x32xf32, #tpu.memory_space<vmem>>, vector<1x32xf32>
    %18 = vector.broadcast %17 : vector<1x32xf32> to vector<16x32xf32>
    %19 = arith.mulf %16, %18 : vector<16x32xf32>
    %c0_7 = arith.constant 0 : index
    %c0_8 = arith.constant 0 : index
    %20 = vector.load %arg6[%c0_7, %c0_8] : memref<1x32xf32, #tpu.memory_space<vmem>>, vector<1x32xf32>
    %21 = vector.broadcast %20 : vector<1x32xf32> to vector<16x32xf32>
    %22 = arith.addf %19, %21 : vector<16x32xf32>
    %23 = arith.truncf %22 : vector<16x32xf32> to vector<16x32xbf16>
    %c0_9 = arith.constant 0 : index
    %c0_10 = arith.constant 0 : index
    %24 = vector.load %arg3[%c0_9, %c0_10] : memref<32x96xbf16, #tpu.memory_space<vmem>>, vector<32x96xbf16>
    %cst_11 = arith.constant dense<0.000000e+00> : vector<16x96xf32>
    %25 = tpu.matmul %23, %24, %cst_11 {dimension_numbers = #tpu.dot_dimension_numbers<[1], [0], [0], [1], [0, 0, 1, 1], [], []>} : vector<16x32xbf16>, vector<32x96xbf16>, vector<16x96xf32> -> vector<16x96xf32>
    %c0_12 = arith.constant 0 : index
    %c0_13 = arith.constant 0 : index
    %26 = vector.load %arg4[%c0_12, %c0_13] : memref<1x96xf32, #tpu.memory_space<vmem>>, vector<1x96xf32>
    %27 = vector.broadcast %26 : vector<1x96xf32> to vector<16x96xf32>
    %28 = arith.addf %25, %27 : vector<16x96xf32>
    %c0_14 = arith.constant 0 : index
    %c0_15 = arith.constant 0 : index
    %29 = vector.load %arg7[%c0_14, %c0_15] : memref<16x96xf32, #tpu.memory_space<vmem>>, vector<16x96xf32>
    tpu.vector_store %arg7[%c0_14, %c0_15], %28 {strides = array<i32>} : memref<16x96xf32, #tpu.memory_space<vmem>>, vector<16x96xf32>,
    return
  }
  func.func @transform_0(%arg0: i32, %arg1: i32) -> (i32, i32) {
    %c0_i32 = arith.constant 0 : i32
    %c0_i32_0 = arith.constant 0 : i32
    return %arg0, %c0_i32 : i32, i32
  }
  func.func @transform_1(%arg0: i32, %arg1: i32) -> (i32, i32) {
    %c0_i32 = arith.constant 0 : i32
    %c0_i32_0 = arith.constant 0 : i32
    return %c0_i32, %arg1 : i32, i32
  }
  func.func @transform_2(%arg0: i32, %arg1: i32) -> (i32, i32) {
    %c0_i32 = arith.constant 0 : i32
    %c0_i32_0 = arith.constant 0 : i32
    return %c0_i32, %arg1 : i32, i32
  }
  func.func @transform_3(%arg0: i32, %arg1: i32) -> (i32, i32) {
    %c0_i32 = arith.constant 0 : i32
    %c0_i32_0 = arith.constant 0 : i32
    %c0_i32_1 = arith.constant 0 : i32
    return %c0_i32, %c0_i32_0 : i32, i32
  }
  func.func @transform_4(%arg0: i32, %arg1: i32) -> (i32, i32) {
    %c0_i32 = arith.constant 0 : i32
    %c0_i32_0 = arith.constant 0 : i32
    %c0_i32_1 = arith.constant 0 : i32
    return %c0_i32, %c0_i32_0 : i32, i32
  }
  func.func @transform_5(%arg0: i32, %arg1: i32) -> (i32, i32) {
    %c0_i32 = arith.constant 0 : i32
    return %arg0, %arg1 : i32, i32
  }
}

module attributes {stable_mosaic.version = 11 : i64} {
  func.func @_attention_kernel(%arg0: i32, %arg1: memref<8x8x8xf32, #tpu.memory_space<vmem>>, %arg2: memref<8x8x8xf32, #tpu.memory_space<vmem>>, %arg3: memref<8x8x8xf32, #tpu.memory_space<vmem>>, %arg4: memref<8x8xf32, #tpu.memory_space<vmem>>, %arg5: memref<8x8x8xf32, #tpu.memory_space<vmem>>) attributes {dimension_semantics = [#tpu.dimension_semantics<parallel>], iteration_bounds = array<i64: 1>, scalar_prefetch = 0 : i64, scratch_operands = 0 : i64, tpu.core_type = #tpu.core_type<tc>, window_params = [{transform_indices = @transform_0, window_bounds = array<i64: 8, 8, 8>}, {transform_indices = @transform_1, window_bounds = array<i64: 8, 8, 8>}, {transform_indices = @transform_2, window_bounds = array<i64: 8, 8, 8>}, {pipeline_mode = #tpu.pipeline_mode<synchronous>, transform_indices = @transform_3, window_bounds = array<i64: 8, 8>}, {transform_indices = @transform_4, window_bounds = array<i64: 8, 8, 8>}]} {
    %c0 = arith.constant 0 : index
    %c0_0 = arith.constant 0 : index
    %c0_1 = arith.constant 0 : index
    %0 = vector.load %arg1[%c0, %c0_0, %c0_1] : memref<8x8x8xf32, #tpu.memory_space<vmem>>, vector<8x8x8xf32>
    %cst = arith.constant 0.353553385 : f32
    %1 = vector.broadcast %cst : f32 to vector<8x8x8xf32>
    %2 = arith.mulf %0, %1 : vector<8x8x8xf32>
    %3 = arith.truncf %2 : vector<8x8x8xf32> to vector<8x8x8xbf16>
    %c0_2 = arith.constant 0 : index
    %c0_3 = arith.constant 0 : index
    %c0_4 = arith.constant 0 : index
    %4 = vector.load %arg2[%c0_2, %c0_3, %c0_4] : memref<8x8x8xf32, #tpu.memory_space<vmem>>, vector<8x8x8xf32>
    %5 = arith.truncf %4 : vector<8x8x8xf32> to vector<8x8x8xbf16>
    "tpu.trace_start"() <{level = 10 : i32, message = "hqd,hkd->hqk"}> : () -> ()
    %cst_5 = arith.constant dense<0.000000e+00> : vector<8x8x8xf32>
    %6 = tpu.matmul %3, %5, %cst_5 {dimension_numbers = #tpu.dot_dimension_numbers<[2], [2], [1], [1], [0, 0, 0, 1, 1, 1], [0], [0]>} : vector<8x8x8xbf16>, vector<8x8x8xbf16>, vector<8x8x8xf32> -> vector<8x8x8xf32>
    "tpu.trace_stop"() : () -> ()
    %c0_6 = arith.constant 0 : index
    %c0_7 = arith.constant 0 : index
    %7 = vector.load %arg4[%c0_6, %c0_7] : memref<8x8xf32, #tpu.memory_space<vmem>>, vector<8x8xf32>
    %8 = vector.shape_cast %7 : vector<8x8xf32> to vector<1x8x8xf32>
    %9 = vector.broadcast %8 : vector<1x8x8xf32> to vector<8x8x8xf32>
    %10 = arith.addf %6, %9 : vector<8x8x8xf32>
    %cst_8 = arith.constant dense<0xFF800000> : vector<8x8xf32>
    %11 = vector.multi_reduction <maximumf>, %10, %cst_8 [2] : vector<8x8x8xf32> to vector<8x8xf32>
    %12 = vector.shape_cast %11 : vector<8x8xf32> to vector<8x8x1xf32>
    %13 = vector.broadcast %12 : vector<8x8x1xf32> to vector<8x8x8xf32>
    %14 = arith.subf %10, %13 : vector<8x8x8xf32>
    %15 = math.exp %14 : vector<8x8x8xf32>
    %cst_9 = arith.constant dense<0.000000e+00> : vector<8x8xf32>
    %16 = vector.multi_reduction <add>, %15, %cst_9 [2] : vector<8x8x8xf32> to vector<8x8xf32>
    %17 = vector.shape_cast %16 : vector<8x8xf32> to vector<8x8x1xf32>
    %18 = tpu.reciprocal %17 {approx = true} : vector<8x8x1xf32> -> vector<8x8x1xf32>
    %19 = vector.broadcast %18 : vector<8x8x1xf32> to vector<8x8x8xf32>
    %20 = arith.mulf %15, %19 : vector<8x8x8xf32>
    %21 = arith.truncf %20 : vector<8x8x8xf32> to vector<8x8x8xbf16>
    %c0_10 = arith.constant 0 : index
    %c0_11 = arith.constant 0 : index
    %c0_12 = arith.constant 0 : index
    %22 = vector.load %arg3[%c0_10, %c0_11, %c0_12] : memref<8x8x8xf32, #tpu.memory_space<vmem>>, vector<8x8x8xf32>
    %23 = arith.truncf %22 : vector<8x8x8xf32> to vector<8x8x8xbf16>
    "tpu.trace_start"() <{level = 10 : i32, message = "hqk,hkd->hqd"}> : () -> ()
    %cst_13 = arith.constant dense<0.000000e+00> : vector<8x8x8xf32>
    %24 = tpu.matmul %21, %23, %cst_13 {dimension_numbers = #tpu.dot_dimension_numbers<[2], [1], [1], [2], [0, 0, 0, 1, 1, 2], [0], [0]>} : vector<8x8x8xbf16>, vector<8x8x8xbf16>, vector<8x8x8xf32> -> vector<8x8x8xf32>
    "tpu.trace_stop"() : () -> ()
    %c0_14 = arith.constant 0 : index
    %c0_15 = arith.constant 0 : index
    %c0_16 = arith.constant 0 : index
    %25 = vector.load %arg5[%c0_14, %c0_15, %c0_16] : memref<8x8x8xf32, #tpu.memory_space<vmem>>, vector<8x8x8xf32>
    tpu.vector_store %arg5[%c0_14, %c0_15, %c0_16], %24 {strides = array<i32>} : memref<8x8x8xf32, #tpu.memory_space<vmem>>, vector<8x8x8xf32>,
    return
  }
  func.func @transform_0(%arg0: i32) -> (i32, i32, i32) {
    %c0_i32 = arith.constant 0 : i32
    %c0_i32_0 = arith.constant 0 : i32
    %c0_i32_1 = arith.constant 0 : i32
    return %arg0, %c0_i32, %c0_i32_0 : i32, i32, i32
  }
  func.func @transform_1(%arg0: i32) -> (i32, i32, i32) {
    %c0_i32 = arith.constant 0 : i32
    %c0_i32_0 = arith.constant 0 : i32
    %c0_i32_1 = arith.constant 0 : i32
    return %arg0, %c0_i32, %c0_i32_0 : i32, i32, i32
  }
  func.func @transform_2(%arg0: i32) -> (i32, i32, i32) {
    %c0_i32 = arith.constant 0 : i32
    %c0_i32_0 = arith.constant 0 : i32
    %c0_i32_1 = arith.constant 0 : i32
    return %arg0, %c0_i32, %c0_i32_0 : i32, i32, i32
  }
  func.func @transform_3(%arg0: i32) -> (i32, i32) {
    %c0_i32 = arith.constant 0 : i32
    %c0_i32_0 = arith.constant 0 : i32
    %c0_i32_1 = arith.constant 0 : i32
    return %c0_i32, %c0_i32_0 : i32, i32
  }
  func.func @transform_4(%arg0: i32) -> (i32, i32, i32) {
    %c0_i32 = arith.constant 0 : i32
    %c0_i32_0 = arith.constant 0 : i32
    %c0_i32_1 = arith.constant 0 : i32
    return %arg0, %c0_i32, %c0_i32_0 : i32, i32, i32
  }
}

module attributes {stable_mosaic.version = 11 : i64} {
  func.func @_linear_kernel(%arg0: i32, %arg1: i32, %arg2: memref<16x32xf32, #tpu.memory_space<vmem>>, %arg3: memref<32x32xbf16, #tpu.memory_space<vmem>>, %arg4: memref<1x32xf32, #tpu.memory_space<vmem>>, %arg5: memref<16x32xf32, #tpu.memory_space<vmem>>, %arg6: memref<16x32xf32, #tpu.memory_space<vmem>>) attributes {dimension_semantics = [#tpu.dimension_semantics<parallel>, #tpu.dimension_semantics<parallel>], iteration_bounds = array<i64: 1, 1>, scalar_prefetch = 0 : i64, scratch_operands = 0 : i64, tpu.core_type = #tpu.core_type<tc>, window_params = [{transform_indices = @transform_0, window_bounds = array<i64: 16, 32>}, {transform_indices = @transform_1, window_bounds = array<i64: 32, 32>}, {transform_indices = @transform_2, window_bounds = array<i64: 1, 32>}, {transform_indices = @transform_3, window_bounds = array<i64: 16, 32>}, {transform_indices = @transform_4, window_bounds = array<i64: 16, 32>}]} {
    %c0 = arith.constant 0 : index
    %c0_0 = arith.constant 0 : index
    %0 = vector.load %arg2[%c0, %c0_0] : memref<16x32xf32, #tpu.memory_space<vmem>>, vector<16x32xf32>
    %1 = arith.truncf %0 : vector<16x32xf32> to vector<16x32xbf16>
    %c0_1 = arith.constant 0 : index
    %c0_2 = arith.constant 0 : index
    %2 = vector.load %arg3[%c0_1, %c0_2] : memref<32x32xbf16, #tpu.memory_space<vmem>>, vector<32x32xbf16>
    %cst = arith.constant dense<0.000000e+00> : vector<16x32xf32>
    %3 = tpu.matmul %1, %2, %cst {dimension_numbers = #tpu.dot_dimension_numbers<[1], [0], [0], [1], [0, 0, 1, 1], [], []>} : vector<16x32xbf16>, vector<32x32xbf16>, vector<16x32xf32> -> vector<16x32xf32>
    %c0_3 = arith.constant 0 : index
    %c0_4 = arith.constant 0 : index
    %4 = vector.load %arg4[%c0_3, %c0_4] : memref<1x32xf32, #tpu.memory_space<vmem>>, vector<1x32xf32>
    %5 = vector.broadcast %4 : vector<1x32xf32> to vector<16x32xf32>
    %6 = arith.addf %3, %5 : vector<16x32xf32>
    %c0_5 = arith.constant 0 : index
    %c0_6 = arith.constant 0 : index
    %7 = vector.load %arg5[%c0_5, %c0_6] : memref<16x32xf32, #tpu.memory_space<vmem>>, vector<16x32xf32>
    %8 = arith.addf %6, %7 : vector<16x32xf32>
    %c0_7 = arith.constant 0 : index
    %c0_8 = arith.constant 0 : index
    %9 = vector.load %arg6[%c0_7, %c0_8] : memref<16x32xf32, #tpu.memory_space<vmem>>, vector<16x32xf32>
    tpu.vector_store %arg6[%c0_7, %c0_8], %8 {strides = array<i32>} : memref<16x32xf32, #tpu.memory_space<vmem>>, vector<16x32xf32>,
    return
  }
  func.func @transform_0(%arg0: i32, %arg1: i32) -> (i32, i32) {
    %c0_i32 = arith.constant 0 : i32
    %c0_i32_0 = arith.constant 0 : i32
    return %arg0, %c0_i32 : i32, i32
  }
  func.func @transform_1(%arg0: i32, %arg1: i32) -> (i32, i32) {
    %c0_i32 = arith.constant 0 : i32
    %c0_i32_0 = arith.constant 0 : i32
    return %c0_i32, %arg1 : i32, i32
  }
  func.func @transform_2(%arg0: i32, %arg1: i32) -> (i32, i32) {
    %c0_i32 = arith.constant 0 : i32
    %c0_i32_0 = arith.constant 0 : i32
    return %c0_i32, %arg1 : i32, i32
  }
  func.func @transform_3(%arg0: i32, %arg1: i32) -> (i32, i32) {
    %c0_i32 = arith.constant 0 : i32
    return %arg0, %arg1 : i32, i32
  }
  func.func @transform_4(%arg0: i32, %arg1: i32) -> (i32, i32) {
    %c0_i32 = arith.constant 0 : i32
    return %arg0, %arg1 : i32, i32
  }
}

module attributes {stable_mosaic.version = 11 : i64} {
  func.func @_linear_kernel(%arg0: i32, %arg1: i32, %arg2: memref<16x32xf32, #tpu.memory_space<vmem>>, %arg3: memref<32x32xbf16, #tpu.memory_space<vmem>>, %arg4: memref<1x32xf32, #tpu.memory_space<vmem>>, %arg5: memref<1x32xf32, #tpu.memory_space<vmem>>, %arg6: memref<1x32xf32, #tpu.memory_space<vmem>>, %arg7: memref<16x32xf32, #tpu.memory_space<vmem>>) attributes {dimension_semantics = [#tpu.dimension_semantics<parallel>, #tpu.dimension_semantics<parallel>], iteration_bounds = array<i64: 1, 1>, scalar_prefetch = 0 : i64, scratch_operands = 0 : i64, tpu.core_type = #tpu.core_type<tc>, window_params = [{transform_indices = @transform_0, window_bounds = array<i64: 16, 32>}, {transform_indices = @transform_1, window_bounds = array<i64: 32, 32>}, {transform_indices = @transform_2, window_bounds = array<i64: 1, 32>}, {pipeline_mode = #tpu.pipeline_mode<synchronous>, transform_indices = @transform_3, window_bounds = array<i64: 1, 32>}, {pipeline_mode = #tpu.pipeline_mode<synchronous>, transform_indices = @transform_4, window_bounds = array<i64: 1, 32>}, {transform_indices = @transform_5, window_bounds = array<i64: 16, 32>}]} {
    %c0 = arith.constant 0 : index
    %c0_0 = arith.constant 0 : index
    %0 = vector.load %arg2[%c0, %c0_0] : memref<16x32xf32, #tpu.memory_space<vmem>>, vector<16x32xf32>
    %cst = arith.constant dense<0.000000e+00> : vector<16xf32>
    %1 = vector.multi_reduction <add>, %0, %cst [1] : vector<16x32xf32> to vector<16xf32>
    %2 = vector.shape_cast %1 : vector<16xf32> to vector<16x1xf32>
    %cst_1 = arith.constant 3.200000e+01 : f32
    %3 = vector.broadcast %cst_1 : f32 to vector<16x1xf32>
    %4 = arith.divf %2, %3 : vector<16x1xf32>
    %5 = vector.broadcast %4 : vector<16x1xf32> to vector<16x32xf32>
    %6 = arith.subf %0, %5 : vector<16x32xf32>
    %7 = arith.mulf %6, %6 : vector<16x32xf32>
    %cst_2 = arith.constant dense<0.000000e+00> : vector<16xf32>
    %8 = vector.multi_reduction <add>, %7, %cst_2 [1] : vector<16x32xf32> to vector<16xf32>
    %9 = vector.shape_cast %8 : vector<16xf32> to vector<16x1xf32>
    %cst_3 = arith.constant 3.200000e+01 : f32
    %10 = vector.broadcast %cst_3 : f32 to vector<16x1xf32>
    %11 = arith.divf %9, %10 : vector<16x1xf32>
    %cst_4 = arith.constant 9.99999974E-6 : f32
    %12 = vector.broadcast %cst_4 : f32 to vector<16x1xf32>
    %13 = arith.addf %11, %12 : vector<16x1xf32>
    %14 = math.rsqrt %13 : vector<16x1xf32>
    %15 = vector.broadcast %14 : vector<16x1xf32> to vector<16x32xf32>
    %16 = arith.mulf %6, %15 : vector<16x32xf32>
    %c0_5 = arith.constant 0 : index
    %c0_6 = arith.constant 0 : index
    %17 = vector.load %arg5[%c0_5, %c0_6] : memref<1x32xf32, #tpu.memory_space<vmem>>, vector<1x32xf32>
    %18 = vector.broadcast %17 : vector<1x32xf32> to vector<16x32xf32>
    %19 = arith.mulf %16, %18 : vector<16x32xf32>
    %c0_7 = arith.constant 0 : index
    %c0_8 = arith.constant 0 : index
    %20 = vector.load %arg6[%c0_7, %c0_8] : memref<1x32xf32, #tpu.memory_space<vmem>>, vector<1x32xf32>
    %21 = vector.broadcast %20 : vector<1x32xf32> to vector<16x32xf32>
    %22 = arith.addf %19, %21 : vector<16x32xf32>
    %23 = arith.truncf %22 : vector<16x32xf32> to vector<16x32xbf16>
    %c0_9 = arith.constant 0 : index
    %c0_10 = arith.constant 0 : index
    %24 = vector.load %arg3[%c0_9, %c0_10] : memref<32x32xbf16, #tpu.memory_space<vmem>>, vector<32x32xbf16>
    %cst_11 = arith.constant dense<0.000000e+00> : vector<16x32xf32>
    %25 = tpu.matmul %23, %24, %cst_11 {dimension_numbers = #tpu.dot_dimension_numbers<[1], [0], [0], [1], [0, 0, 1, 1], [], []>} : vector<16x32xbf16>, vector<32x32xbf16>, vector<16x32xf32> -> vector<16x32xf32>
    %c0_12 = arith.constant 0 : index
    %c0_13 = arith.constant 0 : index
    %26 = vector.load %arg4[%c0_12, %c0_13] : memref<1x32xf32, #tpu.memory_space<vmem>>, vector<1x32xf32>
    %27 = vector.broadcast %26 : vector<1x32xf32> to vector<16x32xf32>
    %28 = arith.addf %25, %27 : vector<16x32xf32>
    %c0_14 = arith.constant 0 : index
    %c0_15 = arith.constant 0 : index
    %29 = vector.load %arg7[%c0_14, %c0_15] : memref<16x32xf32, #tpu.memory_space<vmem>>, vector<16x32xf32>
    tpu.vector_store %arg7[%c0_14, %c0_15], %28 {strides = array<i32>} : memref<16x32xf32, #tpu.memory_space<vmem>>, vector<16x32xf32>,
    return
  }
  func.func @transform_0(%arg0: i32, %arg1: i32) -> (i32, i32) {
    %c0_i32 = arith.constant 0 : i32
    %c0_i32_0 = arith.constant 0 : i32
    return %arg0, %c0_i32 : i32, i32
  }
  func.func @transform_1(%arg0: i32, %arg1: i32) -> (i32, i32) {
    %c0_i32 = arith.constant 0 : i32
    %c0_i32_0 = arith.constant 0 : i32
    return %c0_i32, %arg1 : i32, i32
  }
  func.func @transform_2(%arg0: i32, %arg1: i32) -> (i32, i32) {
    %c0_i32 = arith.constant 0 : i32
    %c0_i32_0 = arith.constant 0 : i32
    return %c0_i32, %arg1 : i32, i32
  }
  func.func @transform_3(%arg0: i32, %arg1: i32) -> (i32, i32) {
    %c0_i32 = arith.constant 0 : i32
    %c0_i32_0 = arith.constant 0 : i32
    %c0_i32_1 = arith.constant 0 : i32
    return %c0_i32, %c0_i32_0 : i32, i32
  }
  func.func @transform_4(%arg0: i32, %arg1: i32) -> (i32, i32) {
    %c0_i32 = arith.constant 0 : i32
    %c0_i32_0 = arith.constant 0 : i32
    %c0_i32_1 = arith.constant 0 : i32
    return %c0_i32, %c0_i32_0 : i32, i32
  }
  func.func @transform_5(%arg0: i32, %arg1: i32) -> (i32, i32) {
    %c0_i32 = arith.constant 0 : i32
    return %arg0, %arg1 : i32, i32
  }
}

module attributes {stable_mosaic.version = 11 : i64} {
  func.func @_linear_kernel(%arg0: i32, %arg1: i32, %arg2: memref<32x24xf32, #tpu.memory_space<vmem>>, %arg3: memref<24x32xbf16, #tpu.memory_space<vmem>>, %arg4: memref<1x32xf32, #tpu.memory_space<vmem>>, %arg5: memref<32x32xf32, #tpu.memory_space<vmem>>) attributes {dimension_semantics = [#tpu.dimension_semantics<parallel>, #tpu.dimension_semantics<parallel>], iteration_bounds = array<i64: 1, 1>, scalar_prefetch = 0 : i64, scratch_operands = 0 : i64, tpu.core_type = #tpu.core_type<tc>, window_params = [{transform_indices = @transform_0, window_bounds = array<i64: 32, 24>}, {transform_indices = @transform_1, window_bounds = array<i64: 24, 32>}, {transform_indices = @transform_2, window_bounds = array<i64: 1, 32>}, {transform_indices = @transform_3, window_bounds = array<i64: 32, 32>}]} {
    %c0 = arith.constant 0 : index
    %c0_0 = arith.constant 0 : index
    %0 = vector.load %arg2[%c0, %c0_0] : memref<32x24xf32, #tpu.memory_space<vmem>>, vector<32x24xf32>
    %1 = arith.truncf %0 : vector<32x24xf32> to vector<32x24xbf16>
    %c0_1 = arith.constant 0 : index
    %c0_2 = arith.constant 0 : index
    %2 = vector.load %arg3[%c0_1, %c0_2] : memref<24x32xbf16, #tpu.memory_space<vmem>>, vector<24x32xbf16>
    %cst = arith.constant dense<0.000000e+00> : vector<32x32xf32>
    %3 = tpu.matmul %1, %2, %cst {dimension_numbers = #tpu.dot_dimension_numbers<[1], [0], [0], [1], [0, 0, 1, 1], [], []>} : vector<32x24xbf16>, vector<24x32xbf16>, vector<32x32xf32> -> vector<32x32xf32>
    %c0_3 = arith.constant 0 : index
    %c0_4 = arith.constant 0 : index
    %4 = vector.load %arg4[%c0_3, %c0_4] : memref<1x32xf32, #tpu.memory_space<vmem>>, vector<1x32xf32>
    %5 = vector.broadcast %4 : vector<1x32xf32> to vector<32x32xf32>
    %6 = arith.addf %3, %5 : vector<32x32xf32>
    %cst_5 = arith.constant 5.000000e-01 : f32
    %7 = vector.broadcast %cst_5 : f32 to vector<32x32xf32>
    %8 = arith.mulf %7, %6 : vector<32x32xf32>
    %cst_6 = arith.constant 0.707106769 : f32
    %9 = vector.broadcast %cst_6 : f32 to vector<32x32xf32>
    %10 = arith.mulf %6, %9 : vector<32x32xf32>
    %cst_7 = arith.constant 0.000000e+00 : f32
    %11 = vector.broadcast %cst_7 : f32 to vector<32x32xf32>
    %12 = arith.cmpf olt, %10, %11 : vector<32x32xf32>
    %cst_8 = arith.constant -1.000000e+00 : f32
    %cst_9 = arith.constant 1.000000e+00 : f32
    %13 = vector.broadcast %cst_8 : f32 to vector<32x32xf32>
    %14 = vector.broadcast %cst_9 : f32 to vector<32x32xf32>
    %15 = arith.select %12, %13, %14 : vector<32x32xi1>, vector<32x32xf32>
    %16 = math.absf %10 : vector<32x32xf32>
    %cst_10 = arith.constant 0.327591091 : f32
    %17 = vector.broadcast %cst_10 : f32 to vector<32x32xf32>
    %18 = arith.mulf %17, %16 : vector<32x32xf32>
    %cst_11 = arith.constant 1.000000e+00 : f32
    %19 = vector.broadcast %cst_11 : f32 to vector<32x32xf32>
    %20 = arith.addf %19, %18 : vector<32x32xf32>
    %21 = tpu.reciprocal %20 {approx = true} : vector<32x32xf32> -> vector<32x32xf32>
    %cst_12 = arith.constant 1.06140542 : f32
    %22 = vector.broadcast %cst_12 : f32 to vector<32x32xf32>
    %23 = arith.mulf %22, %21 : vector<32x32xf32>
    %cst_13 = arith.constant -1.45315206 : f32
    %24 = vector.broadcast %cst_13 : f32 to vector<32x32xf32>
    %25 = arith.addf %23, %24 : vector<32x32xf32>
    %26 = arith.mulf %25, %21 : vector<32x32xf32>
    %cst_14 = arith.constant 1.42141378 : f32
    %27 = vector.broadcast %cst_14 : f32 to vector<32x32xf32>
    %28 = arith.addf %26, %27 : vector<32x32xf32>
    %29 = arith.mulf %28, %21 : vector<32x32xf32>
    %cst_15 = arith.constant -0.284496725 : f32
    %30 = vector.broadcast %cst_15 : f32 to vector<32x32xf32>
    %31 = arith.addf %29, %30 : vector<32x32xf32>
    %32 = arith.mulf %31, %21 : vector<32x32xf32>
    %cst_16 = arith.constant 0.254829586 : f32
    %33 = vector.broadcast %cst_16 : f32 to vector<32x32xf32>
    %34 = arith.addf %32, %33 : vector<32x32xf32>
    %35 = arith.mulf %34, %21 : vector<32x32xf32>
    %cst_17 = arith.constant 0.000000e+00 : f32
    %36 = vector.broadcast %cst_17 : f32 to vector<32x32xf32>
    %37 = arith.subf %36, %16 : vector<32x32xf32>
    %38 = arith.mulf %37, %16 : vector<32x32xf32>
    %39 = math.exp %38 : vector<32x32xf32>
    %40 = arith.mulf %35, %39 : vector<32x32xf32>
    %cst_18 = arith.constant 1.000000e+00 : f32
    %41 = vector.broadcast %cst_18 : f32 to vector<32x32xf32>
    %42 = arith.subf %41, %40 : vector<32x32xf32>
    %43 = arith.mulf %15, %42 : vector<32x32xf32>
    %cst_19 = arith.constant 1.000000e+00 : f32
    %44 = vector.broadcast %cst_19 : f32 to vector<32x32xf32>
    %45 = arith.addf %44, %43 : vector<32x32xf32>
    %46 = arith.mulf %8, %45 : vector<32x32xf32>
    %c0_20 = arith.constant 0 : index
    %c0_21 = arith.constant 0 : index
    %47 = vector.load %arg5[%c0_20, %c0_21] : memref<32x32xf32, #tpu.memory_space<vmem>>, vector<32x32xf32>
    tpu.vector_store %arg5[%c0_20, %c0_21], %46 {strides = array<i32>} : memref<32x32xf32, #tpu.memory_space<vmem>>, vector<32x32xf32>,
    return
  }
  func.func @transform_0(%arg0: i32, %arg1: i32) -> (i32, i32) {
    %c0_i32 = arith.constant 0 : i32
    %c0_i32_0 = arith.constant 0 : i32
    return %arg0, %c0_i32 : i32, i32
  }
  func.func @transform_1(%arg0: i32, %arg1: i32) -> (i32, i32) {
    %c0_i32 = arith.constant 0 : i32
    %c0_i32_0 = arith.constant 0 : i32
    return %c0_i32, %arg1 : i32, i32
  }
  func.func @transform_2(%arg0: i32, %arg1: i32) -> (i32, i32) {
    %c0_i32 = arith.constant 0 : i32
    %c0_i32_0 = arith.constant 0 : i32
    return %c0_i32, %arg1 : i32, i32
  }
  func.func @transform_3(%arg0: i32, %arg1: i32) -> (i32, i32) {
    %c0_i32 = arith.constant 0 : i32
    return %arg0, %arg1 : i32, i32
  }
}

module attributes {stable_mosaic.version = 11 : i64} {
  func.func @_linear_kernel(%arg0: i32, %arg1: i32, %arg2: memref<16x96xf32, #tpu.memory_space<vmem>>, %arg3: memref<96x32xbf16, #tpu.memory_space<vmem>>, %arg4: memref<1x32xf32, #tpu.memory_space<vmem>>, %arg5: memref<16x32xf32, #tpu.memory_space<vmem>>) attributes {dimension_semantics = [#tpu.dimension_semantics<parallel>, #tpu.dimension_semantics<parallel>], iteration_bounds = array<i64: 1, 1>, scalar_prefetch = 0 : i64, scratch_operands = 0 : i64, tpu.core_type = #tpu.core_type<tc>, window_params = [{transform_indices = @transform_0, window_bounds = array<i64: 16, 96>}, {transform_indices = @transform_1, window_bounds = array<i64: 96, 32>}, {transform_indices = @transform_2, window_bounds = array<i64: 1, 32>}, {transform_indices = @transform_3, window_bounds = array<i64: 16, 32>}]} {
    %c0 = arith.constant 0 : index
    %c0_0 = arith.constant 0 : index
    %0 = vector.load %arg2[%c0, %c0_0] : memref<16x96xf32, #tpu.memory_space<vmem>>, vector<16x96xf32>
    %1 = arith.truncf %0 : vector<16x96xf32> to vector<16x96xbf16>
    %c0_1 = arith.constant 0 : index
    %c0_2 = arith.constant 0 : index
    %2 = vector.load %arg3[%c0_1, %c0_2] : memref<96x32xbf16, #tpu.memory_space<vmem>>, vector<96x32xbf16>
    %cst = arith.constant dense<0.000000e+00> : vector<16x32xf32>
    %3 = tpu.matmul %1, %2, %cst {dimension_numbers = #tpu.dot_dimension_numbers<[1], [0], [0], [1], [0, 0, 1, 1], [], []>} : vector<16x96xbf16>, vector<96x32xbf16>, vector<16x32xf32> -> vector<16x32xf32>
    %c0_3 = arith.constant 0 : index
    %c0_4 = arith.constant 0 : index
    %4 = vector.load %arg4[%c0_3, %c0_4] : memref<1x32xf32, #tpu.memory_space<vmem>>, vector<1x32xf32>
    %5 = vector.broadcast %4 : vector<1x32xf32> to vector<16x32xf32>
    %6 = arith.addf %3, %5 : vector<16x32xf32>
    %cst_5 = arith.constant 5.000000e-01 : f32
    %7 = vector.broadcast %cst_5 : f32 to vector<16x32xf32>
    %8 = arith.mulf %7, %6 : vector<16x32xf32>
    %cst_6 = arith.constant 0.707106769 : f32
    %9 = vector.broadcast %cst_6 : f32 to vector<16x32xf32>
    %10 = arith.mulf %6, %9 : vector<16x32xf32>
    %cst_7 = arith.constant 0.000000e+00 : f32
    %11 = vector.broadcast %cst_7 : f32 to vector<16x32xf32>
    %12 = arith.cmpf olt, %10, %11 : vector<16x32xf32>
    %cst_8 = arith.constant -1.000000e+00 : f32
    %cst_9 = arith.constant 1.000000e+00 : f32
    %13 = vector.broadcast %cst_8 : f32 to vector<16x32xf32>
    %14 = vector.broadcast %cst_9 : f32 to vector<16x32xf32>
    %15 = arith.select %12, %13, %14 : vector<16x32xi1>, vector<16x32xf32>
    %16 = math.absf %10 : vector<16x32xf32>
    %cst_10 = arith.constant 0.327591091 : f32
    %17 = vector.broadcast %cst_10 : f32 to vector<16x32xf32>
    %18 = arith.mulf %17, %16 : vector<16x32xf32>
    %cst_11 = arith.constant 1.000000e+00 : f32
    %19 = vector.broadcast %cst_11 : f32 to vector<16x32xf32>
    %20 = arith.addf %19, %18 : vector<16x32xf32>
    %21 = tpu.reciprocal %20 {approx = true} : vector<16x32xf32> -> vector<16x32xf32>
    %cst_12 = arith.constant 1.06140542 : f32
    %22 = vector.broadcast %cst_12 : f32 to vector<16x32xf32>
    %23 = arith.mulf %22, %21 : vector<16x32xf32>
    %cst_13 = arith.constant -1.45315206 : f32
    %24 = vector.broadcast %cst_13 : f32 to vector<16x32xf32>
    %25 = arith.addf %23, %24 : vector<16x32xf32>
    %26 = arith.mulf %25, %21 : vector<16x32xf32>
    %cst_14 = arith.constant 1.42141378 : f32
    %27 = vector.broadcast %cst_14 : f32 to vector<16x32xf32>
    %28 = arith.addf %26, %27 : vector<16x32xf32>
    %29 = arith.mulf %28, %21 : vector<16x32xf32>
    %cst_15 = arith.constant -0.284496725 : f32
    %30 = vector.broadcast %cst_15 : f32 to vector<16x32xf32>
    %31 = arith.addf %29, %30 : vector<16x32xf32>
    %32 = arith.mulf %31, %21 : vector<16x32xf32>
    %cst_16 = arith.constant 0.254829586 : f32
    %33 = vector.broadcast %cst_16 : f32 to vector<16x32xf32>
    %34 = arith.addf %32, %33 : vector<16x32xf32>
    %35 = arith.mulf %34, %21 : vector<16x32xf32>
    %cst_17 = arith.constant 0.000000e+00 : f32
    %36 = vector.broadcast %cst_17 : f32 to vector<16x32xf32>
    %37 = arith.subf %36, %16 : vector<16x32xf32>
    %38 = arith.mulf %37, %16 : vector<16x32xf32>
    %39 = math.exp %38 : vector<16x32xf32>
    %40 = arith.mulf %35, %39 : vector<16x32xf32>
    %cst_18 = arith.constant 1.000000e+00 : f32
    %41 = vector.broadcast %cst_18 : f32 to vector<16x32xf32>
    %42 = arith.subf %41, %40 : vector<16x32xf32>
    %43 = arith.mulf %15, %42 : vector<16x32xf32>
    %cst_19 = arith.constant 1.000000e+00 : f32
    %44 = vector.broadcast %cst_19 : f32 to vector<16x32xf32>
    %45 = arith.addf %44, %43 : vector<16x32xf32>
    %46 = arith.mulf %8, %45 : vector<16x32xf32>
    %c0_20 = arith.constant 0 : index
    %c0_21 = arith.constant 0 : index
    %47 = vector.load %arg5[%c0_20, %c0_21] : memref<16x32xf32, #tpu.memory_space<vmem>>, vector<16x32xf32>
    tpu.vector_store %arg5[%c0_20, %c0_21], %46 {strides = array<i32>} : memref<16x32xf32, #tpu.memory_space<vmem>>, vector<16x32xf32>,
    return
  }
  func.func @transform_0(%arg0: i32, %arg1: i32) -> (i32, i32) {
    %c0_i32 = arith.constant 0 : i32
    %c0_i32_0 = arith.constant 0 : i32
    return %arg0, %c0_i32 : i32, i32
  }
  func.func @transform_1(%arg0: i32, %arg1: i32) -> (i32, i32) {
    %c0_i32 = arith.constant 0 : i32
    %c0_i32_0 = arith.constant 0 : i32
    return %c0_i32, %arg1 : i32, i32
  }
  func.func @transform_2(%arg0: i32, %arg1: i32) -> (i32, i32) {
    %c0_i32 = arith.constant 0 : i32
    %c0_i32_0 = arith.constant 0 : i32
    return %c0_i32, %arg1 : i32, i32
  }
  func.func @transform_3(%arg0: i32, %arg1: i32) -> (i32, i32) {
    %c0_i32 = arith.constant 0 : i32
    return %arg0, %arg1 : i32, i32
  }
}

module attributes {stable_mosaic.version = 11 : i64} {
  func.func @_attention_kernel(%arg0: i32, %arg1: memref<8x8x8xf32, #tpu.memory_space<vmem>>, %arg2: memref<8x8x8xf32, #tpu.memory_space<vmem>>, %arg3: memref<8x8x8xf32, #tpu.memory_space<vmem>>, %arg4: memref<8x8x8xf32, #tpu.memory_space<vmem>>) attributes {dimension_semantics = [#tpu.dimension_semantics<parallel>], iteration_bounds = array<i64: 1>, scalar_prefetch = 0 : i64, scratch_operands = 0 : i64, tpu.core_type = #tpu.core_type<tc>, window_params = [{transform_indices = @transform_0, window_bounds = array<i64: 8, 8, 8>}, {transform_indices = @transform_1, window_bounds = array<i64: 8, 8, 8>}, {transform_indices = @transform_2, window_bounds = array<i64: 8, 8, 8>}, {transform_indices = @transform_3, window_bounds = array<i64: 8, 8, 8>}]} {
    %c0 = arith.constant 0 : index
    %c0_0 = arith.constant 0 : index
    %c0_1 = arith.constant 0 : index
    %0 = vector.load %arg1[%c0, %c0_0, %c0_1] : memref<8x8x8xf32, #tpu.memory_space<vmem>>, vector<8x8x8xf32>
    %cst = arith.constant 0.353553385 : f32
    %1 = vector.broadcast %cst : f32 to vector<8x8x8xf32>
    %2 = arith.mulf %0, %1 : vector<8x8x8xf32>
    %3 = arith.truncf %2 : vector<8x8x8xf32> to vector<8x8x8xbf16>
    %c0_2 = arith.constant 0 : index
    %c0_3 = arith.constant 0 : index
    %c0_4 = arith.constant 0 : index
    %4 = vector.load %arg2[%c0_2, %c0_3, %c0_4] : memref<8x8x8xf32, #tpu.memory_space<vmem>>, vector<8x8x8xf32>
    %5 = arith.truncf %4 : vector<8x8x8xf32> to vector<8x8x8xbf16>
    "tpu.trace_start"() <{level = 10 : i32, message = "hqd,hkd->hqk"}> : () -> ()
    %cst_5 = arith.constant dense<0.000000e+00> : vector<8x8x8xf32>
    %6 = tpu.matmul %3, %5, %cst_5 {dimension_numbers = #tpu.dot_dimension_numbers<[2], [2], [1], [1], [0, 0, 0, 1, 1, 1], [0], [0]>} : vector<8x8x8xbf16>, vector<8x8x8xbf16>, vector<8x8x8xf32> -> vector<8x8x8xf32>
    "tpu.trace_stop"() : () -> ()
    %cst_6 = arith.constant dense<0xFF800000> : vector<8x8xf32>
    %7 = vector.multi_reduction <maximumf>, %6, %cst_6 [2] : vector<8x8x8xf32> to vector<8x8xf32>
    %8 = vector.shape_cast %7 : vector<8x8xf32> to vector<8x8x1xf32>
    %9 = vector.broadcast %8 : vector<8x8x1xf32> to vector<8x8x8xf32>
    %10 = arith.subf %6, %9 : vector<8x8x8xf32>
    %11 = math.exp %10 : vector<8x8x8xf32>
    %cst_7 = arith.constant dense<0.000000e+00> : vector<8x8xf32>
    %12 = vector.multi_reduction <add>, %11, %cst_7 [2] : vector<8x8x8xf32> to vector<8x8xf32>
    %13 = vector.shape_cast %12 : vector<8x8xf32> to vector<8x8x1xf32>
    %14 = tpu.reciprocal %13 {approx = true} : vector<8x8x1xf32> -> vector<8x8x1xf32>
    %15 = vector.broadcast %14 : vector<8x8x1xf32> to vector<8x8x8xf32>
    %16 = arith.mulf %11, %15 : vector<8x8x8xf32>
    %17 = arith.truncf %16 : vector<8x8x8xf32> to vector<8x8x8xbf16>
    %c0_8 = arith.constant 0 : index
    %c0_9 = arith.constant 0 : index
    %c0_10 = arith.constant 0 : index
    %18 = vector.load %arg3[%c0_8, %c0_9, %c0_10] : memref<8x8x8xf32, #tpu.memory_space<vmem>>, vector<8x8x8xf32>
    %19 = arith.truncf %18 : vector<8x8x8xf32> to vector<8x8x8xbf16>
    "tpu.trace_start"() <{level = 10 : i32, message = "hqk,hkd->hqd"}> : () -> ()
    %cst_11 = arith.constant dense<0.000000e+00> : vector<8x8x8xf32>
    %20 = tpu.matmul %17, %19, %cst_11 {dimension_numbers = #tpu.dot_dimension_numbers<[2], [1], [1], [2], [0, 0, 0, 1, 1, 2], [0], [0]>} : vector<8x8x8xbf16>, vector<8x8x8xbf16>, vector<8x8x8xf32> -> vector<8x8x8xf32>
    "tpu.trace_stop"() : () -> ()
    %c0_12 = arith.constant 0 : index
    %c0_13 = arith.constant 0 : index
    %c0_14 = arith.constant 0 : index
    %21 = vector.load %arg4[%c0_12, %c0_13, %c0_14] : memref<8x8x8xf32, #tpu.memory_space<vmem>>, vector<8x8x8xf32>
    tpu.vector_store %arg4[%c0_12, %c0_13, %c0_14], %20 {strides = array<i32>} : memref<8x8x8xf32, #tpu.memory_space<vmem>>, vector<8x8x8xf32>,
    return
  }
  func.func @transform_0(%arg0: i32) -> (i32, i32, i32) {
    %c0_i32 = arith.constant 0 : i32
    %c0_i32_0 = arith.constant 0 : i32
    %c0_i32_1 = arith.constant 0 : i32
    return %arg0, %c0_i32, %c0_i32_0 : i32, i32, i32
  }
  func.func @transform_1(%arg0: i32) -> (i32, i32, i32) {
    %c0_i32 = arith.constant 0 : i32
    %c0_i32_0 = arith.constant 0 : i32
    %c0_i32_1 = arith.constant 0 : i32
    return %arg0, %c0_i32, %c0_i32_0 : i32, i32, i32
  }
  func.func @transform_2(%arg0: i32) -> (i32, i32, i32) {
    %c0_i32 = arith.constant 0 : i32
    %c0_i32_0 = arith.constant 0 : i32
    %c0_i32_1 = arith.constant 0 : i32
    return %arg0, %c0_i32, %c0_i32_0 : i32, i32, i32
  }
  func.func @transform_3(%arg0: i32) -> (i32, i32, i32) {
    %c0_i32 = arith.constant 0 : i32
    %c0_i32_0 = arith.constant 0 : i32
    %c0_i32_1 = arith.constant 0 : i32
    return %arg0, %c0_i32, %c0_i32_0 : i32, i32, i32
  }
}

module attributes {stable_mosaic.version = 11 : i64} {
  func.func @_linear_kernel(%arg0: i32, %arg1: i32, %arg2: memref<16x32xf32, #tpu.memory_space<vmem>>, %arg3: memref<32x128xbf16, #tpu.memory_space<vmem>>, %arg4: memref<1x128xf32, #tpu.memory_space<vmem>>, %arg5: memref<1x32xf32, #tpu.memory_space<vmem>>, %arg6: memref<1x32xf32, #tpu.memory_space<vmem>>, %arg7: memref<16x128xf32, #tpu.memory_space<vmem>>) attributes {dimension_semantics = [#tpu.dimension_semantics<parallel>, #tpu.dimension_semantics<parallel>], iteration_bounds = array<i64: 1, 1>, scalar_prefetch = 0 : i64, scratch_operands = 0 : i64, tpu.core_type = #tpu.core_type<tc>, window_params = [{transform_indices = @transform_0, window_bounds = array<i64: 16, 32>}, {transform_indices = @transform_1, window_bounds = array<i64: 32, 128>}, {transform_indices = @transform_2, window_bounds = array<i64: 1, 128>}, {pipeline_mode = #tpu.pipeline_mode<synchronous>, transform_indices = @transform_3, window_bounds = array<i64: 1, 32>}, {pipeline_mode = #tpu.pipeline_mode<synchronous>, transform_indices = @transform_4, window_bounds = array<i64: 1, 32>}, {transform_indices = @transform_5, window_bounds = array<i64: 16, 128>}]} {
    %c0 = arith.constant 0 : index
    %c0_0 = arith.constant 0 : index
    %0 = vector.load %arg2[%c0, %c0_0] : memref<16x32xf32, #tpu.memory_space<vmem>>, vector<16x32xf32>
    %cst = arith.constant dense<0.000000e+00> : vector<16xf32>
    %1 = vector.multi_reduction <add>, %0, %cst [1] : vector<16x32xf32> to vector<16xf32>
    %2 = vector.shape_cast %1 : vector<16xf32> to vector<16x1xf32>
    %cst_1 = arith.constant 3.200000e+01 : f32
    %3 = vector.broadcast %cst_1 : f32 to vector<16x1xf32>
    %4 = arith.divf %2, %3 : vector<16x1xf32>
    %5 = vector.broadcast %4 : vector<16x1xf32> to vector<16x32xf32>
    %6 = arith.subf %0, %5 : vector<16x32xf32>
    %7 = arith.mulf %6, %6 : vector<16x32xf32>
    %cst_2 = arith.constant dense<0.000000e+00> : vector<16xf32>
    %8 = vector.multi_reduction <add>, %7, %cst_2 [1] : vector<16x32xf32> to vector<16xf32>
    %9 = vector.shape_cast %8 : vector<16xf32> to vector<16x1xf32>
    %cst_3 = arith.constant 3.200000e+01 : f32
    %10 = vector.broadcast %cst_3 : f32 to vector<16x1xf32>
    %11 = arith.divf %9, %10 : vector<16x1xf32>
    %cst_4 = arith.constant 9.99999974E-6 : f32
    %12 = vector.broadcast %cst_4 : f32 to vector<16x1xf32>
    %13 = arith.addf %11, %12 : vector<16x1xf32>
    %14 = math.rsqrt %13 : vector<16x1xf32>
    %15 = vector.broadcast %14 : vector<16x1xf32> to vector<16x32xf32>
    %16 = arith.mulf %6, %15 : vector<16x32xf32>
    %c0_5 = arith.constant 0 : index
    %c0_6 = arith.constant 0 : index
    %17 = vector.load %arg5[%c0_5, %c0_6] : memref<1x32xf32, #tpu.memory_space<vmem>>, vector<1x32xf32>
    %18 = vector.broadcast %17 : vector<1x32xf32> to vector<16x32xf32>
    %19 = arith.mulf %16, %18 : vector<16x32xf32>
    %c0_7 = arith.constant 0 : index
    %c0_8 = arith.constant 0 : index
    %20 = vector.load %arg6[%c0_7, %c0_8] : memref<1x32xf32, #tpu.memory_space<vmem>>, vector<1x32xf32>
    %21 = vector.broadcast %20 : vector<1x32xf32> to vector<16x32xf32>
    %22 = arith.addf %19, %21 : vector<16x32xf32>
    %23 = arith.truncf %22 : vector<16x32xf32> to vector<16x32xbf16>
    %c0_9 = arith.constant 0 : index
    %c0_10 = arith.constant 0 : index
    %24 = vector.load %arg3[%c0_9, %c0_10] : memref<32x128xbf16, #tpu.memory_space<vmem>>, vector<32x128xbf16>
    %cst_11 = arith.constant dense<0.000000e+00> : vector<16x128xf32>
    %25 = tpu.matmul %23, %24, %cst_11 {dimension_numbers = #tpu.dot_dimension_numbers<[1], [0], [0], [1], [0, 0, 1, 1], [], []>} : vector<16x32xbf16>, vector<32x128xbf16>, vector<16x128xf32> -> vector<16x128xf32>
    %c0_12 = arith.constant 0 : index
    %c0_13 = arith.constant 0 : index
    %26 = vector.load %arg4[%c0_12, %c0_13] : memref<1x128xf32, #tpu.memory_space<vmem>>, vector<1x128xf32>
    %27 = vector.broadcast %26 : vector<1x128xf32> to vector<16x128xf32>
    %28 = arith.addf %25, %27 : vector<16x128xf32>
    %cst_14 = arith.constant 5.000000e-01 : f32
    %29 = vector.broadcast %cst_14 : f32 to vector<16x128xf32>
    %30 = arith.mulf %29, %28 : vector<16x128xf32>
    %cst_15 = arith.constant 0.707106769 : f32
    %31 = vector.broadcast %cst_15 : f32 to vector<16x128xf32>
    %32 = arith.mulf %28, %31 : vector<16x128xf32>
    %cst_16 = arith.constant 0.000000e+00 : f32
    %33 = vector.broadcast %cst_16 : f32 to vector<16x128xf32>
    %34 = arith.cmpf olt, %32, %33 : vector<16x128xf32>
    %cst_17 = arith.constant -1.000000e+00 : f32
    %cst_18 = arith.constant 1.000000e+00 : f32
    %35 = vector.broadcast %cst_17 : f32 to vector<16x128xf32>
    %36 = vector.broadcast %cst_18 : f32 to vector<16x128xf32>
    %37 = arith.select %34, %35, %36 : vector<16x128xi1>, vector<16x128xf32>
    %38 = math.absf %32 : vector<16x128xf32>
    %cst_19 = arith.constant 0.327591091 : f32
    %39 = vector.broadcast %cst_19 : f32 to vector<16x128xf32>
    %40 = arith.mulf %39, %38 : vector<16x128xf32>
    %cst_20 = arith.constant 1.000000e+00 : f32
    %41 = vector.broadcast %cst_20 : f32 to vector<16x128xf32>
    %42 = arith.addf %41, %40 : vector<16x128xf32>
    %43 = tpu.reciprocal %42 {approx = true} : vector<16x128xf32> -> vector<16x128xf32>
    %cst_21 = arith.constant 1.06140542 : f32
    %44 = vector.broadcast %cst_21 : f32 to vector<16x128xf32>
    %45 = arith.mulf %44, %43 : vector<16x128xf32>
    %cst_22 = arith.constant -1.45315206 : f32
    %46 = vector.broadcast %cst_22 : f32 to vector<16x128xf32>
    %47 = arith.addf %45, %46 : vector<16x128xf32>
    %48 = arith.mulf %47, %43 : vector<16x128xf32>
    %cst_23 = arith.constant 1.42141378 : f32
    %49 = vector.broadcast %cst_23 : f32 to vector<16x128xf32>
    %50 = arith.addf %48, %49 : vector<16x128xf32>
    %51 = arith.mulf %50, %43 : vector<16x128xf32>
    %cst_24 = arith.constant -0.284496725 : f32
    %52 = vector.broadcast %cst_24 : f32 to vector<16x128xf32>
    %53 = arith.addf %51, %52 : vector<16x128xf32>
    %54 = arith.mulf %53, %43 : vector<16x128xf32>
    %cst_25 = arith.constant 0.254829586 : f32
    %55 = vector.broadcast %cst_25 : f32 to vector<16x128xf32>
    %56 = arith.addf %54, %55 : vector<16x128xf32>
    %57 = arith.mulf %56, %43 : vector<16x128xf32>
    %cst_26 = arith.constant 0.000000e+00 : f32
    %58 = vector.broadcast %cst_26 : f32 to vector<16x128xf32>
    %59 = arith.subf %58, %38 : vector<16x128xf32>
    %60 = arith.mulf %59, %38 : vector<16x128xf32>
    %61 = math.exp %60 : vector<16x128xf32>
    %62 = arith.mulf %57, %61 : vector<16x128xf32>
    %cst_27 = arith.constant 1.000000e+00 : f32
    %63 = vector.broadcast %cst_27 : f32 to vector<16x128xf32>
    %64 = arith.subf %63, %62 : vector<16x128xf32>
    %65 = arith.mulf %37, %64 : vector<16x128xf32>
    %cst_28 = arith.constant 1.000000e+00 : f32
    %66 = vector.broadcast %cst_28 : f32 to vector<16x128xf32>
    %67 = arith.addf %66, %65 : vector<16x128xf32>
    %68 = arith.mulf %30, %67 : vector<16x128xf32>
    %c0_29 = arith.constant 0 : index
    %c0_30 = arith.constant 0 : index
    %69 = vector.load %arg7[%c0_29, %c0_30] : memref<16x128xf32, #tpu.memory_space<vmem>>, vector<16x128xf32>
    tpu.vector_store %arg7[%c0_29, %c0_30], %68 {strides = array<i32>} : memref<16x128xf32, #tpu.memory_space<vmem>>, vector<16x128xf32>,
    return
  }
  func.func @transform_0(%arg0: i32, %arg1: i32) -> (i32, i32) {
    %c0_i32 = arith.constant 0 : i32
    %c0_i32_0 = arith.constant 0 : i32
    return %arg0, %c0_i32 : i32, i32
  }
  func.func @transform_1(%arg0: i32, %arg1: i32) -> (i32, i32) {
    %c0_i32 = arith.constant 0 : i32
    %c0_i32_0 = arith.constant 0 : i32
    return %c0_i32, %arg1 : i32, i32
  }
  func.func @transform_2(%arg0: i32, %arg1: i32) -> (i32, i32) {
    %c0_i32 = arith.constant 0 : i32
    %c0_i32_0 = arith.constant 0 : i32
    return %c0_i32, %arg1 : i32, i32
  }
  func.func @transform_3(%arg0: i32, %arg1: i32) -> (i32, i32) {
    %c0_i32 = arith.constant 0 : i32
    %c0_i32_0 = arith.constant 0 : i32
    %c0_i32_1 = arith.constant 0 : i32
    return %c0_i32, %c0_i32_0 : i32, i32
  }
  func.func @transform_4(%arg0: i32, %arg1: i32) -> (i32, i32) {
    %c0_i32 = arith.constant 0 : i32
    %c0_i32_0 = arith.constant 0 : i32
    %c0_i32_1 = arith.constant 0 : i32
    return %c0_i32, %c0_i32_0 : i32, i32
  }
  func.func @transform_5(%arg0: i32, %arg1: i32) -> (i32, i32) {
    %c0_i32 = arith.constant 0 : i32
    return %arg0, %arg1 : i32, i32
  }
}

module attributes {stable_mosaic.version = 11 : i64} {
  func.func @_linear_kernel(%arg0: i32, %arg1: i32, %arg2: memref<16x128xf32, #tpu.memory_space<vmem>>, %arg3: memref<128x32xbf16, #tpu.memory_space<vmem>>, %arg4: memref<1x32xf32, #tpu.memory_space<vmem>>, %arg5: memref<16x32xf32, #tpu.memory_space<vmem>>, %arg6: memref<16x32xf32, #tpu.memory_space<vmem>>) attributes {dimension_semantics = [#tpu.dimension_semantics<parallel>, #tpu.dimension_semantics<parallel>], iteration_bounds = array<i64: 1, 1>, scalar_prefetch = 0 : i64, scratch_operands = 0 : i64, tpu.core_type = #tpu.core_type<tc>, window_params = [{transform_indices = @transform_0, window_bounds = array<i64: 16, 128>}, {transform_indices = @transform_1, window_bounds = array<i64: 128, 32>}, {transform_indices = @transform_2, window_bounds = array<i64: 1, 32>}, {transform_indices = @transform_3, window_bounds = array<i64: 16, 32>}, {transform_indices = @transform_4, window_bounds = array<i64: 16, 32>}]} {
    %c0 = arith.constant 0 : index
    %c0_0 = arith.constant 0 : index
    %0 = vector.load %arg2[%c0, %c0_0] : memref<16x128xf32, #tpu.memory_space<vmem>>, vector<16x128xf32>
    %1 = arith.truncf %0 : vector<16x128xf32> to vector<16x128xbf16>
    %c0_1 = arith.constant 0 : index
    %c0_2 = arith.constant 0 : index
    %2 = vector.load %arg3[%c0_1, %c0_2] : memref<128x32xbf16, #tpu.memory_space<vmem>>, vector<128x32xbf16>
    %cst = arith.constant dense<0.000000e+00> : vector<16x32xf32>
    %3 = tpu.matmul %1, %2, %cst {dimension_numbers = #tpu.dot_dimension_numbers<[1], [0], [0], [1], [0, 0, 1, 1], [], []>} : vector<16x128xbf16>, vector<128x32xbf16>, vector<16x32xf32> -> vector<16x32xf32>
    %c0_3 = arith.constant 0 : index
    %c0_4 = arith.constant 0 : index
    %4 = vector.load %arg4[%c0_3, %c0_4] : memref<1x32xf32, #tpu.memory_space<vmem>>, vector<1x32xf32>
    %5 = vector.broadcast %4 : vector<1x32xf32> to vector<16x32xf32>
    %6 = arith.addf %3, %5 : vector<16x32xf32>
    %c0_5 = arith.constant 0 : index
    %c0_6 = arith.constant 0 : index
    %7 = vector.load %arg5[%c0_5, %c0_6] : memref<16x32xf32, #tpu.memory_space<vmem>>, vector<16x32xf32>
    %8 = arith.addf %6, %7 : vector<16x32xf32>
    %c0_7 = arith.constant 0 : index
    %c0_8 = arith.constant 0 : index
    %9 = vector.load %arg6[%c0_7, %c0_8] : memref<16x32xf32, #tpu.memory_space<vmem>>, vector<16x32xf32>
    tpu.vector_store %arg6[%c0_7, %c0_8], %8 {strides = array<i32>} : memref<16x32xf32, #tpu.memory_space<vmem>>, vector<16x32xf32>,
    return
  }
  func.func @transform_0(%arg0: i32, %arg1: i32) -> (i32, i32) {
    %c0_i32 = arith.constant 0 : i32
    %c0_i32_0 = arith.constant 0 : i32
    return %arg0, %c0_i32 : i32, i32
  }
  func.func @transform_1(%arg0: i32, %arg1: i32) -> (i32, i32) {
    %c0_i32 = arith.constant 0 : i32
    %c0_i32_0 = arith.constant 0 : i32
    return %c0_i32, %arg1 : i32, i32
  }
  func.func @transform_2(%arg0: i32, %arg1: i32) -> (i32, i32) {
    %c0_i32 = arith.constant 0 : i32
    %c0_i32_0 = arith.constant 0 : i32
    return %c0_i32, %arg1 : i32, i32
  }
  func.func @transform_3(%arg0: i32, %arg1: i32) -> (i32, i32) {
    %c0_i32 = arith.constant 0 : i32
    return %arg0, %arg1 : i32, i32
  }
  func.func @transform_4(%arg0: i32, %arg1: i32) -> (i32, i32) {
    %c0_i32 = arith.constant 0 : i32
    return %arg0, %arg1 : i32, i32
  }
}

module attributes {stable_mosaic.version = 11 : i64} {
  func.func @_layernorm_kernel(%arg0: i32, %arg1: memref<16x32xf32, #tpu.memory_space<vmem>>, %arg2: memref<1x32xf32, #tpu.memory_space<vmem>>, %arg3: memref<1x32xf32, #tpu.memory_space<vmem>>, %arg4: memref<16x32xf32, #tpu.memory_space<vmem>>) attributes {dimension_semantics = [#tpu.dimension_semantics<parallel>], iteration_bounds = array<i64: 1>, scalar_prefetch = 0 : i64, scratch_operands = 0 : i64, tpu.core_type = #tpu.core_type<tc>, window_params = [{transform_indices = @transform_0, window_bounds = array<i64: 16, 32>}, {pipeline_mode = #tpu.pipeline_mode<synchronous>, transform_indices = @transform_1, window_bounds = array<i64: 1, 32>}, {pipeline_mode = #tpu.pipeline_mode<synchronous>, transform_indices = @transform_2, window_bounds = array<i64: 1, 32>}, {transform_indices = @transform_3, window_bounds = array<i64: 16, 32>}]} {
    %c0 = arith.constant 0 : index
    %c0_0 = arith.constant 0 : index
    %0 = vector.load %arg1[%c0, %c0_0] : memref<16x32xf32, #tpu.memory_space<vmem>>, vector<16x32xf32>
    %cst = arith.constant dense<0.000000e+00> : vector<16xf32>
    %1 = vector.multi_reduction <add>, %0, %cst [1] : vector<16x32xf32> to vector<16xf32>
    %2 = vector.shape_cast %1 : vector<16xf32> to vector<16x1xf32>
    %cst_1 = arith.constant 3.200000e+01 : f32
    %3 = vector.broadcast %cst_1 : f32 to vector<16x1xf32>
    %4 = arith.divf %2, %3 : vector<16x1xf32>
    %5 = vector.broadcast %4 : vector<16x1xf32> to vector<16x32xf32>
    %6 = arith.subf %0, %5 : vector<16x32xf32>
    %7 = arith.mulf %6, %6 : vector<16x32xf32>
    %cst_2 = arith.constant dense<0.000000e+00> : vector<16xf32>
    %8 = vector.multi_reduction <add>, %7, %cst_2 [1] : vector<16x32xf32> to vector<16xf32>
    %9 = vector.shape_cast %8 : vector<16xf32> to vector<16x1xf32>
    %cst_3 = arith.constant 3.200000e+01 : f32
    %10 = vector.broadcast %cst_3 : f32 to vector<16x1xf32>
    %11 = arith.divf %9, %10 : vector<16x1xf32>
    %cst_4 = arith.constant 9.99999974E-6 : f32
    %12 = vector.broadcast %cst_4 : f32 to vector<16x1xf32>
    %13 = arith.addf %11, %12 : vector<16x1xf32>
    %14 = math.rsqrt %13 : vector<16x1xf32>
    %15 = vector.broadcast %14 : vector<16x1xf32> to vector<16x32xf32>
    %16 = arith.mulf %6, %15 : vector<16x32xf32>
    %c0_5 = arith.constant 0 : index
    %c0_6 = arith.constant 0 : index
    %17 = vector.load %arg2[%c0_5, %c0_6] : memref<1x32xf32, #tpu.memory_space<vmem>>, vector<1x32xf32>
    %18 = vector.broadcast %17 : vector<1x32xf32> to vector<16x32xf32>
    %19 = arith.mulf %16, %18 : vector<16x32xf32>
    %c0_7 = arith.constant 0 : index
    %c0_8 = arith.constant 0 : index
    %20 = vector.load %arg3[%c0_7, %c0_8] : memref<1x32xf32, #tpu.memory_space<vmem>>, vector<1x32xf32>
    %21 = vector.broadcast %20 : vector<1x32xf32> to vector<16x32xf32>
    %22 = arith.addf %19, %21 : vector<16x32xf32>
    %c0_9 = arith.constant 0 : index
    %c0_10 = arith.constant 0 : index
    %23 = vector.load %arg4[%c0_9, %c0_10] : memref<16x32xf32, #tpu.memory_space<vmem>>, vector<16x32xf32>
    tpu.vector_store %arg4[%c0_9, %c0_10], %22 {strides = array<i32>} : memref<16x32xf32, #tpu.memory_space<vmem>>, vector<16x32xf32>,
    return
  }
  func.func @transform_0(%arg0: i32) -> (i32, i32) {
    %c0_i32 = arith.constant 0 : i32
    %c0_i32_0 = arith.constant 0 : i32
    return %arg0, %c0_i32 : i32, i32
  }
  func.func @transform_1(%arg0: i32) -> (i32, i32) {
    %c0_i32 = arith.constant 0 : i32
    %c0_i32_0 = arith.constant 0 : i32
    %c0_i32_1 = arith.constant 0 : i32
    return %c0_i32, %c0_i32_0 : i32, i32
  }
  func.func @transform_2(%arg0: i32) -> (i32, i32) {
    %c0_i32 = arith.constant 0 : i32
    %c0_i32_0 = arith.constant 0 : i32
    %c0_i32_1 = arith.constant 0 : i32
    return %c0_i32, %c0_i32_0 : i32, i32
  }
  func.func @transform_3(%arg0: i32) -> (i32, i32) {
    %c0_i32 = arith.constant 0 : i32
    %c0_i32_0 = arith.constant 0 : i32
    return %arg0, %c0_i32 : i32, i32
  }
}

module attributes {stable_mosaic.version = 11 : i64} {
  func.func @_linear_kernel(%arg0: i32, %arg1: i32, %arg2: memref<16x32xf32, #tpu.memory_space<vmem>>, %arg3: memref<32x64xbf16, #tpu.memory_space<vmem>>, %arg4: memref<1x64xf32, #tpu.memory_space<vmem>>, %arg5: memref<16x64xf32, #tpu.memory_space<vmem>>) attributes {dimension_semantics = [#tpu.dimension_semantics<parallel>, #tpu.dimension_semantics<parallel>], iteration_bounds = array<i64: 1, 1>, scalar_prefetch = 0 : i64, scratch_operands = 0 : i64, tpu.core_type = #tpu.core_type<tc>, window_params = [{transform_indices = @transform_0, window_bounds = array<i64: 16, 32>}, {transform_indices = @transform_1, window_bounds = array<i64: 32, 64>}, {transform_indices = @transform_2, window_bounds = array<i64: 1, 64>}, {transform_indices = @transform_3, window_bounds = array<i64: 16, 64>}]} {
    %c0 = arith.constant 0 : index
    %c0_0 = arith.constant 0 : index
    %0 = vector.load %arg2[%c0, %c0_0] : memref<16x32xf32, #tpu.memory_space<vmem>>, vector<16x32xf32>
    %1 = arith.truncf %0 : vector<16x32xf32> to vector<16x32xbf16>
    %c0_1 = arith.constant 0 : index
    %c0_2 = arith.constant 0 : index
    %2 = vector.load %arg3[%c0_1, %c0_2] : memref<32x64xbf16, #tpu.memory_space<vmem>>, vector<32x64xbf16>
    %cst = arith.constant dense<0.000000e+00> : vector<16x64xf32>
    %3 = tpu.matmul %1, %2, %cst {dimension_numbers = #tpu.dot_dimension_numbers<[1], [0], [0], [1], [0, 0, 1, 1], [], []>} : vector<16x32xbf16>, vector<32x64xbf16>, vector<16x64xf32> -> vector<16x64xf32>
    %c0_3 = arith.constant 0 : index
    %c0_4 = arith.constant 0 : index
    %4 = vector.load %arg4[%c0_3, %c0_4] : memref<1x64xf32, #tpu.memory_space<vmem>>, vector<1x64xf32>
    %5 = vector.broadcast %4 : vector<1x64xf32> to vector<16x64xf32>
    %6 = arith.addf %3, %5 : vector<16x64xf32>
    %c0_5 = arith.constant 0 : index
    %c0_6 = arith.constant 0 : index
    %7 = vector.load %arg5[%c0_5, %c0_6] : memref<16x64xf32, #tpu.memory_space<vmem>>, vector<16x64xf32>
    tpu.vector_store %arg5[%c0_5, %c0_6], %6 {strides = array<i32>} : memref<16x64xf32, #tpu.memory_space<vmem>>, vector<16x64xf32>,
    return
  }
  func.func @transform_0(%arg0: i32, %arg1: i32) -> (i32, i32) {
    %c0_i32 = arith.constant 0 : i32
    %c0_i32_0 = arith.constant 0 : i32
    return %arg0, %c0_i32 : i32, i32
  }
  func.func @transform_1(%arg0: i32, %arg1: i32) -> (i32, i32) {
    %c0_i32 = arith.constant 0 : i32
    %c0_i32_0 = arith.constant 0 : i32
    return %c0_i32, %arg1 : i32, i32
  }
  func.func @transform_2(%arg0: i32, %arg1: i32) -> (i32, i32) {
    %c0_i32 = arith.constant 0 : i32
    %c0_i32_0 = arith.constant 0 : i32
    return %c0_i32, %arg1 : i32, i32
  }
  func.func @transform_3(%arg0: i32, %arg1: i32) -> (i32, i32) {
    %c0_i32 = arith.constant 0 : i32
    return %arg0, %arg1 : i32, i32
  }
}

module attributes {stable_mosaic.version = 11 : i64} {
  func.func @_linear_kernel(%arg0: i32, %arg1: i32, %arg2: memref<16x32xf32, #tpu.memory_space<vmem>>, %arg3: memref<32x64xbf16, #tpu.memory_space<vmem>>, %arg4: memref<1x64xf32, #tpu.memory_space<vmem>>, %arg5: memref<1x32xf32, #tpu.memory_space<vmem>>, %arg6: memref<1x32xf32, #tpu.memory_space<vmem>>, %arg7: memref<16x64xf32, #tpu.memory_space<vmem>>) attributes {dimension_semantics = [#tpu.dimension_semantics<parallel>, #tpu.dimension_semantics<parallel>], iteration_bounds = array<i64: 1, 1>, scalar_prefetch = 0 : i64, scratch_operands = 0 : i64, tpu.core_type = #tpu.core_type<tc>, window_params = [{transform_indices = @transform_0, window_bounds = array<i64: 16, 32>}, {transform_indices = @transform_1, window_bounds = array<i64: 32, 64>}, {transform_indices = @transform_2, window_bounds = array<i64: 1, 64>}, {pipeline_mode = #tpu.pipeline_mode<synchronous>, transform_indices = @transform_3, window_bounds = array<i64: 1, 32>}, {pipeline_mode = #tpu.pipeline_mode<synchronous>, transform_indices = @transform_4, window_bounds = array<i64: 1, 32>}, {transform_indices = @transform_5, window_bounds = array<i64: 16, 64>}]} {
    %c0 = arith.constant 0 : index
    %c0_0 = arith.constant 0 : index
    %0 = vector.load %arg2[%c0, %c0_0] : memref<16x32xf32, #tpu.memory_space<vmem>>, vector<16x32xf32>
    %cst = arith.constant dense<0.000000e+00> : vector<16xf32>
    %1 = vector.multi_reduction <add>, %0, %cst [1] : vector<16x32xf32> to vector<16xf32>
    %2 = vector.shape_cast %1 : vector<16xf32> to vector<16x1xf32>
    %cst_1 = arith.constant 3.200000e+01 : f32
    %3 = vector.broadcast %cst_1 : f32 to vector<16x1xf32>
    %4 = arith.divf %2, %3 : vector<16x1xf32>
    %5 = vector.broadcast %4 : vector<16x1xf32> to vector<16x32xf32>
    %6 = arith.subf %0, %5 : vector<16x32xf32>
    %7 = arith.mulf %6, %6 : vector<16x32xf32>
    %cst_2 = arith.constant dense<0.000000e+00> : vector<16xf32>
    %8 = vector.multi_reduction <add>, %7, %cst_2 [1] : vector<16x32xf32> to vector<16xf32>
    %9 = vector.shape_cast %8 : vector<16xf32> to vector<16x1xf32>
    %cst_3 = arith.constant 3.200000e+01 : f32
    %10 = vector.broadcast %cst_3 : f32 to vector<16x1xf32>
    %11 = arith.divf %9, %10 : vector<16x1xf32>
    %cst_4 = arith.constant 9.99999974E-6 : f32
    %12 = vector.broadcast %cst_4 : f32 to vector<16x1xf32>
    %13 = arith.addf %11, %12 : vector<16x1xf32>
    %14 = math.rsqrt %13 : vector<16x1xf32>
    %15 = vector.broadcast %14 : vector<16x1xf32> to vector<16x32xf32>
    %16 = arith.mulf %6, %15 : vector<16x32xf32>
    %c0_5 = arith.constant 0 : index
    %c0_6 = arith.constant 0 : index
    %17 = vector.load %arg5[%c0_5, %c0_6] : memref<1x32xf32, #tpu.memory_space<vmem>>, vector<1x32xf32>
    %18 = vector.broadcast %17 : vector<1x32xf32> to vector<16x32xf32>
    %19 = arith.mulf %16, %18 : vector<16x32xf32>
    %c0_7 = arith.constant 0 : index
    %c0_8 = arith.constant 0 : index
    %20 = vector.load %arg6[%c0_7, %c0_8] : memref<1x32xf32, #tpu.memory_space<vmem>>, vector<1x32xf32>
    %21 = vector.broadcast %20 : vector<1x32xf32> to vector<16x32xf32>
    %22 = arith.addf %19, %21 : vector<16x32xf32>
    %23 = arith.truncf %22 : vector<16x32xf32> to vector<16x32xbf16>
    %c0_9 = arith.constant 0 : index
    %c0_10 = arith.constant 0 : index
    %24 = vector.load %arg3[%c0_9, %c0_10] : memref<32x64xbf16, #tpu.memory_space<vmem>>, vector<32x64xbf16>
    %cst_11 = arith.constant dense<0.000000e+00> : vector<16x64xf32>
    %25 = tpu.matmul %23, %24, %cst_11 {dimension_numbers = #tpu.dot_dimension_numbers<[1], [0], [0], [1], [0, 0, 1, 1], [], []>} : vector<16x32xbf16>, vector<32x64xbf16>, vector<16x64xf32> -> vector<16x64xf32>
    %c0_12 = arith.constant 0 : index
    %c0_13 = arith.constant 0 : index
    %26 = vector.load %arg4[%c0_12, %c0_13] : memref<1x64xf32, #tpu.memory_space<vmem>>, vector<1x64xf32>
    %27 = vector.broadcast %26 : vector<1x64xf32> to vector<16x64xf32>
    %28 = arith.addf %25, %27 : vector<16x64xf32>
    %c0_14 = arith.constant 0 : index
    %c0_15 = arith.constant 0 : index
    %29 = vector.load %arg7[%c0_14, %c0_15] : memref<16x64xf32, #tpu.memory_space<vmem>>, vector<16x64xf32>
    tpu.vector_store %arg7[%c0_14, %c0_15], %28 {strides = array<i32>} : memref<16x64xf32, #tpu.memory_space<vmem>>, vector<16x64xf32>,
    return
  }
  func.func @transform_0(%arg0: i32, %arg1: i32) -> (i32, i32) {
    %c0_i32 = arith.constant 0 : i32
    %c0_i32_0 = arith.constant 0 : i32
    return %arg0, %c0_i32 : i32, i32
  }
  func.func @transform_1(%arg0: i32, %arg1: i32) -> (i32, i32) {
    %c0_i32 = arith.constant 0 : i32
    %c0_i32_0 = arith.constant 0 : i32
    return %c0_i32, %arg1 : i32, i32
  }
  func.func @transform_2(%arg0: i32, %arg1: i32) -> (i32, i32) {
    %c0_i32 = arith.constant 0 : i32
    %c0_i32_0 = arith.constant 0 : i32
    return %c0_i32, %arg1 : i32, i32
  }
  func.func @transform_3(%arg0: i32, %arg1: i32) -> (i32, i32) {
    %c0_i32 = arith.constant 0 : i32
    %c0_i32_0 = arith.constant 0 : i32
    %c0_i32_1 = arith.constant 0 : i32
    return %c0_i32, %c0_i32_0 : i32, i32
  }
  func.func @transform_4(%arg0: i32, %arg1: i32) -> (i32, i32) {
    %c0_i32 = arith.constant 0 : i32
    %c0_i32_0 = arith.constant 0 : i32
    %c0_i32_1 = arith.constant 0 : i32
    return %c0_i32, %c0_i32_0 : i32, i32
  }
  func.func @transform_5(%arg0: i32, %arg1: i32) -> (i32, i32) {
    %c0_i32 = arith.constant 0 : i32
    return %arg0, %arg1 : i32, i32
  }
}

</mosaic_0001>

<bundles_post_ra>
// kernel: talk_forward.45
= control target key start
LH: loop header
LB: loop body
LE: loop exit
PB: predicated region body
PF: predicated region fallthrough
CT: control target
= control target key end

     0   :  { %vm23_vm0 = vcmask 261120   ;;  %v169_v15 = vmov 0.0   ;;  %vm170_vm1 = vmmov 0   ;;  %vm137_vm2 = vcmask 785408   ;;  %s233_s0 = inlined_call_operand.vmem [shape: f32[16,32], index: 0, kind: input, shape index: {}]   ;;  %s234_s1 = inlined_call_operand.vmem [shape: bf16[32,96], index: 1, kind: input, shape index: {}]   ;;  %s235_s3 = inlined_call_operand.vmem [shape: f32[1,32], index: 3, kind: input, shape index: {}]   ;;  %s236_s4 = inlined_call_operand.vmem [shape: f32[1,32], index: 4, kind: input, shape index: {}]   ;;  %s237_s2 = inlined_call_operand.vmem [shape: f32[1,96], index: 2, kind: input, shape index: {}]   ;;  %s238_s5 = inlined_call_operand.vmem [shape: f32[16,96], index: 5, kind: output, shape index: {}]  }
   0x1   :  { %v21_v0 = vld [vmem:[%s233_s0] sm:$0xff]  ;;  %v22_v1 = vld [vmem:[%s233_s0 + $0x8] sm:$0xff]  ;;  %153 = vmatprep.subr.bf16.mxu0 %v169_v15  ;;  %157 = vmatprep.mubr.msk.bf16.mxu0 %vm170_vm1, %v169_v15 }
   0x2   :  { %v24_v2 = vsel %vm23_vm0, %v21_v0, 0.0  ;;  %v27_v3 = vsel %vm23_vm0, %v22_v1, 0.0  ;;  %v163_v14 = vld [vmem:[%s234_s1] sm:$0xff]   ;;  %v164_v16 = vld [vmem:[%s234_s1 + $0x8] sm:$0xff]  }
   0x3   :  { %25 = vadd.xlane.f32.xlu0 %v24_v2  ;;  %154 = vmatpush3.bf16.msra.mxu0 %v163_v14  ;;  %v144_v25 = vld [vmem:[%s235_s3] ss:$0 sm:$0xff] }
   0x4   :  { %155 = vmatprep.subr.bf16.mxu0 %v169_v15  ;;  %v145_v29 = vld [vmem:[%s236_s4] ss:$0 sm:$0xff] }
   0x5   :  { %v146_v34 = vld [vmem:[%s237_s2] ss:$0 sm:$0xff] }
   0x7   :  { %28 = vadd.xlane.f32.xlu0 %v27_v3  ;;  %156 = vmatpush3.bf16.msra.mxu0 %v164_v16 }
  0x90   :  { %v26_v4 = vpop.xlane.xlu0 %25 }
  0x91   :  { %v31_v5 = vmul.f32 0.03125, %v26_v4 }
  0x93   :  { %v33_v6 = vsub.f32 %v21_v0, %v31_v5 }
  0x94   :  { %v29_v7 = vpop.xlane.xlu0 %28 }
  0x95   :  { %v32_v8 = vmul.f32 0.03125, %v29_v7  ;;  %v35_v9 = vmul.f32 %v33_v6, %v33_v6 }
  0x97   :  { %v34_v10 = vsub.f32 %v22_v1, %v32_v8  ;;  %v37_v11 = vsel %vm23_vm0, %v35_v9, 0.0 }
  0x98   :  { %38 = vadd.xlane.f32.xlu1 %v37_v11 }
  0x99   :  { %v36_v12 = vmul.f32 %v34_v10, %v34_v10 }
  0x9b   :  { %v40_v13 = vsel %vm23_vm0, %v36_v12, 0.0 }
  0x9c   :  { %41 = vadd.xlane.f32.xlu1 %v40_v13 }
 0x125   :  { %v39_v17 = vpop.xlane.xlu1 %38 }
 0x126   :  { %v43_v18 = vmul.f32 0.03125, %v39_v17 }
 0x128   :  { %v45_v19 = vadd.f32 1e-05, %v43_v18 }
 0x129   :  { %v42_v20 = vpop.xlane.xlu1 %41 }
 0x12a   :  { %165 = vrsqrt.f32 %v45_v19  ;;  %v44_v21 = vmul.f32 0.03125, %v42_v20 }
 0x12c   :  { %v46_v22 = vadd.f32 1e-05, %v44_v21 }
 0x12e   :  { %167 = vrsqrt.f32 %v46_v22 }
 0x134   :  { %v166_v23 = vpop.eup %165 }
 0x135   :  { %v49_v24 = vmul.f32 %v166_v23, %v33_v6 }
 0x137   :  { %v58_v28 = vmul.f32 %v144_v25, %v49_v24 }
 0x138   :  { %v168_v26 = vpop.eup %167 }
 0x139   :  { %v50_v27 = vmul.f32 %v168_v26, %v34_v10  ;;  %v67_v31 = vadd.f32 %v145_v29, %v58_v28 }
 0x13b   :  { %v59_v30 = vmul.f32 %v144_v25, %v50_v27 }
 0x13d   :  { %v68_v32 = vadd.f32 %v145_v29, %v59_v30 }
 0x13f   :  { %v69_v33 = vpack.c.bf16 %v68_v32, %v67_v31 }
 0x141   :  { %158 = vmatmul.mubr.msk.bf16.vlgmr.msra.gmra.mrb[0].mxu0 %vm23_vm0, %v69_v33 }
 0x214   :  { %v130_v35 = vpop.f32.mrb[0].mxu0 }
 0x215   :  { %v131_v36 = vadd.f32 %v146_v34, %v130_v35  ;;  %v159_v37 = vpop.f32.mrb[1].mxu0 }
 0x216   :  { %v133_v38 = vpop.f32.mrb[2].mxu0 }
 0x217   :  { %138 = vst.msk [vmem:[%s238_s5] sm:$0xff] %vm137_vm2, %v131_v36  ;;  %v134_v39 = vadd.f32 %v146_v34, %v133_v38  ;;  %v160_v40 = vpop.f32.mrb[3].mxu0 }
 0x219   :  { %139 = vst.msk [vmem:[%s238_s5 + $0x8] sm:$0xff] %vm137_vm2, %v134_v39 }

// kernel: talk_forward.47
= control target key start
LH: loop header
LB: loop body
LE: loop exit
PB: predicated region body
PF: predicated region fallthrough
CT: control target
= control target key end

     0   :  { %v118_v0 = vmov 0.0   ;;  %vm119_vm0 = vmmov 0   ;;  %vm44_vm1 = vcmask 261120   ;;  %s175_s1 = inlined_call_operand.vmem [shape: bf16[32,32], index: 1, kind: input, shape index: {}]   ;;  %s176_s0 = inlined_call_operand.vmem [shape: f32[16,32], index: 0, kind: input, shape index: {}]   ;;  %s177_s2 = inlined_call_operand.vmem [shape: f32[1,32], index: 2, kind: input, shape index: {}]   ;;  %s178_s3 = inlined_call_operand.vmem [shape: f32[16,32], index: 3, kind: input, shape index: {}]   ;;  %s179_s4 = inlined_call_operand.vmem [shape: f32[16,32], index: 4, kind: output, shape index: {}]  }
   0x1   :  { %106 = vmatprep.subr.bf16.mxu0 %v118_v0  ;;  %v116_v1 = vld [vmem:[%s175_s1] sm:$0xff]   ;;  %110 = vmatprep.mubr.msk.bf16.mxu0 %vm119_vm0, %v118_v0  ;;  %v117_v2 = vld [vmem:[%s175_s1 + $0x8] sm:$0xff]  }
   0x2   :  { %107 = vmatpush3.bf16.msra.mxu0 %v116_v1  ;;  %v18_v3 = vld [vmem:[%s176_s0] sm:$0xff]  ;;  %v19_v4 = vld [vmem:[%s176_s0 + $0x8] sm:$0xff] }
   0x3   :  { %108 = vmatprep.subr.bf16.mxu0 %v118_v0  ;;  %v20_v5 = vpack.c.bf16 %v19_v4, %v18_v3  ;;  %v99_v6 = vld [vmem:[%s177_s2] ss:$0 sm:$0xff]  ;;  %v90_v12 = vld [vmem:[%s178_s3 + $0x8] sm:$0xff] }
   0x4   :  { %v89_v8 = vld [vmem:[%s178_s3] sm:$0xff] }
   0x6   :  { %109 = vmatpush3.bf16.msra.mxu0 %v117_v2 }
   0x9   :  { %111 = vmatmul.mubr.msk.bf16.vlgmr.msra.gmra.mrb[0].mxu0 %vm44_vm1, %v20_v5 }
  0xdc   :  { %v82_v7 = vpop.f32.mrb[0].mxu0 }
  0xdd   :  { %v83_v9 = vadd.f32 %v99_v6, %v82_v7  ;;  %v112_v10 = vpop.f32.mrb[1].mxu0 }
  0xde   :  { %v85_v11 = vpop.f32.mrb[2].mxu0 }
  0xdf   :  { %v91_v13 = vadd.f32 %v89_v8, %v83_v9  ;;  %v86_v14 = vadd.f32 %v99_v6, %v85_v11  ;;  %v113_v15 = vpop.f32.mrb[3].mxu0 }
  0xe1   :  { %93 = vst.msk [vmem:[%s179_s4] sm:$0xff] %vm44_vm1, %v91_v13  ;;  %v92_v16 = vadd.f32 %v90_v12, %v86_v14 }
  0xe3   :  { %94 = vst.msk [vmem:[%s179_s4 + $0x8] sm:$0xff] %vm44_vm1, %v92_v16 }

// kernel: talk_forward.48
= control target key start
LH: loop header
LB: loop body
LE: loop exit
PB: predicated region body
PF: predicated region fallthrough
CT: control target
= control target key end

     0   :  { %vm23_vm0 = vcmask 261120   ;;  %v168_v15 = vmov 0.0   ;;  %vm169_vm1 = vmmov 0   ;;  %s234_s0 = inlined_call_operand.vmem [shape: f32[16,32], index: 0, kind: input, shape index: {}]   ;;  %s235_s1 = inlined_call_operand.vmem [shape: bf16[32,32], index: 1, kind: input, shape index: {}]   ;;  %s236_s3 = inlined_call_operand.vmem [shape: f32[1,32], index: 3, kind: input, shape index: {}]   ;;  %s237_s4 = inlined_call_operand.vmem [shape: f32[1,32], index: 4, kind: input, shape index: {}]   ;;  %s238_s2 = inlined_call_operand.vmem [shape: f32[1,32], index: 2, kind: input, shape index: {}]   ;;  %s239_s5 = inlined_call_operand.vmem [shape: f32[16,32], index: 5, kind: output, shape index: {}]  }
   0x1   :  { %v21_v0 = vld [vmem:[%s234_s0] sm:$0xff]  ;;  %v22_v1 = vld [vmem:[%s234_s0 + $0x8] sm:$0xff]  ;;  %152 = vmatprep.subr.bf16.mxu0 %v168_v15  ;;  %156 = vmatprep.mubr.msk.bf16.mxu0 %vm169_vm1, %v168_v15 }
   0x2   :  { %v24_v2 = vsel %vm23_vm0, %v21_v0, 0.0  ;;  %v27_v3 = vsel %vm23_vm0, %v22_v1, 0.0  ;;  %v162_v14 = vld [vmem:[%s235_s1] sm:$0xff]   ;;  %v163_v16 = vld [vmem:[%s235_s1 + $0x8] sm:$0xff]  }
   0x3   :  { %25 = vadd.xlane.f32.xlu0 %v24_v2  ;;  %153 = vmatpush3.bf16.msra.mxu0 %v162_v14  ;;  %v143_v25 = vld [vmem:[%s236_s3] ss:$0 sm:$0xff] }
   0x4   :  { %154 = vmatprep.subr.bf16.mxu0 %v168_v15  ;;  %v144_v29 = vld [vmem:[%s237_s4] ss:$0 sm:$0xff] }
   0x5   :  { %v145_v34 = vld [vmem:[%s238_s2] ss:$0 sm:$0xff] }
   0x7   :  { %28 = vadd.xlane.f32.xlu0 %v27_v3  ;;  %155 = vmatpush3.bf16.msra.mxu0 %v163_v16 }
  0x90   :  { %v26_v4 = vpop.xlane.xlu0 %25 }
  0x91   :  { %v31_v5 = vmul.f32 0.03125, %v26_v4 }
  0x93   :  { %v33_v6 = vsub.f32 %v21_v0, %v31_v5 }
  0x94   :  { %v29_v7 = vpop.xlane.xlu0 %28 }
  0x95   :  { %v32_v8 = vmul.f32 0.03125, %v29_v7  ;;  %v35_v9 = vmul.f32 %v33_v6, %v33_v6 }
  0x97   :  { %v34_v10 = vsub.f32 %v22_v1, %v32_v8  ;;  %v37_v11 = vsel %vm23_vm0, %v35_v9, 0.0 }
  0x98   :  { %38 = vadd.xlane.f32.xlu1 %v37_v11 }
  0x99   :  { %v36_v12 = vmul.f32 %v34_v10, %v34_v10 }
  0x9b   :  { %v40_v13 = vsel %vm23_vm0, %v36_v12, 0.0 }
  0x9c   :  { %41 = vadd.xlane.f32.xlu1 %v40_v13 }
 0x125   :  { %v39_v17 = vpop.xlane.xlu1 %38 }
 0x126   :  { %v43_v18 = vmul.f32 0.03125, %v39_v17 }
 0x128   :  { %v45_v19 = vadd.f32 1e-05, %v43_v18 }
 0x129   :  { %v42_v20 = vpop.xlane.xlu1 %41 }
 0x12a   :  { %164 = vrsqrt.f32 %v45_v19  ;;  %v44_v21 = vmul.f32 0.03125, %v42_v20 }
 0x12c   :  { %v46_v22 = vadd.f32 1e-05, %v44_v21 }
 0x12e   :  { %166 = vrsqrt.f32 %v46_v22 }
 0x134   :  { %v165_v23 = vpop.eup %164 }
 0x135   :  { %v49_v24 = vmul.f32 %v165_v23, %v33_v6 }
 0x137   :  { %v58_v28 = vmul.f32 %v143_v25, %v49_v24 }
 0x138   :  { %v167_v26 = vpop.eup %166 }
 0x139   :  { %v50_v27 = vmul.f32 %v167_v26, %v34_v10  ;;  %v67_v31 = vadd.f32 %v144_v29, %v58_v28 }
 0x13b   :  { %v59_v30 = vmul.f32 %v143_v25, %v50_v27 }
 0x13d   :  { %v68_v32 = vadd.f32 %v144_v29, %v59_v30 }
 0x13f   :  { %v69_v33 = vpack.c.bf16 %v68_v32, %v67_v31 }
 0x141   :  { %157 = vmatmul.mubr.msk.bf16.vlgmr.msra.gmra.mrb[0].mxu0 %vm23_vm0, %v69_v33 }
 0x214   :  { %v130_v35 = vpop.f32.mrb[0].mxu0 }
 0x215   :  { %v131_v36 = vadd.f32 %v145_v34, %v130_v35  ;;  %v158_v37 = vpop.f32.mrb[1].mxu0 }
 0x216   :  { %v133_v38 = vpop.f32.mrb[2].mxu0 }
 0x217   :  { %137 = vst.msk [vmem:[%s239_s5] sm:$0xff] %vm23_vm0, %v131_v36  ;;  %v134_v39 = vadd.f32 %v145_v34, %v133_v38  ;;  %v159_v40 = vpop.f32.mrb[3].mxu0 }
 0x219   :  { %138 = vst.msk [vmem:[%s239_s5 + $0x8] sm:$0xff] %vm23_vm0, %v134_v39 }

// kernel: talk_forward.46
= control target key start
LH: loop header
LB: loop body
LE: loop exit
PB: predicated region body
PF: predicated region fallthrough
CT: control target
= control target key end

     0   :  { %v1099_v0 = vmov 0.0   ;;  %vm59_vm0 = vcmask 64512   ;;  %vm1100_vm1 = vmmov 0   ;;  %vm543_vm2 = vcmask 1043456   ;;  %s1361_s1 = inlined_call_operand.vmem [shape: f32[8,8,8], index: 1, kind: input, shape index: {}]   ;;  %s1362_s0 = inlined_call_operand.vmem [shape: f32[8,8,8], index: 0, kind: input, shape index: {}]   ;;  %s1363_s3 = inlined_call_operand.vmem [shape: f32[8,8], index: 3, kind: input, shape index: {}]   ;;  %s1364_s2 = inlined_call_operand.vmem [shape: f32[8,8,8], index: 2, kind: input, shape index: {}]   ;;  %s1365_s4 = inlined_call_operand.vmem [shape: f32[8,8,8], index: 4, kind: output, shape index: {}]  }
   0x1   :  { %969 = vmatprep.subr.bf16.mxu0 %v1099_v0  ;;  %975 = vmatprep.subr.bf16.mxu1 %v1099_v0  ;;  %v42_v1 = vld [vmem:[%s1361_s1] sm:$0xff]  ;;  %v43_v2 = vld [vmem:[%s1361_s1 + $0x8] sm:$0xff]  ;;  %v44_v7 = vld [vmem:[%s1361_s1 + $0x10] sm:$0xff] }
   0x2   :  { %v18_v3 = vld [vmem:[%s1362_s0] sm:$0xff]  ;;  %v50_v4 = vpack.c.bf16 %v42_v1, %v42_v1  ;;  %v51_v5 = vpack.c.bf16 %v43_v2, %v43_v2  ;;  %971 = vmatprep.mubr.msk.bf16.mxu0 %vm1100_vm1, %v1099_v0  ;;  %977 = vmatprep.mubr.msk.bf16.mxu1 %vm1100_vm1, %v1099_v0  ;;  %v19_v6 = vld [vmem:[%s1362_s0 + $0x8] sm:$0xff]  ;;  %v45_v8 = vld [vmem:[%s1361_s1 + $0x18] sm:$0xff]  ;;  %v52_v13 = vpack.c.bf16 %v44_v7, %v44_v7 }
   0x3   :  { %v26_v11 = vmul.f32 0.35355338, %v18_v3  ;;  %v27_v12 = vmul.f32 0.35355338, %v19_v6  ;;  %v53_v14 = vpack.c.bf16 %v45_v8, %v45_v8  ;;  %v20_v17 = vld [vmem:[%s1362_s0 + $0x10] sm:$0xff]  ;;  %v21_v18 = vld [vmem:[%s1362_s0 + $0x18] sm:$0xff] }
   0x4   :  { %v64_v9 = vsel %vm59_vm0, %v50_v4, 0  ;;  %v110_v10 = vsel %vm59_vm0, %v51_v5, 0  ;;  %v156_v19 = vsel %vm59_vm0, %v52_v13, 0  ;;  %v46_v21 = vld [vmem:[%s1361_s1 + $0x20] sm:$0xff]  ;;  %v47_v22 = vld [vmem:[%s1361_s1 + $0x28] sm:$0xff]  ;;  %v48_v33 = vld [vmem:[%s1361_s1 + $0x30] sm:$0xff] }
   0x5   :  { %970 = vmatpush3.bf16.xpose.msra.mxu0 %v64_v9  ;;  %976 = vmatpush3.bf16.xpose.msra.mxu1 %v110_v10  ;;  %v34_v15 = vpack.c.bf16 %v26_v11, %v26_v11  ;;  %v35_v16 = vpack.c.bf16 %v27_v12, %v27_v12  ;;  %v202_v20 = vsel %vm59_vm0, %v53_v14, 0  ;;  %v28_v23 = vmul.f32 0.35355338, %v20_v17  ;;  %v22_v29 = vld [vmem:[%s1362_s0 + $0x20] sm:$0xff]  ;;  %v23_v30 = vld [vmem:[%s1362_s0 + $0x28] sm:$0xff]  ;;  %v49_v34 = vld [vmem:[%s1361_s1 + $0x38] sm:$0xff] }
   0x6   :  { %981 = vmatprep.subr.bf16.mxu0 %v1099_v0  ;;  %987 = vmatprep.subr.bf16.mxu1 %v1099_v0  ;;  %v29_v24 = vmul.f32 0.35355338, %v21_v18  ;;  %v54_v25 = vpack.c.bf16 %v46_v21, %v46_v21  ;;  %v55_v26 = vpack.c.bf16 %v47_v22, %v47_v22  ;;  %v30_v35 = vmul.f32 0.35355338, %v22_v29  ;;  %v24_v41 = vld [vmem:[%s1362_s0 + $0x30] sm:$0xff]  ;;  %v25_v42 = vld [vmem:[%s1362_s0 + $0x38] sm:$0xff] }
   0x7   :  { %v36_v27 = vpack.c.bf16 %v28_v23, %v28_v23  ;;  %v31_v36 = vmul.f32 0.35355338, %v23_v30  ;;  %v56_v37 = vpack.c.bf16 %v48_v33, %v48_v33  ;;  %v57_v38 = vpack.c.bf16 %v49_v34, %v49_v34  ;;  %v58_v49 = vld [vmem:[%s1363_s3] sm:$0xff] }
   0x8   :  { %v37_v28 = vpack.c.bf16 %v29_v24, %v29_v24  ;;  %v248_v31 = vsel %vm59_vm0, %v54_v25, 0  ;;  %v294_v32 = vsel %vm59_vm0, %v55_v26, 0  ;;  %v38_v39 = vpack.c.bf16 %v30_v35, %v30_v35 }
   0x9   :  { %v39_v40 = vpack.c.bf16 %v31_v36, %v31_v36  ;;  %v340_v43 = vsel %vm59_vm0, %v56_v37, 0  ;;  %v386_v44 = vsel %vm59_vm0, %v57_v38, 0  ;;  %v32_v45 = vmul.f32 0.35355338, %v24_v41 }
   0xa   :  { %v33_v46 = vmul.f32 0.35355338, %v25_v42 }
   0xb   :  { %v40_v47 = vpack.c.bf16 %v32_v45, %v32_v45 }
   0xc   :  { %972 = vmatmul.mubr.msk.bf16.vlgmr.msra.gmra.mrb[0].mxu0 %vm59_vm0, %v34_v15  ;;  %978 = vmatmul.mubr.msk.bf16.vlgmr.msra.gmra.mrb[0].mxu1 %vm59_vm0, %v35_v16  ;;  %v41_v48 = vpack.c.bf16 %v33_v46, %v33_v46 }
   0xd   :  { %982 = vmatpush3.bf16.xpose.msra.mxu0 %v156_v19  ;;  %988 = vmatpush3.bf16.xpose.msra.mxu1 %v202_v20 }
   0xe   :  { %983 = vmatprep.mubr.msk.bf16.mxu0 %vm1100_vm1, %v1099_v0  ;;  %989 = vmatprep.mubr.msk.bf16.mxu1 %vm1100_vm1, %v1099_v0 }
   0xf   :  { %993 = vmatprep.subr.bf16.mxu0 %v1099_v0  ;;  %999 = vmatprep.subr.bf16.mxu1 %v1099_v0 }
  0x14   :  { %984 = vmatmul.mubr.msk.bf16.vlgmr.msra.gmra.mrb[4].mxu0 %vm59_vm0, %v36_v27  ;;  %990 = vmatmul.mubr.msk.bf16.vlgmr.msra.gmra.mrb[4].mxu1 %vm59_vm0, %v37_v28 }
  0x15   :  { %994 = vmatpush3.bf16.xpose.msra.mxu0 %v248_v31  ;;  %1000 = vmatpush3.bf16.xpose.msra.mxu1 %v294_v32 }
  0x16   :  { %995 = vmatprep.mubr.msk.bf16.mxu0 %vm1100_vm1, %v1099_v0  ;;  %1001 = vmatprep.mubr.msk.bf16.mxu1 %vm1100_vm1, %v1099_v0 }
  0x17   :  { %1005 = vmatprep.subr.bf16.mxu0 %v1099_v0  ;;  %1011 = vmatprep.subr.bf16.mxu1 %v1099_v0 }
  0x1c   :  { %996 = vmatmul.mubr.msk.bf16.vlgmr.msra.gmra.mrb[8].mxu0 %vm59_vm0, %v38_v39  ;;  %1002 = vmatmul.mubr.msk.bf16.vlgmr.msra.gmra.mrb[8].mxu1 %vm59_vm0, %v39_v40 }
  0x1d   :  { %1006 = vmatpush3.bf16.xpose.msra.mxu0 %v340_v43  ;;  %1012 = vmatpush3.bf16.xpose.msra.mxu1 %v386_v44 }
  0x1e   :  { %1007 = vmatprep.mubr.msk.bf16.mxu0 %vm1100_vm1, %v1099_v0  ;;  %1013 = vmatprep.mubr.msk.bf16.mxu1 %vm1100_vm1, %v1099_v0 }
  0x1f   :  { %1017 = vmatprep.subr.bf16.mxu0 %v1099_v0  ;;  %1023 = vmatprep.subr.bf16.mxu1 %v1099_v0 }
  0x24   :  { %1008 = vmatmul.mubr.msk.bf16.vlgmr.msra.gmra.mrb[12].mxu0 %vm59_vm0, %v40_v47  ;;  %1014 = vmatmul.mubr.msk.bf16.vlgmr.msra.gmra.mrb[12].mxu1 %vm59_vm0, %v41_v48 }
  0x25   :  { %1019 = vmatprep.mubr.msk.bf16.mxu0 %vm1100_vm1, %v1099_v0  ;;  %1025 = vmatprep.mubr.msk.bf16.mxu1 %vm1100_vm1, %v1099_v0 }
  0xdf   :  { %v100_v50 = vpop.f32.mrb[0].mxu0  ;;  %v146_v51 = vpop.f32.mrb[0].mxu1 }
  0xe0   :  { %v101_v52 = vadd.f32 %v100_v50, %v58_v49  ;;  %v973_v53 = vpop.f32.mrb[1].mxu0  ;;  %v147_v54 = vadd.f32 %v146_v51, %v58_v49  ;;  %v979_v55 = vpop.f32.mrb[1].mxu1 }
  0xe1   :  { %v103_v56 = vpop.f32.mrb[2].mxu0  ;;  %v149_v57 = vpop.f32.mrb[2].mxu1 }
  0xe2   :  { %v974_v58 = vpop.f32.mrb[3].mxu0  ;;  %v428_v59 = vsel %vm59_vm0, %v101_v52, -inf  ;;  %v980_v60 = vpop.f32.mrb[3].mxu1  ;;  %v431_v61 = vsel %vm59_vm0, %v147_v54, -inf }
  0xe3   :  { %429 = vmax.xlane.f32.xlu0 %v428_v59 }
  0xe7   :  { %432 = vmax.xlane.f32.xlu0 %v431_v61  ;;  %v192_v62 = vpop.f32.mrb[4].mxu0  ;;  %v238_v63 = vpop.f32.mrb[4].mxu1 }
  0xe8   :  { %v193_v1 = vadd.f32 %v192_v62, %v58_v49  ;;  %v985_v2 = vpop.f32.mrb[5].mxu0  ;;  %v239_v3 = vadd.f32 %v238_v63, %v58_v49  ;;  %v991_v4 = vpop.f32.mrb[5].mxu1 }
  0xe9   :  { %v195_v5 = vpop.f32.mrb[6].mxu0  ;;  %v241_v6 = vpop.f32.mrb[6].mxu1 }
  0xea   :  { %v986_v7 = vpop.f32.mrb[7].mxu0  ;;  %v434_v8 = vsel %vm59_vm0, %v193_v1, -inf  ;;  %v992_v9 = vpop.f32.mrb[7].mxu1  ;;  %v437_v10 = vsel %vm59_vm0, %v239_v3, -inf }
  0xeb   :  { %435 = vmax.xlane.f32.xlu1 %v434_v8 }
  0xef   :  { %v330_v11 = vpop.f32.mrb[8].mxu1  ;;  %438 = vmax.xlane.f32.xlu1 %v437_v10  ;;  %v284_v12 = vpop.f32.mrb[8].mxu0 }
  0xf0   :  { %v331_v13 = vadd.f32 %v330_v11, %v58_v49  ;;  %v285_v14 = vadd.f32 %v284_v12, %v58_v49  ;;  %v997_v15 = vpop.f32.mrb[9].mxu0  ;;  %v1003_v16 = vpop.f32.mrb[9].mxu1  ;;  %v524_v11 = vld [vmem:[%s1364_s2] sm:$0xff] }
  0xf1   :  { %v333_v17 = vpop.f32.mrb[10].mxu1  ;;  %v287_v18 = vpop.f32.mrb[10].mxu0  ;;  %v525_v15 = vld [vmem:[%s1364_s2 + $0x8] sm:$0xff] }
  0xf2   :  { %v443_v19 = vsel %vm59_vm0, %v331_v13, -inf  ;;  %v440_v20 = vsel %vm59_vm0, %v285_v14, -inf  ;;  %v998_v21 = vpop.f32.mrb[11].mxu0  ;;  %v1004_v22 = vpop.f32.mrb[11].mxu1  ;;  %v533_v16 = vpack.c.bf16 %v525_v15, %v525_v15  ;;  %v526_v18 = vld [vmem:[%s1364_s2 + $0x10] sm:$0xff] }
  0xf3   :  { %444 = vmax.xlane.f32.xlu1 %v443_v19  ;;  %441 = vmax.xlane.f32.xlu0 %v440_v20  ;;  %v534_v19 = vpack.c.bf16 %v526_v18, %v526_v18  ;;  %v527_v21 = vld [vmem:[%s1364_s2 + $0x18] sm:$0xff] }
  0xf4   :  { %v591_v17 = vsel %vm543_vm2, %v533_v16, 0  ;;  %v535_v22 = vpack.c.bf16 %v527_v21, %v527_v21 }
  0xf5   :  { %1024 = vmatpush3.bf16.msra.mxu1 %v591_v17  ;;  %v637_v20 = vsel %vm543_vm2, %v534_v19, 0 }
  0xf6   :  { %1035 = vmatprep.subr.bf16.mxu1 %v1099_v0 }
  0xf7   :  { %v376_v23 = vpop.f32.mrb[12].mxu0  ;;  %v422_v24 = vpop.f32.mrb[12].mxu1 }
  0xf8   :  { %v377_v25 = vadd.f32 %v376_v23, %v58_v49  ;;  %v423_v26 = vadd.f32 %v422_v24, %v58_v49  ;;  %v1009_v27 = vpop.f32.mrb[13].mxu0  ;;  %v1015_v28 = vpop.f32.mrb[13].mxu1  ;;  %v683_v23 = vsel %vm543_vm2, %v535_v22, 0  ;;  %v528_v24 = vld [vmem:[%s1364_s2 + $0x20] sm:$0xff] }
  0xf9   :  { %v425_v29 = vpop.f32.mrb[14].mxu1  ;;  %v379_v30 = vpop.f32.mrb[14].mxu0  ;;  %v529_v27 = vld [vmem:[%s1364_s2 + $0x28] sm:$0xff] }
  0xfa   :  { %v449_v31 = vsel %vm59_vm0, %v423_v26, -inf  ;;  %v446_v32 = vsel %vm59_vm0, %v377_v25, -inf  ;;  %v1010_v33 = vpop.f32.mrb[15].mxu0  ;;  %v1016_v34 = vpop.f32.mrb[15].mxu1  ;;  %v537_v28 = vpack.c.bf16 %v529_v27, %v529_v27  ;;  %v530_v30 = vld [vmem:[%s1364_s2 + $0x30] sm:$0xff] }
  0xfb   :  { %450 = vmax.xlane.f32.xlu1 %v449_v31  ;;  %447 = vmax.xlane.f32.xlu0 %v446_v32  ;;  %v538_v31 = vpack.c.bf16 %v530_v30, %v530_v30  ;;  %v531_v33 = vld [vmem:[%s1364_s2 + $0x38] sm:$0xff] }
  0xfc   :  { %v775_v29 = vsel %vm543_vm2, %v537_v28, 0  ;;  %v539_v34 = vpack.c.bf16 %v531_v33, %v531_v33 }
  0xfd   :  { %v821_v32 = vsel %vm543_vm2, %v538_v31, 0 }
 0x170   :  { %v430_v35 = vpop.xlane.xlu0 %429 }
 0x171   :  { %v452_v36 = vsub.f32 %v101_v52, %v430_v35  ;;  %v867_v35 = vsel %vm543_vm2, %v539_v34, 0 }
 0x173   :  { %v460_v37 = vmul.f32 1.442695, %v452_v36 }
 0x174   :  { %v433_v38 = vpop.xlane.xlu0 %432 }
 0x175   :  { %1067 = vpow2.f32 %v460_v37  ;;  %v453_v39 = vsub.f32 %v147_v54, %v433_v38 }
 0x177   :  { %v462_v40 = vmul.f32 1.442695, %v453_v39 }
 0x178   :  { %v436_v41 = vpop.xlane.xlu1 %435 }
 0x179   :  { %1069 = vpow2.f32 %v462_v40  ;;  %v454_v42 = vsub.f32 %v193_v1, %v436_v41 }
 0x17b   :  { %v464_v43 = vmul.f32 1.442695, %v454_v42 }
 0x17c   :  { %v439_v44 = vpop.xlane.xlu1 %438 }
 0x17d   :  { %1071 = vpow2.f32 %v464_v43  ;;  %v455_v45 = vsub.f32 %v239_v3, %v439_v44 }
 0x17f   :  { %v1231_v46 = vpop.eup %1067  ;;  %v466_v47 = vmul.f32 1.442695, %v455_v45 }
 0x180   :  { %v445_v48 = vpop.xlane.xlu1 %444  ;;  %v442_v49 = vpop.xlane.xlu0 %441  ;;  %v476_v50 = vsel %vm59_vm0, %v1231_v46, 0.0 }
 0x181   :  { %1073 = vpow2.f32 %v466_v47  ;;  %v457_v51 = vsub.f32 %v331_v13, %v445_v48  ;;  %v456_v52 = vsub.f32 %v285_v14, %v442_v49  ;;  %477 = vadd.xlane.f32.xlu0 %v476_v50  ;;  %v532_v13 = vpack.c.bf16 %v524_v11, %v524_v11 }
 0x183   :  { %v1235_v53 = vpop.eup %1069  ;;  %v470_v54 = vmul.f32 1.442695, %v457_v51  ;;  %v468_v55 = vmul.f32 1.442695, %v456_v52  ;;  %v545_v14 = vsel %vm543_vm2, %v532_v13, 0 }
 0x184   :  { %v479_v56 = vsel %vm59_vm0, %v1235_v53, 0.0  ;;  %1018 = vmatpush3.bf16.msra.mxu0 %v545_v14 }
 0x185   :  { %1075 = vpow2.f32 %v470_v54  ;;  %480 = vadd.xlane.f32.xlu1 %v479_v56  ;;  %1029 = vmatprep.subr.bf16.mxu0 %v1099_v0 }
 0x186   :  { %1077 = vpow2.f32 %v468_v55 }
 0x187   :  { %v1239_v57 = vpop.eup %1071 }
 0x188   :  { %v451_v58 = vpop.xlane.xlu1 %450  ;;  %v448_v59 = vpop.xlane.xlu0 %447  ;;  %v482_v60 = vsel %vm59_vm0, %v1239_v57, 0.0 }
 0x189   :  { %v459_v61 = vsub.f32 %v423_v26, %v451_v58  ;;  %v458_v62 = vsub.f32 %v377_v25, %v448_v59  ;;  %483 = vadd.xlane.f32.xlu0 %v482_v60  ;;  %v536_v25 = vpack.c.bf16 %v528_v24, %v528_v24 }
 0x18b   :  { %v1243_v63 = vpop.eup %1073  ;;  %v474_v1 = vmul.f32 1.442695, %v459_v61  ;;  %v472_v2 = vmul.f32 1.442695, %v458_v62  ;;  %v729_v26 = vsel %vm543_vm2, %v536_v25, 0 }
 0x18c   :  { %v485_v3 = vsel %vm59_vm0, %v1243_v63, 0.0 }
 0x18d   :  { %1079 = vpow2.f32 %v474_v1  ;;  %486 = vadd.xlane.f32.xlu1 %v485_v3 }
 0x18e   :  { %1081 = vpow2.f32 %v472_v2 }
 0x18f   :  { %v1247_v4 = vpop.eup %1075 }
 0x190   :  { %v1249_v5 = vpop.eup %1077  ;;  %v491_v6 = vsel %vm59_vm0, %v1247_v4, 0.0 }
 0x191   :  { %492 = vadd.xlane.f32.xlu1 %v491_v6  ;;  %v488_v7 = vsel %vm59_vm0, %v1249_v5, 0.0 }
 0x192   :  { %489 = vadd.xlane.f32.xlu0 %v488_v7 }
 0x197   :  { %v1255_v8 = vpop.eup %1079 }
 0x198   :  { %v1257_v9 = vpop.eup %1081  ;;  %v497_v10 = vsel %vm59_vm0, %v1255_v8, 0.0 }
 0x199   :  { %498 = vadd.xlane.f32.xlu1 %v497_v10  ;;  %v494_v12 = vsel %vm59_vm0, %v1257_v9, 0.0 }
 0x19a   :  { %495 = vadd.xlane.f32.xlu0 %v494_v12 }
 0x20e   :  { %v478_v36 = vpop.xlane.xlu0 %477 }
 0x20f   :  { %1083 = vrcp.f32 %v478_v36 }
 0x212   :  { %v481_v37 = vpop.xlane.xlu1 %480 }
 0x213   :  { %1085 = vrcp.f32 %v481_v37 }
 0x216   :  { %v484_v38 = vpop.xlane.xlu0 %483 }
 0x217   :  { %1087 = vrcp.f32 %v484_v38 }
 0x219   :  { %v1084_v39 = vpop.eup %1083 }
 0x21a   :  { %v508_v40 = vmul.f32 %v1084_v39, %v1231_v46  ;;  %v487_v41 = vpop.xlane.xlu1 %486 }
 0x21b   :  { %1089 = vrcp.f32 %v487_v41 }
 0x21c   :  { %v516_v42 = vpack.c.bf16 %v508_v40, %v508_v40 }
 0x21d   :  { %v1086_v43 = vpop.eup %1085 }
 0x21e   :  { %v509_v44 = vmul.f32 %v1086_v43, %v1235_v53  ;;  %v493_v45 = vpop.xlane.xlu1 %492  ;;  %1020 = vmatmul.mubr.msk.bf16.vlgmr.msra.gmra.mrb[16].mxu0 %vm59_vm0, %v516_v42 }
 0x21f   :  { %1091 = vrcp.f32 %v493_v45  ;;  %v490_v47 = vpop.xlane.xlu0 %489  ;;  %1030 = vmatpush3.bf16.msra.mxu0 %v637_v20  ;;  %1031 = vmatprep.mubr.msk.bf16.mxu0 %vm1100_vm1, %v1099_v0 }
 0x220   :  { %1093 = vrcp.f32 %v490_v47  ;;  %v517_v48 = vpack.c.bf16 %v509_v44, %v509_v44  ;;  %1041 = vmatprep.subr.bf16.mxu0 %v1099_v0 }
 0x221   :  { %v1088_v46 = vpop.eup %1087 }
 0x222   :  { %v510_v49 = vmul.f32 %v1088_v46, %v1239_v57  ;;  %1026 = vmatmul.mubr.msk.bf16.vlgmr.msra.gmra.mrb[16].mxu1 %vm59_vm0, %v517_v48 }
 0x223   :  { %1036 = vmatpush3.bf16.msra.mxu1 %v683_v23  ;;  %1037 = vmatprep.mubr.msk.bf16.mxu1 %vm1100_vm1, %v1099_v0 }
 0x224   :  { %v518_v50 = vpack.c.bf16 %v510_v49, %v510_v49  ;;  %1047 = vmatprep.subr.bf16.mxu1 %v1099_v0 }
 0x225   :  { %v1090_v51 = vpop.eup %1089 }
 0x226   :  { %v511_v52 = vmul.f32 %v1090_v51, %v1243_v63  ;;  %v499_v53 = vpop.xlane.xlu1 %498  ;;  %1032 = vmatmul.mubr.msk.bf16.vlgmr.msra.gmra.mrb[20].mxu0 %vm59_vm0, %v518_v50 }
 0x227   :  { %1095 = vrcp.f32 %v499_v53  ;;  %v496_v54 = vpop.xlane.xlu0 %495  ;;  %1042 = vmatpush3.bf16.msra.mxu0 %v729_v26  ;;  %1043 = vmatprep.mubr.msk.bf16.mxu0 %vm1100_vm1, %v1099_v0 }
 0x228   :  { %1097 = vrcp.f32 %v496_v54  ;;  %v519_v55 = vpack.c.bf16 %v511_v52, %v511_v52  ;;  %1053 = vmatprep.subr.bf16.mxu0 %v1099_v0 }
 0x229   :  { %v1092_v56 = vpop.eup %1091 }
 0x22a   :  { %v1094_v57 = vpop.eup %1093  ;;  %1038 = vmatmul.mubr.msk.bf16.vlgmr.msra.gmra.mrb[20].mxu1 %vm59_vm0, %v519_v55  ;;  %v513_v59 = vmul.f32 %v1092_v56, %v1247_v4 }
 0x22b   :  { %v512_v58 = vmul.f32 %v1094_v57, %v1249_v5  ;;  %1048 = vmatpush3.bf16.msra.mxu1 %v775_v29  ;;  %1049 = vmatprep.mubr.msk.bf16.mxu1 %vm1100_vm1, %v1099_v0 }
 0x22c   :  { %1059 = vmatprep.subr.bf16.mxu1 %v1099_v0  ;;  %v521_v61 = vpack.c.bf16 %v513_v59, %v513_v59 }
 0x22d   :  { %v520_v60 = vpack.c.bf16 %v512_v58, %v512_v58 }
 0x22f   :  { %1044 = vmatmul.mubr.msk.bf16.vlgmr.msra.gmra.mrb[24].mxu0 %vm59_vm0, %v520_v60 }
 0x230   :  { %1054 = vmatpush3.bf16.msra.mxu0 %v821_v32  ;;  %1055 = vmatprep.mubr.msk.bf16.mxu0 %vm1100_vm1, %v1099_v0 }
 0x231   :  { %v1096_v62 = vpop.eup %1095 }
 0x232   :  { %v1098_v63 = vpop.eup %1097  ;;  %1050 = vmatmul.mubr.msk.bf16.vlgmr.msra.gmra.mrb[24].mxu1 %vm59_vm0, %v521_v61  ;;  %v515_v2 = vmul.f32 %v1096_v62, %v1255_v8 }
 0x233   :  { %v514_v1 = vmul.f32 %v1098_v63, %v1257_v9  ;;  %1060 = vmatpush3.bf16.msra.mxu1 %v867_v35  ;;  %1061 = vmatprep.mubr.msk.bf16.mxu1 %vm1100_vm1, %v1099_v0 }
 0x234   :  { %v523_v4 = vpack.c.bf16 %v515_v2, %v515_v2 }
 0x235   :  { %v522_v3 = vpack.c.bf16 %v514_v1, %v514_v1 }
 0x237   :  { %1056 = vmatmul.mubr.msk.bf16.vlgmr.msra.gmra.mrb[28].mxu0 %vm59_vm0, %v522_v3 }
 0x23a   :  { %1062 = vmatmul.mubr.msk.bf16.vlgmr.msra.gmra.mrb[28].mxu1 %vm59_vm0, %v523_v4 }
 0x2f1   :  { %v581_v5 = vpop.f32.mrb[16].mxu0 }
 0x2f2   :  { %909 = vst.msk [vmem:[%s1365_s4] sm:$0xff] %vm59_vm0, %v581_v5  ;;  %v1021_v6 = vpop.f32.mrb[17].mxu0 }
 0x2f3   :  { %v584_v7 = vpop.f32.mrb[18].mxu0 }
 0x2f4   :  { %v1022_v9 = vpop.f32.mrb[19].mxu0 }
 0x2f5   :  { %v627_v10 = vpop.f32.mrb[16].mxu1 }
 0x2f6   :  { %910 = vst.msk [vmem:[%s1365_s4 + $0x8] sm:$0xff] %vm59_vm0, %v627_v10  ;;  %v1027_v0 = vpop.f32.mrb[17].mxu1 }
 0x2f7   :  { %v630_v8 = vpop.f32.mrb[18].mxu1 }
 0x2f8   :  { %v1028_v11 = vpop.f32.mrb[19].mxu1 }
 0x2f9   :  { %v673_v12 = vpop.f32.mrb[20].mxu0 }
 0x2fa   :  { %911 = vst.msk [vmem:[%s1365_s4 + $0x10] sm:$0xff] %vm59_vm0, %v673_v12  ;;  %v1033_v13 = vpop.f32.mrb[21].mxu0 }
 0x2fb   :  { %v676_v14 = vpop.f32.mrb[22].mxu0 }
 0x2fc   :  { %v1034_v15 = vpop.f32.mrb[23].mxu0 }
 0x2fd   :  { %v719_v16 = vpop.f32.mrb[20].mxu1 }
 0x2fe   :  { %912 = vst.msk [vmem:[%s1365_s4 + $0x18] sm:$0xff] %vm59_vm0, %v719_v16  ;;  %v1039_v17 = vpop.f32.mrb[21].mxu1 }
 0x2ff   :  { %v722_v18 = vpop.f32.mrb[22].mxu1 }
 0x300   :  { %v1040_v19 = vpop.f32.mrb[23].mxu1 }
 0x302   :  { %v765_v20 = vpop.f32.mrb[24].mxu0 }
 0x303   :  { %913 = vst.msk [vmem:[%s1365_s4 + $0x20] sm:$0xff] %vm59_vm0, %v765_v20  ;;  %v1045_v21 = vpop.f32.mrb[25].mxu0 }
 0x304   :  { %v768_v22 = vpop.f32.mrb[26].mxu0 }
 0x305   :  { %v1046_v23 = vpop.f32.mrb[27].mxu0  ;;  %v811_v24 = vpop.f32.mrb[24].mxu1 }
 0x306   :  { %914 = vst.msk [vmem:[%s1365_s4 + $0x28] sm:$0xff] %vm59_vm0, %v811_v24  ;;  %v1051_v25 = vpop.f32.mrb[25].mxu1 }
 0x307   :  { %v814_v26 = vpop.f32.mrb[26].mxu1 }
 0x308   :  { %v1052_v27 = vpop.f32.mrb[27].mxu1 }
 0x30a   :  { %v857_v28 = vpop.f32.mrb[28].mxu0 }
 0x30b   :  { %915 = vst.msk [vmem:[%s1365_s4 + $0x30] sm:$0xff] %vm59_vm0, %v857_v28  ;;  %v1057_v29 = vpop.f32.mrb[29].mxu0 }
 0x30c   :  { %v860_v30 = vpop.f32.mrb[30].mxu0 }
 0x30d   :  { %v1058_v31 = vpop.f32.mrb[31].mxu0  ;;  %v903_v32 = vpop.f32.mrb[28].mxu1 }
 0x30e   :  { %916 = vst.msk [vmem:[%s1365_s4 + $0x38] sm:$0xff] %vm59_vm0, %v903_v32  ;;  %v1063_v33 = vpop.f32.mrb[29].mxu1 }
 0x30f   :  { %v906_v34 = vpop.f32.mrb[30].mxu1 }
 0x310   :  { %v1064_v35 = vpop.f32.mrb[31].mxu1 }

// kernel: talk_forward.32
= control target key start
LH: loop header
LB: loop body
LE: loop exit
PB: predicated region body
PF: predicated region fallthrough
CT: control target
= control target key end

     0   :  { %vm47_vm0 = vcmask 1043456   ;;  %vm40_vm1 = vcmask 195584   ;;  %vm204_vm6 = vcmask 261120   ;;  %s340_s1 = inlined_call_operand.vmem [shape: bf16[24,32], index: 1, kind: input, shape index: {}]   ;;  %s341_s0 = inlined_call_operand.vmem [shape: f32[32,24], index: 0, kind: input, shape index: {}]   ;;  %s342_s2 = inlined_call_operand.vmem [shape: f32[1,32], index: 2, kind: input, shape index: {}]   ;;  %s343_s3 = inlined_call_operand.vmem [shape: f32[32,32], index: 3, kind: output, shape index: {}]  }
   0x1   :  { %v232_v0 = vld [vmem:[%s340_s1] sm:$0xff]   ;;  %v233_v1 = vld [vmem:[%s340_s1 + $0x8] ss:$0 sps:$4 sm:$0xff]   ;;  %v17_v5 = vld [vmem:[%s341_s0 + $0x10] sm:$0xff] }
   0x2   :  { %v15_v2 = vld [vmem:[%s341_s0] sm:$0xff]  ;;  %v16_v3 = vld [vmem:[%s341_s0 + $0x8] sm:$0xff]  ;;  %222 = vmatprep.subr.bf16.mxu0 %v232_v0  ;;  %v18_v6 = vld [vmem:[%s341_s0 + $0x18] sm:$0xff]  ;;  %v49_v7 = vsel %vm47_vm0, %v233_v1, 0 }
   0x3   :  { %v19_v4 = vpack.c.bf16 %v16_v3, %v15_v2  ;;  %223 = vmatpush3.bf16.msra.mxu0 %v232_v0  ;;  %v20_v8 = vpack.c.bf16 %v18_v6, %v17_v5  ;;  %v213_v9 = vld [vmem:[%s342_s2] ss:$0 sm:$0xff] }
   0x4   :  { %230 = vmatprep.subr.msk.bf16.mxu0 %vm47_vm0, %v233_v1 }
   0x5   :  { %226 = vmatprep.mubr.msk.bf16.mxu0 %vm40_vm1, %v19_v4 }
   0x7   :  { %225 = vmatpush3.bf16.msra.mxu0 %v49_v7 }
   0xa   :  { %227 = vmatmul.mubr.msk.bf16.vlgmr.msra.gmra.mrb[0].mxu0 %vm40_vm1, %v20_v8 }
  0xdd   :  { %v228_v10 = vpop.f32.mrb[0].mxu0 }
  0xde   :  { %v292_v11 = vadd.f32 %v228_v10, %v213_v9  ;;  %v85_v12 = vpop.f32.mrb[1].mxu0 }
  0xdf   :  { %v294_v13 = vadd.f32 %v213_v9, %v85_v12  ;;  %v229_v14 = vpop.f32.mrb[2].mxu0 }
  0xe0   :  { %v297_v15 = vmul.f32 0.70710677, %v292_v11  ;;  %v299_v16 = vadd.f32 %v229_v14, %v213_v9  ;;  %v88_v17 = vpop.f32.mrb[3].mxu0 }
  0xe1   :  { %v302_v18 = vmul.f32 0.70710677, %v294_v13  ;;  %v308_v21 = vadd.f32 %v213_v9, %v88_v17 }
  0xe2   :  { %v118_v19 = vand.u32 2147483647, %v297_v15  ;;  %v306_v20 = vmul.f32 0.70710677, %v299_v16  ;;  %vm110_vm2 = vcmp.lt.f32.partialorder %v297_v15, 0.0 }
  0xe3   :  { %v116_v22 = vand.u32 2147483647, %v302_v18  ;;  %v313_v27 = vmul.f32 0.70710677, %v308_v21  ;;  %vm108_vm3 = vcmp.lt.f32.partialorder %v302_v18, 0.0 }
  0xe4   :  { %v122_v23 = vmul.f32 0.3275911, %v118_v19  ;;  %v119_v25 = vand.u32 2147483647, %v306_v20  ;;  %v170_v34 = vsub.f32 0.0, %v118_v19  ;;  %vm111_vm4 = vcmp.lt.f32.partialorder %v306_v20, 0.0 }
  0xe5   :  { %v120_v24 = vmul.f32 0.3275911, %v116_v22  ;;  %v117_v30 = vand.u32 2147483647, %v313_v27  ;;  %v168_v35 = vsub.f32 0.0, %v116_v22  ;;  %vm109_vm5 = vcmp.lt.f32.partialorder %v313_v27, 0.0 }
  0xe6   :  { %v126_v26 = vadd.f32 1.0, %v122_v23  ;;  %v123_v29 = vmul.f32 0.3275911, %v119_v25  ;;  %v174_v37 = vmul.f32 %v170_v34, %v118_v19  ;;  %v171_v38 = vsub.f32 0.0, %v119_v25 }
  0xe7   :  { %v124_v28 = vadd.f32 1.0, %v120_v24  ;;  %v121_v32 = vmul.f32 0.3275911, %v117_v30  ;;  %v172_v41 = vmul.f32 %v168_v35, %v116_v22  ;;  %v169_v43 = vsub.f32 0.0, %v117_v30 }
  0xe8   :  { %234 = vrcp.f32 %v126_v26  ;;  %v127_v31 = vadd.f32 1.0, %v123_v29  ;;  %v180_v46 = vmul.f32 1.442695, %v174_v37  ;;  %v175_v48 = vmul.f32 %v171_v38, %v119_v25 }
  0xe9   :  { %236 = vrcp.f32 %v124_v28  ;;  %v125_v33 = vadd.f32 1.0, %v121_v32  ;;  %v176_v50 = vmul.f32 1.442695, %v172_v41  ;;  %v173_v54 = vmul.f32 %v169_v43, %v117_v30 }
  0xea   :  { %238 = vrcp.f32 %v127_v31  ;;  %v182_v59 = vmul.f32 1.442695, %v175_v48  ;;  %v250_v35 = vmov 1.0  }
  0xeb   :  { %240 = vrcp.f32 %v125_v33  ;;  %v178_v0 = vmul.f32 1.442695, %v173_v54  ;;  %v114_v37 = vsel %vm110_vm2, -1.0, %v250_v35  ;;  %v115_v48 = vsel %vm111_vm4, -1.0, %v250_v35 }
  0xec   :  { %242 = vpow2.f32 %v180_v46  ;;  %v100_v46 = vmul.f32 0.5, %v294_v13  ;;  %v101_v54 = vmul.f32 0.5, %v308_v21 }
  0xed   :  { %244 = vpow2.f32 %v176_v50 }
  0xee   :  { %246 = vpow2.f32 %v182_v59 }
  0xef   :  { %248 = vpow2.f32 %v178_v0 }
  0xf2   :  { %v235_v36 = vpop.eup %234 }
  0xf3   :  { %v237_v39 = vpop.eup %236  ;;  %v134_v40 = vmul.f32 1.0614054, %v235_v36 }
  0xf4   :  { %v132_v42 = vmul.f32 1.0614054, %v237_v39  ;;  %v239_v45 = vpop.eup %238 }
  0xf5   :  { %v138_v44 = vadd.f32 -1.4531521, %v134_v40  ;;  %v135_v51 = vmul.f32 1.0614054, %v239_v45  ;;  %v241_v52 = vpop.eup %240 }
  0xf6   :  { %v136_v47 = vadd.f32 -1.4531521, %v132_v42  ;;  %v133_v57 = vmul.f32 1.0614054, %v241_v52  ;;  %v243_v23 = vpop.eup %242  ;;  %v102_v42 = vmul.f32 0.5, %v292_v11  ;;  %v103_v11 = vmul.f32 0.5, %v299_v16 }
  0xf7   :  { %v142_v49 = vmul.f32 %v235_v36, %v138_v44  ;;  %v139_v56 = vadd.f32 -1.4531521, %v135_v51  ;;  %v245_v25 = vpop.eup %244 }
  0xf8   :  { %v140_v53 = vmul.f32 %v237_v39, %v136_v47  ;;  %v137_v62 = vadd.f32 -1.4531521, %v133_v57  ;;  %v247_v34 = vpop.eup %246 }
  0xf9   :  { %v146_v55 = vadd.f32 1.4214138, %v142_v49  ;;  %v143_v61 = vmul.f32 %v239_v45, %v139_v56  ;;  %v249_v41 = vpop.eup %248 }
  0xfa   :  { %v144_v58 = vadd.f32 1.4214138, %v140_v53  ;;  %v141_v3 = vmul.f32 %v241_v52, %v137_v62  ;;  %v113_v53 = vsel %vm109_vm5, -1.0, %v250_v35 }
  0xfb   :  { %v150_v60 = vmul.f32 %v235_v36, %v146_v55  ;;  %v147_v2 = vadd.f32 1.4214138, %v143_v61 }
  0xfc   :  { %v148_v63 = vmul.f32 %v237_v39, %v144_v58  ;;  %v145_v7 = vadd.f32 1.4214138, %v141_v3 }
  0xfd   :  { %v154_v1 = vadd.f32 -0.28449672, %v150_v60  ;;  %v151_v6 = vmul.f32 %v239_v45, %v147_v2 }
  0xfe   :  { %v152_v4 = vadd.f32 -0.28449672, %v148_v63  ;;  %v149_v12 = vmul.f32 %v241_v52, %v145_v7 }
  0xff   :  { %v158_v5 = vmul.f32 %v235_v36, %v154_v1  ;;  %v155_v10 = vadd.f32 -0.28449672, %v151_v6 }
 0x100   :  { %v156_v8 = vmul.f32 %v237_v39, %v152_v4  ;;  %v153_v22 = vadd.f32 -0.28449672, %v149_v12 }
 0x101   :  { %v162_v9 = vadd.f32 0.2548296, %v158_v5  ;;  %v159_v19 = vmul.f32 %v239_v45, %v155_v10 }
 0x102   :  { %v160_v14 = vadd.f32 0.2548296, %v156_v8  ;;  %v157_v29 = vmul.f32 %v241_v52, %v153_v22 }
 0x103   :  { %v166_v17 = vmul.f32 %v235_v36, %v162_v9  ;;  %v163_v28 = vadd.f32 0.2548296, %v159_v19  ;;  %v112_v36 = vsel %vm108_vm3, -1.0, %v250_v35 }
 0x104   :  { %v164_v24 = vmul.f32 %v237_v39, %v160_v14  ;;  %v161_v33 = vadd.f32 0.2548296, %v157_v29 }
 0x105   :  { %v186_v26 = vmul.f32 %v243_v23, %v166_v17  ;;  %v167_v32 = vmul.f32 %v239_v45, %v163_v28 }
 0x106   :  { %v184_v30 = vmul.f32 %v245_v25, %v164_v24  ;;  %v165_v39 = vmul.f32 %v241_v52, %v161_v33 }
 0x107   :  { %v190_v31 = vsub.f32 1.0, %v186_v26  ;;  %v187_v15 = vmul.f32 %v247_v34, %v167_v32 }
 0x108   :  { %v188_v38 = vsub.f32 1.0, %v184_v30  ;;  %v185_v45 = vmul.f32 %v249_v41, %v165_v39 }
 0x109   :  { %v194_v40 = vmul.f32 %v190_v31, %v114_v37  ;;  %v191_v44 = vsub.f32 1.0, %v187_v15 }
 0x10a   :  { %v192_v18 = vmul.f32 %v188_v38, %v112_v36  ;;  %v189_v51 = vsub.f32 1.0, %v185_v45 }
 0x10b   :  { %v198_v43 = vadd.f32 1.0, %v194_v40  ;;  %v195_v50 = vmul.f32 %v191_v44, %v115_v48 }
 0x10c   :  { %v196_v47 = vadd.f32 1.0, %v192_v18  ;;  %v193_v27 = vmul.f32 %v189_v51, %v113_v53 }
 0x10d   :  { %v202_v49 = vmul.f32 %v198_v43, %v102_v42  ;;  %v199_v52 = vadd.f32 1.0, %v195_v50 }
 0x10e   :  { %v200_v20 = vmul.f32 %v196_v47, %v100_v46  ;;  %v197_v55 = vadd.f32 1.0, %v193_v27 }
 0x10f   :  { %207 = vst.msk [vmem:[%s343_s3 + $0x10] sm:$0xff] %vm204_vm6, %v202_v49  ;;  %v203_v13 = vmul.f32 %v199_v52, %v103_v11 }
 0x110   :  { %205 = vst.msk [vmem:[%s343_s3] sm:$0xff] %vm204_vm6, %v200_v20  ;;  %v201_v56 = vmul.f32 %v197_v55, %v101_v54 }
 0x111   :  { %208 = vst.msk [vmem:[%s343_s3 + $0x18] sm:$0xff] %vm204_vm6, %v203_v13 }
 0x112   :  { %206 = vst.msk [vmem:[%s343_s3 + $0x8] sm:$0xff] %vm204_vm6, %v201_v56 }

// kernel: talk_forward.33
= control target key start
LH: loop header
LB: loop body
LE: loop exit
PB: predicated region body
PF: predicated region fallthrough
CT: control target
= control target key end

     0   :  { %v225_v0 = vmov 0.0   ;;  %vm226_vm0 = vmmov 0   ;;  %vm73_vm1 = vcmask 785408   ;;  %v227_v55 = vmov 1.0   ;;  %s281_s1 = inlined_call_operand.vmem [shape: bf16[96,32], index: 1, kind: input, shape index: {}]   ;;  %s282_s0 = inlined_call_operand.vmem [shape: f32[16,96], index: 0, kind: input, shape index: {}]   ;;  %s283_s2 = inlined_call_operand.vmem [shape: f32[1,32], index: 2, kind: input, shape index: {}]   ;;  %s284_s3 = inlined_call_operand.vmem [shape: f32[16,32], index: 3, kind: output, shape index: {}]  }
   0x1   :  { %192 = vmatprep.subr.bf16.mxu0 %v225_v0  ;;  %v211_v1 = vld [vmem:[%s281_s1] sm:$0xff]   ;;  %204 = vmatprep.mubr.msk.bf16.mxu0 %vm226_vm0, %v225_v0  ;;  %v212_v2 = vld [vmem:[%s281_s1 + $0x8] sm:$0xff]   ;;  %v213_v3 = vld [vmem:[%s281_s1 + $0x10] sm:$0xff]   ;;  %vm170_vm4 = vcmask 261120  }
   0x2   :  { %193 = vmatpush3.bf16.msra.mxu0 %v211_v1  ;;  %v214_v4 = vld [vmem:[%s281_s1 + $0x18] sm:$0xff]   ;;  %v215_v5 = vld [vmem:[%s281_s1 + $0x20] sm:$0xff]   ;;  %v216_v6 = vld [vmem:[%s281_s1 + $0x28] sm:$0xff]  }
   0x3   :  { %194 = vmatprep.subr.bf16.mxu0 %v225_v0  ;;  %v15_v7 = vld [vmem:[%s282_s0] sm:$0xff]  ;;  %v16_v8 = vld [vmem:[%s282_s0 + $0x8] sm:$0xff] }
   0x4   :  { %v17_v9 = vpack.c.bf16 %v16_v8, %v15_v7  ;;  %v177_v10 = vld [vmem:[%s283_s2] ss:$0 sm:$0xff] }
   0x6   :  { %195 = vmatpush3.bf16.msra.mxu0 %v212_v2 }
   0x7   :  { %196 = vmatprep.subr.bf16.mxu0 %v225_v0 }
   0xa   :  { %197 = vmatpush3.bf16.msra.mxu0 %v213_v3 }
   0xb   :  { %198 = vmatprep.subr.bf16.mxu0 %v225_v0 }
   0xe   :  { %199 = vmatpush3.bf16.msra.mxu0 %v214_v4 }
   0xf   :  { %200 = vmatprep.subr.bf16.mxu0 %v225_v0 }
  0x12   :  { %201 = vmatpush3.bf16.msra.mxu0 %v215_v5 }
  0x13   :  { %202 = vmatprep.subr.bf16.mxu0 %v225_v0 }
  0x16   :  { %203 = vmatpush3.bf16.msra.mxu0 %v216_v6 }
  0x19   :  { %205 = vmatmul.mubr.msk.bf16.vlgmr.msra.gmra.mrb[0].mxu0 %vm73_vm1, %v17_v9 }
  0xec   :  { %v111_v11 = vpop.f32.mrb[0].mxu0 }
  0xed   :  { %v112_v12 = vadd.f32 %v177_v10, %v111_v11  ;;  %v206_v13 = vpop.f32.mrb[1].mxu0 }
  0xee   :  { %v114_v14 = vpop.f32.mrb[2].mxu0 }
  0xef   :  { %v120_v15 = vmul.f32 0.70710677, %v112_v12  ;;  %v115_v16 = vadd.f32 %v177_v10, %v114_v14  ;;  %v207_v17 = vpop.f32.mrb[3].mxu0  ;;  %v118_v60 = vmul.f32 0.5, %v112_v12 }
  0xf1   :  { %v126_v18 = vand.u32 2147483647, %v120_v15  ;;  %v121_v19 = vmul.f32 0.70710677, %v115_v16  ;;  %vm122_vm2 = vcmp.lt.f32.partialorder %v120_v15, 0.0  ;;  %v119_v1 = vmul.f32 0.5, %v115_v16 }
  0xf2   :  { %v124_v56 = vsel %vm122_vm2, -1.0, %v227_v55 }
  0xf3   :  { %v128_v20 = vmul.f32 0.3275911, %v126_v18  ;;  %v127_v21 = vand.u32 2147483647, %v121_v19  ;;  %v152_v25 = vsub.f32 0.0, %v126_v18  ;;  %vm123_vm3 = vcmp.lt.f32.partialorder %v121_v19, 0.0 }
  0xf4   :  { %v125_v62 = vsel %vm123_vm3, -1.0, %v227_v55 }
  0xf5   :  { %v130_v22 = vadd.f32 1.0, %v128_v20  ;;  %v129_v23 = vmul.f32 0.3275911, %v127_v21  ;;  %v153_v26 = vsub.f32 0.0, %v127_v21  ;;  %v154_v28 = vmul.f32 %v152_v25, %v126_v18 }
  0xf7   :  { %217 = vrcp.f32 %v130_v22  ;;  %v131_v24 = vadd.f32 1.0, %v129_v23  ;;  %v155_v32 = vmul.f32 %v153_v26, %v127_v21  ;;  %v156_v33 = vmul.f32 1.442695, %v154_v28 }
  0xf9   :  { %219 = vrcp.f32 %v131_v24  ;;  %v158_v38 = vmul.f32 1.442695, %v155_v32 }
  0xfa   :  { %221 = vpow2.f32 %v156_v33 }
  0xfb   :  { %223 = vpow2.f32 %v158_v38 }
 0x101   :  { %v218_v27 = vpop.eup %217 }
 0x102   :  { %v134_v29 = vmul.f32 1.0614054, %v218_v27 }
 0x103   :  { %v220_v30 = vpop.eup %219 }
 0x104   :  { %v136_v31 = vadd.f32 -1.4531521, %v134_v29  ;;  %v135_v34 = vmul.f32 1.0614054, %v220_v30  ;;  %v222_v49 = vpop.eup %221 }
 0x105   :  { %v224_v53 = vpop.eup %223 }
 0x106   :  { %v138_v35 = vmul.f32 %v218_v27, %v136_v31  ;;  %v137_v36 = vadd.f32 -1.4531521, %v135_v34 }
 0x108   :  { %v140_v37 = vadd.f32 1.4214138, %v138_v35  ;;  %v139_v39 = vmul.f32 %v220_v30, %v137_v36 }
 0x10a   :  { %v142_v40 = vmul.f32 %v218_v27, %v140_v37  ;;  %v141_v41 = vadd.f32 1.4214138, %v139_v39 }
 0x10c   :  { %v144_v42 = vadd.f32 -0.28449672, %v142_v40  ;;  %v143_v43 = vmul.f32 %v220_v30, %v141_v41 }
 0x10e   :  { %v146_v44 = vmul.f32 %v218_v27, %v144_v42  ;;  %v145_v45 = vadd.f32 -0.28449672, %v143_v43 }
 0x110   :  { %v148_v46 = vadd.f32 0.2548296, %v146_v44  ;;  %v147_v47 = vmul.f32 %v220_v30, %v145_v45 }
 0x112   :  { %v150_v48 = vmul.f32 %v218_v27, %v148_v46  ;;  %v149_v50 = vadd.f32 0.2548296, %v147_v47 }
 0x114   :  { %v160_v51 = vmul.f32 %v222_v49, %v150_v48  ;;  %v151_v52 = vmul.f32 %v220_v30, %v149_v50 }
 0x116   :  { %v162_v54 = vsub.f32 1.0, %v160_v51  ;;  %v161_v57 = vmul.f32 %v224_v53, %v151_v52 }
 0x118   :  { %v164_v58 = vmul.f32 %v162_v54, %v124_v56  ;;  %v163_v59 = vsub.f32 1.0, %v161_v57 }
 0x11a   :  { %v166_v61 = vadd.f32 1.0, %v164_v58  ;;  %v165_v63 = vmul.f32 %v163_v59, %v125_v62 }
 0x11c   :  { %v168_v0 = vmul.f32 %v166_v61, %v118_v60  ;;  %v167_v2 = vadd.f32 1.0, %v165_v63 }
 0x11e   :  { %171 = vst.msk [vmem:[%s284_s3] sm:$0xff] %vm170_vm4, %v168_v0  ;;  %v169_v3 = vmul.f32 %v167_v2, %v119_v1 }
 0x120   :  { %172 = vst.msk [vmem:[%s284_s3 + $0x8] sm:$0xff] %vm170_vm4, %v169_v3 }

// kernel: talk_forward.37
= control target key start
LH: loop header
LB: loop body
LE: loop exit
PB: predicated region body
PF: predicated region fallthrough
CT: control target
= control target key end

     0   :  { %vm23_vm0 = vcmask 261120   ;;  %v229_v15 = vmov 0.0   ;;  %vm230_vm1 = vmmov 0   ;;  %s294_s0 = inlined_call_operand.vmem [shape: f32[16,32], index: 0, kind: input, shape index: {}]   ;;  %s295_s1 = inlined_call_operand.vmem [shape: bf16[32,128], index: 1, kind: input, shape index: {}]   ;;  %s296_s3 = inlined_call_operand.vmem [shape: f32[1,32], index: 3, kind: input, shape index: {}]   ;;  %s297_s4 = inlined_call_operand.vmem [shape: f32[1,32], index: 4, kind: input, shape index: {}]   ;;  %s298_s2 = inlined_call_operand.vmem [shape: f32[1,128], index: 2, kind: input, shape index: {}]   ;;  %s299_s5 = inlined_call_operand.vmem [shape: f32[16,128], index: 5, kind: output, shape index: {}]  }
   0x1   :  { %v21_v0 = vld [vmem:[%s294_s0] sm:$0xff]  ;;  %v22_v1 = vld [vmem:[%s294_s0 + $0x8] sm:$0xff]  ;;  %204 = vmatprep.subr.bf16.mxu0 %v229_v15  ;;  %208 = vmatprep.mubr.msk.bf16.mxu0 %vm230_vm1, %v229_v15 }
   0x2   :  { %v24_v2 = vsel %vm23_vm0, %v21_v0, 0.0  ;;  %v27_v3 = vsel %vm23_vm0, %v22_v1, 0.0  ;;  %v215_v14 = vld [vmem:[%s295_s1] sm:$0xff]   ;;  %v216_v16 = vld [vmem:[%s295_s1 + $0x8] sm:$0xff]  }
   0x3   :  { %25 = vadd.xlane.f32.xlu0 %v24_v2  ;;  %205 = vmatpush3.bf16.msra.mxu0 %v215_v14  ;;  %v195_v25 = vld [vmem:[%s296_s3] ss:$0 sm:$0xff] }
   0x4   :  { %206 = vmatprep.subr.bf16.mxu0 %v229_v15  ;;  %v196_v29 = vld [vmem:[%s297_s4] ss:$0 sm:$0xff]  ;;  %v231_v15 = vmov 1.0  }
   0x5   :  { %v197_v34 = vld [vmem:[%s298_s2] ss:$0 sm:$0xff] }
   0x7   :  { %28 = vadd.xlane.f32.xlu0 %v27_v3  ;;  %207 = vmatpush3.bf16.msra.mxu0 %v216_v16 }
  0x90   :  { %v26_v4 = vpop.xlane.xlu0 %25 }
  0x91   :  { %v31_v5 = vmul.f32 0.03125, %v26_v4 }
  0x93   :  { %v33_v6 = vsub.f32 %v21_v0, %v31_v5 }
  0x94   :  { %v29_v7 = vpop.xlane.xlu0 %28 }
  0x95   :  { %v32_v8 = vmul.f32 0.03125, %v29_v7  ;;  %v35_v9 = vmul.f32 %v33_v6, %v33_v6 }
  0x97   :  { %v34_v10 = vsub.f32 %v22_v1, %v32_v8  ;;  %v37_v11 = vsel %vm23_vm0, %v35_v9, 0.0 }
  0x98   :  { %38 = vadd.xlane.f32.xlu1 %v37_v11 }
  0x99   :  { %v36_v12 = vmul.f32 %v34_v10, %v34_v10 }
  0x9b   :  { %v40_v13 = vsel %vm23_vm0, %v36_v12, 0.0 }
  0x9c   :  { %41 = vadd.xlane.f32.xlu1 %v40_v13 }
 0x125   :  { %v39_v17 = vpop.xlane.xlu1 %38 }
 0x126   :  { %v43_v18 = vmul.f32 0.03125, %v39_v17 }
 0x128   :  { %v45_v19 = vadd.f32 1e-05, %v43_v18 }
 0x129   :  { %v42_v20 = vpop.xlane.xlu1 %41 }
 0x12a   :  { %217 = vrsqrt.f32 %v45_v19  ;;  %v44_v21 = vmul.f32 0.03125, %v42_v20 }
 0x12c   :  { %v46_v22 = vadd.f32 1e-05, %v44_v21 }
 0x12e   :  { %219 = vrsqrt.f32 %v46_v22 }
 0x134   :  { %v218_v23 = vpop.eup %217 }
 0x135   :  { %v49_v24 = vmul.f32 %v218_v23, %v33_v6 }
 0x137   :  { %v58_v28 = vmul.f32 %v195_v25, %v49_v24 }
 0x138   :  { %v220_v26 = vpop.eup %219 }
 0x139   :  { %v50_v27 = vmul.f32 %v220_v26, %v34_v10  ;;  %v67_v31 = vadd.f32 %v196_v29, %v58_v28 }
 0x13b   :  { %v59_v30 = vmul.f32 %v195_v25, %v50_v27 }
 0x13d   :  { %v68_v32 = vadd.f32 %v196_v29, %v59_v30 }
 0x13f   :  { %v69_v33 = vpack.c.bf16 %v68_v32, %v67_v31 }
 0x141   :  { %209 = vmatmul.mubr.msk.bf16.vlgmr.msra.gmra.mrb[0].mxu0 %vm23_vm0, %v69_v33 }
 0x214   :  { %v130_v35 = vpop.f32.mrb[0].mxu0 }
 0x215   :  { %v131_v36 = vadd.f32 %v197_v34, %v130_v35  ;;  %v210_v37 = vpop.f32.mrb[1].mxu0 }
 0x216   :  { %v133_v38 = vpop.f32.mrb[2].mxu0 }
 0x217   :  { %v139_v39 = vmul.f32 0.70710677, %v131_v36  ;;  %v134_v40 = vadd.f32 %v197_v34, %v133_v38  ;;  %v211_v41 = vpop.f32.mrb[3].mxu0  ;;  %v137_v20 = vmul.f32 0.5, %v131_v36 }
 0x219   :  { %v145_v42 = vand.u32 2147483647, %v139_v39  ;;  %v140_v43 = vmul.f32 0.70710677, %v134_v40  ;;  %vm141_vm2 = vcmp.lt.f32.partialorder %v139_v39, 0.0  ;;  %v138_v25 = vmul.f32 0.5, %v134_v40 }
 0x21a   :  { %v143_v16 = vsel %vm141_vm2, -1.0, %v231_v15 }
 0x21b   :  { %v147_v44 = vmul.f32 0.3275911, %v145_v42  ;;  %v146_v45 = vand.u32 2147483647, %v140_v43  ;;  %v171_v49 = vsub.f32 0.0, %v145_v42  ;;  %vm142_vm3 = vcmp.lt.f32.partialorder %v140_v43, 0.0 }
 0x21c   :  { %v144_v22 = vsel %vm142_vm3, -1.0, %v231_v15 }
 0x21d   :  { %v149_v46 = vadd.f32 1.0, %v147_v44  ;;  %v148_v47 = vmul.f32 0.3275911, %v146_v45  ;;  %v172_v50 = vsub.f32 0.0, %v146_v45  ;;  %v173_v52 = vmul.f32 %v171_v49, %v145_v42 }
 0x21f   :  { %221 = vrcp.f32 %v149_v46  ;;  %v150_v48 = vadd.f32 1.0, %v148_v47  ;;  %v174_v56 = vmul.f32 %v172_v50, %v146_v45  ;;  %v175_v57 = vmul.f32 1.442695, %v173_v52 }
 0x221   :  { %223 = vrcp.f32 %v150_v48  ;;  %v177_v62 = vmul.f32 1.442695, %v174_v56 }
 0x222   :  { %225 = vpow2.f32 %v175_v57 }
 0x223   :  { %227 = vpow2.f32 %v177_v62 }
 0x229   :  { %v222_v51 = vpop.eup %221 }
 0x22a   :  { %v153_v53 = vmul.f32 1.0614054, %v222_v51 }
 0x22b   :  { %v224_v54 = vpop.eup %223 }
 0x22c   :  { %v155_v55 = vadd.f32 -1.4531521, %v153_v53  ;;  %v154_v58 = vmul.f32 1.0614054, %v224_v54  ;;  %v226_v9 = vpop.eup %225 }
 0x22d   :  { %v228_v13 = vpop.eup %227 }
 0x22e   :  { %v157_v59 = vmul.f32 %v222_v51, %v155_v55  ;;  %v156_v60 = vadd.f32 -1.4531521, %v154_v58 }
 0x230   :  { %v159_v61 = vadd.f32 1.4214138, %v157_v59  ;;  %v158_v63 = vmul.f32 %v224_v54, %v156_v60 }
 0x232   :  { %v161_v0 = vmul.f32 %v222_v51, %v159_v61  ;;  %v160_v1 = vadd.f32 1.4214138, %v158_v63 }
 0x234   :  { %v163_v2 = vadd.f32 -0.28449672, %v161_v0  ;;  %v162_v3 = vmul.f32 %v224_v54, %v160_v1 }
 0x236   :  { %v165_v4 = vmul.f32 %v222_v51, %v163_v2  ;;  %v164_v5 = vadd.f32 -0.28449672, %v162_v3 }
 0x238   :  { %v167_v6 = vadd.f32 0.2548296, %v165_v4  ;;  %v166_v7 = vmul.f32 %v224_v54, %v164_v5 }
 0x23a   :  { %v169_v8 = vmul.f32 %v222_v51, %v167_v6  ;;  %v168_v10 = vadd.f32 0.2548296, %v166_v7 }
 0x23c   :  { %v179_v11 = vmul.f32 %v226_v9, %v169_v8  ;;  %v170_v12 = vmul.f32 %v224_v54, %v168_v10 }
 0x23e   :  { %v181_v14 = vsub.f32 1.0, %v179_v11  ;;  %v180_v17 = vmul.f32 %v228_v13, %v170_v12 }
 0x240   :  { %v183_v18 = vmul.f32 %v181_v14, %v143_v16  ;;  %v182_v19 = vsub.f32 1.0, %v180_v17 }
 0x242   :  { %v185_v21 = vadd.f32 1.0, %v183_v18  ;;  %v184_v23 = vmul.f32 %v182_v19, %v144_v22 }
 0x244   :  { %v187_v24 = vmul.f32 %v185_v21, %v137_v20  ;;  %v186_v26 = vadd.f32 1.0, %v184_v23 }
 0x246   :  { %189 = vst [vmem:[%s299_s5] sm:$0xff] %v187_v24  ;;  %v188_v27 = vmul.f32 %v186_v26, %v138_v25 }
 0x248   :  { %190 = vst [vmem:[%s299_s5 + $0x8] sm:$0xff] %v188_v27 }

// kernel: talk_forward.35
= control target key start
LH: loop header
LB: loop body
LE: loop exit
PB: predicated region body
PF: predicated region fallthrough
CT: control target
= control target key end

     0   :  { %v1095_v0 = vmov 0.0   ;;  %vm55_vm0 = vcmask 64512   ;;  %vm1096_vm1 = vmmov 0   ;;  %vm539_vm2 = vcmask 1043456   ;;  %s1349_s1 = inlined_call_operand.vmem [shape: f32[8,8,8], index: 1, kind: input, shape index: {}]   ;;  %s1350_s0 = inlined_call_operand.vmem [shape: f32[8,8,8], index: 0, kind: input, shape index: {}]   ;;  %s1351_s2 = inlined_call_operand.vmem [shape: f32[8,8,8], index: 2, kind: input, shape index: {}]   ;;  %s1352_s3 = inlined_call_operand.vmem [shape: f32[8,8,8], index: 3, kind: output, shape index: {}]  }
   0x1   :  { %965 = vmatprep.subr.bf16.mxu0 %v1095_v0  ;;  %971 = vmatprep.subr.bf16.mxu1 %v1095_v0  ;;  %v39_v1 = vld [vmem:[%s1349_s1] sm:$0xff]  ;;  %v40_v2 = vld [vmem:[%s1349_s1 + $0x8] sm:$0xff]  ;;  %v41_v7 = vld [vmem:[%s1349_s1 + $0x10] sm:$0xff] }
   0x2   :  { %v15_v3 = vld [vmem:[%s1350_s0] sm:$0xff]  ;;  %v47_v4 = vpack.c.bf16 %v39_v1, %v39_v1  ;;  %v48_v5 = vpack.c.bf16 %v40_v2, %v40_v2  ;;  %967 = vmatprep.mubr.msk.bf16.mxu0 %vm1096_vm1, %v1095_v0  ;;  %973 = vmatprep.mubr.msk.bf16.mxu1 %vm1096_vm1, %v1095_v0  ;;  %v16_v6 = vld [vmem:[%s1350_s0 + $0x8] sm:$0xff]  ;;  %v42_v8 = vld [vmem:[%s1349_s1 + $0x18] sm:$0xff]  ;;  %v49_v13 = vpack.c.bf16 %v41_v7, %v41_v7 }
   0x3   :  { %v23_v11 = vmul.f32 0.35355338, %v15_v3  ;;  %v24_v12 = vmul.f32 0.35355338, %v16_v6  ;;  %v50_v14 = vpack.c.bf16 %v42_v8, %v42_v8  ;;  %v17_v17 = vld [vmem:[%s1350_s0 + $0x10] sm:$0xff]  ;;  %v18_v18 = vld [vmem:[%s1350_s0 + $0x18] sm:$0xff] }
   0x4   :  { %v60_v9 = vsel %vm55_vm0, %v47_v4, 0  ;;  %v106_v10 = vsel %vm55_vm0, %v48_v5, 0  ;;  %v152_v19 = vsel %vm55_vm0, %v49_v13, 0  ;;  %v43_v21 = vld [vmem:[%s1349_s1 + $0x20] sm:$0xff]  ;;  %v44_v22 = vld [vmem:[%s1349_s1 + $0x28] sm:$0xff]  ;;  %v45_v33 = vld [vmem:[%s1349_s1 + $0x30] sm:$0xff] }
   0x5   :  { %966 = vmatpush3.bf16.xpose.msra.mxu0 %v60_v9  ;;  %972 = vmatpush3.bf16.xpose.msra.mxu1 %v106_v10  ;;  %v31_v15 = vpack.c.bf16 %v23_v11, %v23_v11  ;;  %v32_v16 = vpack.c.bf16 %v24_v12, %v24_v12  ;;  %v198_v20 = vsel %vm55_vm0, %v50_v14, 0  ;;  %v25_v23 = vmul.f32 0.35355338, %v17_v17  ;;  %v19_v29 = vld [vmem:[%s1350_s0 + $0x20] sm:$0xff]  ;;  %v20_v30 = vld [vmem:[%s1350_s0 + $0x28] sm:$0xff]  ;;  %v46_v34 = vld [vmem:[%s1349_s1 + $0x38] sm:$0xff] }
   0x6   :  { %977 = vmatprep.subr.bf16.mxu0 %v1095_v0  ;;  %983 = vmatprep.subr.bf16.mxu1 %v1095_v0  ;;  %v26_v24 = vmul.f32 0.35355338, %v18_v18  ;;  %v51_v25 = vpack.c.bf16 %v43_v21, %v43_v21  ;;  %v52_v26 = vpack.c.bf16 %v44_v22, %v44_v22  ;;  %v27_v35 = vmul.f32 0.35355338, %v19_v29  ;;  %v21_v41 = vld [vmem:[%s1350_s0 + $0x30] sm:$0xff]  ;;  %v22_v42 = vld [vmem:[%s1350_s0 + $0x38] sm:$0xff] }
   0x7   :  { %v33_v27 = vpack.c.bf16 %v25_v23, %v25_v23  ;;  %v28_v36 = vmul.f32 0.35355338, %v20_v30  ;;  %v53_v37 = vpack.c.bf16 %v45_v33, %v45_v33  ;;  %v54_v38 = vpack.c.bf16 %v46_v34, %v46_v34 }
   0x8   :  { %v34_v28 = vpack.c.bf16 %v26_v24, %v26_v24  ;;  %v244_v31 = vsel %vm55_vm0, %v51_v25, 0  ;;  %v290_v32 = vsel %vm55_vm0, %v52_v26, 0  ;;  %v35_v39 = vpack.c.bf16 %v27_v35, %v27_v35 }
   0x9   :  { %v36_v40 = vpack.c.bf16 %v28_v36, %v28_v36  ;;  %v336_v43 = vsel %vm55_vm0, %v53_v37, 0  ;;  %v382_v44 = vsel %vm55_vm0, %v54_v38, 0  ;;  %v29_v45 = vmul.f32 0.35355338, %v21_v41 }
   0xa   :  { %v30_v46 = vmul.f32 0.35355338, %v22_v42 }
   0xb   :  { %v37_v47 = vpack.c.bf16 %v29_v45, %v29_v45 }
   0xc   :  { %968 = vmatmul.mubr.msk.bf16.vlgmr.msra.gmra.mrb[0].mxu0 %vm55_vm0, %v31_v15  ;;  %974 = vmatmul.mubr.msk.bf16.vlgmr.msra.gmra.mrb[0].mxu1 %vm55_vm0, %v32_v16  ;;  %v38_v48 = vpack.c.bf16 %v30_v46, %v30_v46 }
   0xd   :  { %978 = vmatpush3.bf16.xpose.msra.mxu0 %v152_v19  ;;  %984 = vmatpush3.bf16.xpose.msra.mxu1 %v198_v20 }
   0xe   :  { %979 = vmatprep.mubr.msk.bf16.mxu0 %vm1096_vm1, %v1095_v0  ;;  %985 = vmatprep.mubr.msk.bf16.mxu1 %vm1096_vm1, %v1095_v0 }
   0xf   :  { %989 = vmatprep.subr.bf16.mxu0 %v1095_v0  ;;  %995 = vmatprep.subr.bf16.mxu1 %v1095_v0 }
  0x14   :  { %980 = vmatmul.mubr.msk.bf16.vlgmr.msra.gmra.mrb[4].mxu0 %vm55_vm0, %v33_v27  ;;  %986 = vmatmul.mubr.msk.bf16.vlgmr.msra.gmra.mrb[4].mxu1 %vm55_vm0, %v34_v28 }
  0x15   :  { %990 = vmatpush3.bf16.xpose.msra.mxu0 %v244_v31  ;;  %996 = vmatpush3.bf16.xpose.msra.mxu1 %v290_v32 }
  0x16   :  { %991 = vmatprep.mubr.msk.bf16.mxu0 %vm1096_vm1, %v1095_v0  ;;  %997 = vmatprep.mubr.msk.bf16.mxu1 %vm1096_vm1, %v1095_v0 }
  0x17   :  { %1001 = vmatprep.subr.bf16.mxu0 %v1095_v0  ;;  %1007 = vmatprep.subr.bf16.mxu1 %v1095_v0 }
  0x1c   :  { %992 = vmatmul.mubr.msk.bf16.vlgmr.msra.gmra.mrb[8].mxu0 %vm55_vm0, %v35_v39  ;;  %998 = vmatmul.mubr.msk.bf16.vlgmr.msra.gmra.mrb[8].mxu1 %vm55_vm0, %v36_v40 }
  0x1d   :  { %1002 = vmatpush3.bf16.xpose.msra.mxu0 %v336_v43  ;;  %1008 = vmatpush3.bf16.xpose.msra.mxu1 %v382_v44 }
  0x1e   :  { %1003 = vmatprep.mubr.msk.bf16.mxu0 %vm1096_vm1, %v1095_v0  ;;  %1009 = vmatprep.mubr.msk.bf16.mxu1 %vm1096_vm1, %v1095_v0 }
  0x1f   :  { %1013 = vmatprep.subr.bf16.mxu0 %v1095_v0  ;;  %1019 = vmatprep.subr.bf16.mxu1 %v1095_v0 }
  0x24   :  { %1004 = vmatmul.mubr.msk.bf16.vlgmr.msra.gmra.mrb[12].mxu0 %vm55_vm0, %v37_v47  ;;  %1010 = vmatmul.mubr.msk.bf16.vlgmr.msra.gmra.mrb[12].mxu1 %vm55_vm0, %v38_v48 }
  0x25   :  { %1015 = vmatprep.mubr.msk.bf16.mxu0 %vm1096_vm1, %v1095_v0  ;;  %1021 = vmatprep.mubr.msk.bf16.mxu1 %vm1096_vm1, %v1095_v0 }
  0xdf   :  { %v96_v49 = vpop.f32.mrb[0].mxu0  ;;  %v142_v50 = vpop.f32.mrb[0].mxu1 }
  0xe0   :  { %v969_v51 = vpop.f32.mrb[1].mxu0  ;;  %v424_v52 = vsel %vm55_vm0, %v96_v49, -inf  ;;  %v975_v53 = vpop.f32.mrb[1].mxu1  ;;  %v427_v58 = vsel %vm55_vm0, %v142_v50, -inf }
  0xe1   :  { %425 = vmax.xlane.f32.xlu0 %v424_v52  ;;  %v99_v54 = vpop.f32.mrb[2].mxu0  ;;  %v145_v55 = vpop.f32.mrb[2].mxu1 }
  0xe2   :  { %v970_v56 = vpop.f32.mrb[3].mxu0  ;;  %v976_v57 = vpop.f32.mrb[3].mxu1 }
  0xe5   :  { %428 = vmax.xlane.f32.xlu0 %v427_v58 }
  0xe7   :  { %v188_v59 = vpop.f32.mrb[4].mxu0  ;;  %v234_v60 = vpop.f32.mrb[4].mxu1 }
  0xe8   :  { %v981_v61 = vpop.f32.mrb[5].mxu0  ;;  %v430_v62 = vsel %vm55_vm0, %v188_v59, -inf  ;;  %v987_v63 = vpop.f32.mrb[5].mxu1  ;;  %v433_v5 = vsel %vm55_vm0, %v234_v60, -inf }
  0xe9   :  { %431 = vmax.xlane.f32.xlu1 %v430_v62  ;;  %v191_v1 = vpop.f32.mrb[6].mxu0  ;;  %v237_v2 = vpop.f32.mrb[6].mxu1 }
  0xea   :  { %v982_v3 = vpop.f32.mrb[7].mxu0  ;;  %v988_v4 = vpop.f32.mrb[7].mxu1  ;;  %v520_v2 = vld [vmem:[%s1351_s2] sm:$0xff] }
  0xeb   :  { %v528_v4 = vpack.c.bf16 %v520_v2, %v520_v2 }
  0xed   :  { %434 = vmax.xlane.f32.xlu1 %v433_v5  ;;  %v541_v5 = vsel %vm539_vm2, %v528_v4, 0 }
  0xee   :  { %1014 = vmatpush3.bf16.msra.mxu0 %v541_v5 }
  0xef   :  { %v280_v6 = vpop.f32.mrb[8].mxu0  ;;  %v326_v7 = vpop.f32.mrb[8].mxu1  ;;  %1025 = vmatprep.subr.bf16.mxu0 %v1095_v0 }
  0xf0   :  { %v439_v8 = vsel %vm55_vm0, %v326_v7, -inf  ;;  %v436_v9 = vsel %vm55_vm0, %v280_v6, -inf  ;;  %v993_v10 = vpop.f32.mrb[9].mxu0  ;;  %v999_v11 = vpop.f32.mrb[9].mxu1 }
  0xf1   :  { %440 = vmax.xlane.f32.xlu1 %v439_v8  ;;  %437 = vmax.xlane.f32.xlu0 %v436_v9  ;;  %v283_v12 = vpop.f32.mrb[10].mxu0  ;;  %v329_v13 = vpop.f32.mrb[10].mxu1  ;;  %v522_v9 = vld [vmem:[%s1351_s2 + $0x10] sm:$0xff] }
  0xf2   :  { %v994_v14 = vpop.f32.mrb[11].mxu0  ;;  %v1000_v15 = vpop.f32.mrb[11].mxu1  ;;  %v530_v10 = vpack.c.bf16 %v522_v9, %v522_v9  ;;  %v523_v12 = vld [vmem:[%s1351_s2 + $0x18] sm:$0xff] }
  0xf3   :  { %v531_v13 = vpack.c.bf16 %v523_v12, %v523_v12  ;;  %v524_v15 = vld [vmem:[%s1351_s2 + $0x20] sm:$0xff] }
  0xf4   :  { %v633_v11 = vsel %vm539_vm2, %v530_v10, 0 }
  0xf5   :  { %v679_v14 = vsel %vm539_vm2, %v531_v13, 0 }
  0xf7   :  { %v372_v16 = vpop.f32.mrb[12].mxu0  ;;  %v418_v17 = vpop.f32.mrb[12].mxu1 }
  0xf8   :  { %v445_v18 = vsel %vm55_vm0, %v418_v17, -inf  ;;  %v442_v19 = vsel %vm55_vm0, %v372_v16, -inf  ;;  %v1005_v20 = vpop.f32.mrb[13].mxu0  ;;  %v1011_v21 = vpop.f32.mrb[13].mxu1 }
  0xf9   :  { %446 = vmax.xlane.f32.xlu1 %v445_v18  ;;  %443 = vmax.xlane.f32.xlu0 %v442_v19  ;;  %v375_v22 = vpop.f32.mrb[14].mxu0  ;;  %v421_v23 = vpop.f32.mrb[14].mxu1  ;;  %v525_v18 = vld [vmem:[%s1351_s2 + $0x28] sm:$0xff]  ;;  %v526_v21 = vld [vmem:[%s1351_s2 + $0x30] sm:$0xff] }
  0xfa   :  { %v1006_v24 = vpop.f32.mrb[15].mxu0  ;;  %v1012_v25 = vpop.f32.mrb[15].mxu1  ;;  %v533_v19 = vpack.c.bf16 %v525_v18, %v525_v18  ;;  %v534_v22 = vpack.c.bf16 %v526_v21, %v526_v21 }
  0xfb   :  { %v527_v24 = vld [vmem:[%s1351_s2 + $0x38] sm:$0xff] }
  0xfc   :  { %v771_v20 = vsel %vm539_vm2, %v533_v19, 0  ;;  %v817_v23 = vsel %vm539_vm2, %v534_v22, 0  ;;  %v535_v25 = vpack.c.bf16 %v527_v24, %v527_v24 }
 0x16e   :  { %v426_v26 = vpop.xlane.xlu0 %425 }
 0x16f   :  { %v448_v27 = vsub.f32 %v96_v49, %v426_v26  ;;  %v863_v26 = vsel %vm539_vm2, %v535_v25, 0 }
 0x171   :  { %v456_v28 = vmul.f32 1.442695, %v448_v27 }
 0x172   :  { %v429_v29 = vpop.xlane.xlu0 %428 }
 0x173   :  { %1063 = vpow2.f32 %v456_v28  ;;  %v449_v30 = vsub.f32 %v142_v50, %v429_v29 }
 0x175   :  { %v458_v31 = vmul.f32 1.442695, %v449_v30 }
 0x176   :  { %v432_v32 = vpop.xlane.xlu1 %431 }
 0x177   :  { %1065 = vpow2.f32 %v458_v31  ;;  %v450_v33 = vsub.f32 %v188_v59, %v432_v32 }
 0x179   :  { %v460_v34 = vmul.f32 1.442695, %v450_v33 }
 0x17a   :  { %v435_v35 = vpop.xlane.xlu1 %434 }
 0x17b   :  { %1067 = vpow2.f32 %v460_v34  ;;  %v451_v36 = vsub.f32 %v234_v60, %v435_v35 }
 0x17d   :  { %v1219_v37 = vpop.eup %1063  ;;  %v462_v38 = vmul.f32 1.442695, %v451_v36 }
 0x17e   :  { %v441_v39 = vpop.xlane.xlu1 %440  ;;  %v438_v40 = vpop.xlane.xlu0 %437  ;;  %v472_v41 = vsel %vm55_vm0, %v1219_v37, 0.0 }
 0x17f   :  { %1069 = vpow2.f32 %v462_v38  ;;  %v453_v42 = vsub.f32 %v326_v7, %v441_v39  ;;  %v452_v43 = vsub.f32 %v280_v6, %v438_v40  ;;  %473 = vadd.xlane.f32.xlu0 %v472_v41  ;;  %v521_v6 = vld [vmem:[%s1351_s2 + $0x8] sm:$0xff] }
 0x180   :  { %v529_v7 = vpack.c.bf16 %v521_v6, %v521_v6 }
 0x181   :  { %v1223_v44 = vpop.eup %1065  ;;  %v466_v45 = vmul.f32 1.442695, %v453_v42  ;;  %v464_v46 = vmul.f32 1.442695, %v452_v43 }
 0x182   :  { %v475_v47 = vsel %vm55_vm0, %v1223_v44, 0.0  ;;  %v587_v8 = vsel %vm539_vm2, %v529_v7, 0 }
 0x183   :  { %1071 = vpow2.f32 %v466_v45  ;;  %476 = vadd.xlane.f32.xlu1 %v475_v47  ;;  %1020 = vmatpush3.bf16.msra.mxu1 %v587_v8 }
 0x184   :  { %1073 = vpow2.f32 %v464_v46  ;;  %1031 = vmatprep.subr.bf16.mxu1 %v1095_v0 }
 0x185   :  { %v1227_v48 = vpop.eup %1067 }
 0x186   :  { %v447_v49 = vpop.xlane.xlu1 %446  ;;  %v444_v50 = vpop.xlane.xlu0 %443  ;;  %v478_v51 = vsel %vm55_vm0, %v1227_v48, 0.0 }
 0x187   :  { %v455_v52 = vsub.f32 %v418_v17, %v447_v49  ;;  %v454_v53 = vsub.f32 %v372_v16, %v444_v50  ;;  %479 = vadd.xlane.f32.xlu0 %v478_v51  ;;  %v532_v16 = vpack.c.bf16 %v524_v15, %v524_v15 }
 0x189   :  { %v1231_v54 = vpop.eup %1069  ;;  %v470_v55 = vmul.f32 1.442695, %v455_v52  ;;  %v468_v56 = vmul.f32 1.442695, %v454_v53  ;;  %v725_v17 = vsel %vm539_vm2, %v532_v16, 0 }
 0x18a   :  { %v481_v57 = vsel %vm55_vm0, %v1231_v54, 0.0 }
 0x18b   :  { %1075 = vpow2.f32 %v470_v55  ;;  %482 = vadd.xlane.f32.xlu1 %v481_v57 }
 0x18c   :  { %1077 = vpow2.f32 %v468_v56 }
 0x18d   :  { %v1235_v58 = vpop.eup %1071 }
 0x18e   :  { %v1237_v59 = vpop.eup %1073  ;;  %v487_v60 = vsel %vm55_vm0, %v1235_v58, 0.0 }
 0x18f   :  { %488 = vadd.xlane.f32.xlu1 %v487_v60  ;;  %v484_v61 = vsel %vm55_vm0, %v1237_v59, 0.0 }
 0x190   :  { %485 = vadd.xlane.f32.xlu0 %v484_v61 }
 0x195   :  { %v1243_v62 = vpop.eup %1075 }
 0x196   :  { %v1245_v63 = vpop.eup %1077  ;;  %v493_v1 = vsel %vm55_vm0, %v1243_v62, 0.0 }
 0x197   :  { %494 = vadd.xlane.f32.xlu1 %v493_v1  ;;  %v490_v3 = vsel %vm55_vm0, %v1245_v63, 0.0 }
 0x198   :  { %491 = vadd.xlane.f32.xlu0 %v490_v3 }
 0x20c   :  { %v474_v27 = vpop.xlane.xlu0 %473 }
 0x20d   :  { %1079 = vrcp.f32 %v474_v27 }
 0x210   :  { %v477_v28 = vpop.xlane.xlu1 %476 }
 0x211   :  { %1081 = vrcp.f32 %v477_v28 }
 0x214   :  { %v480_v29 = vpop.xlane.xlu0 %479 }
 0x215   :  { %1083 = vrcp.f32 %v480_v29 }
 0x217   :  { %v1080_v30 = vpop.eup %1079 }
 0x218   :  { %v504_v31 = vmul.f32 %v1080_v30, %v1219_v37  ;;  %v483_v32 = vpop.xlane.xlu1 %482 }
 0x219   :  { %1085 = vrcp.f32 %v483_v32 }
 0x21a   :  { %v512_v33 = vpack.c.bf16 %v504_v31, %v504_v31 }
 0x21b   :  { %v1082_v34 = vpop.eup %1081 }
 0x21c   :  { %v505_v35 = vmul.f32 %v1082_v34, %v1223_v44  ;;  %v489_v36 = vpop.xlane.xlu1 %488  ;;  %1016 = vmatmul.mubr.msk.bf16.vlgmr.msra.gmra.mrb[16].mxu0 %vm55_vm0, %v512_v33 }
 0x21d   :  { %1087 = vrcp.f32 %v489_v36  ;;  %v486_v38 = vpop.xlane.xlu0 %485  ;;  %1026 = vmatpush3.bf16.msra.mxu0 %v633_v11  ;;  %1027 = vmatprep.mubr.msk.bf16.mxu0 %vm1096_vm1, %v1095_v0 }
 0x21e   :  { %1089 = vrcp.f32 %v486_v38  ;;  %v513_v39 = vpack.c.bf16 %v505_v35, %v505_v35  ;;  %1037 = vmatprep.subr.bf16.mxu0 %v1095_v0 }
 0x21f   :  { %v1084_v37 = vpop.eup %1083 }
 0x220   :  { %v506_v40 = vmul.f32 %v1084_v37, %v1227_v48  ;;  %1022 = vmatmul.mubr.msk.bf16.vlgmr.msra.gmra.mrb[16].mxu1 %vm55_vm0, %v513_v39 }
 0x221   :  { %1032 = vmatpush3.bf16.msra.mxu1 %v679_v14  ;;  %1033 = vmatprep.mubr.msk.bf16.mxu1 %vm1096_vm1, %v1095_v0 }
 0x222   :  { %v514_v41 = vpack.c.bf16 %v506_v40, %v506_v40  ;;  %1043 = vmatprep.subr.bf16.mxu1 %v1095_v0 }
 0x223   :  { %v1086_v42 = vpop.eup %1085 }
 0x224   :  { %v507_v43 = vmul.f32 %v1086_v42, %v1231_v54  ;;  %v495_v44 = vpop.xlane.xlu1 %494  ;;  %1028 = vmatmul.mubr.msk.bf16.vlgmr.msra.gmra.mrb[20].mxu0 %vm55_vm0, %v514_v41 }
 0x225   :  { %1091 = vrcp.f32 %v495_v44  ;;  %v492_v45 = vpop.xlane.xlu0 %491  ;;  %1038 = vmatpush3.bf16.msra.mxu0 %v725_v17  ;;  %1039 = vmatprep.mubr.msk.bf16.mxu0 %vm1096_vm1, %v1095_v0 }
 0x226   :  { %1093 = vrcp.f32 %v492_v45  ;;  %v515_v46 = vpack.c.bf16 %v507_v43, %v507_v43  ;;  %1049 = vmatprep.subr.bf16.mxu0 %v1095_v0 }
 0x227   :  { %v1088_v47 = vpop.eup %1087 }
 0x228   :  { %v1090_v48 = vpop.eup %1089  ;;  %1034 = vmatmul.mubr.msk.bf16.vlgmr.msra.gmra.mrb[20].mxu1 %vm55_vm0, %v515_v46  ;;  %v509_v50 = vmul.f32 %v1088_v47, %v1235_v58 }
 0x229   :  { %v508_v49 = vmul.f32 %v1090_v48, %v1237_v59  ;;  %1044 = vmatpush3.bf16.msra.mxu1 %v771_v20  ;;  %1045 = vmatprep.mubr.msk.bf16.mxu1 %vm1096_vm1, %v1095_v0 }
 0x22a   :  { %1055 = vmatprep.subr.bf16.mxu1 %v1095_v0  ;;  %v517_v52 = vpack.c.bf16 %v509_v50, %v509_v50 }
 0x22b   :  { %v516_v51 = vpack.c.bf16 %v508_v49, %v508_v49 }
 0x22d   :  { %1040 = vmatmul.mubr.msk.bf16.vlgmr.msra.gmra.mrb[24].mxu0 %vm55_vm0, %v516_v51 }
 0x22e   :  { %1050 = vmatpush3.bf16.msra.mxu0 %v817_v23  ;;  %1051 = vmatprep.mubr.msk.bf16.mxu0 %vm1096_vm1, %v1095_v0 }
 0x22f   :  { %v1092_v53 = vpop.eup %1091 }
 0x230   :  { %v1094_v54 = vpop.eup %1093  ;;  %1046 = vmatmul.mubr.msk.bf16.vlgmr.msra.gmra.mrb[24].mxu1 %vm55_vm0, %v517_v52  ;;  %v511_v56 = vmul.f32 %v1092_v53, %v1243_v62 }
 0x231   :  { %v510_v55 = vmul.f32 %v1094_v54, %v1245_v63  ;;  %1056 = vmatpush3.bf16.msra.mxu1 %v863_v26  ;;  %1057 = vmatprep.mubr.msk.bf16.mxu1 %vm1096_vm1, %v1095_v0 }
 0x232   :  { %v519_v58 = vpack.c.bf16 %v511_v56, %v511_v56 }
 0x233   :  { %v518_v57 = vpack.c.bf16 %v510_v55, %v510_v55 }
 0x235   :  { %1052 = vmatmul.mubr.msk.bf16.vlgmr.msra.gmra.mrb[28].mxu0 %vm55_vm0, %v518_v57 }
 0x238   :  { %1058 = vmatmul.mubr.msk.bf16.vlgmr.msra.gmra.mrb[28].mxu1 %vm55_vm0, %v519_v58 }
 0x2ef   :  { %v577_v59 = vpop.f32.mrb[16].mxu0 }
 0x2f0   :  { %905 = vst.msk [vmem:[%s1352_s3] sm:$0xff] %vm55_vm0, %v577_v59  ;;  %v1017_v60 = vpop.f32.mrb[17].mxu0 }
 0x2f1   :  { %v580_v61 = vpop.f32.mrb[18].mxu0 }
 0x2f2   :  { %v1018_v63 = vpop.f32.mrb[19].mxu0 }
 0x2f3   :  { %v623_v1 = vpop.f32.mrb[16].mxu1 }
 0x2f4   :  { %906 = vst.msk [vmem:[%s1352_s3 + $0x8] sm:$0xff] %vm55_vm0, %v623_v1  ;;  %v1023_v0 = vpop.f32.mrb[17].mxu1 }
 0x2f5   :  { %v626_v62 = vpop.f32.mrb[18].mxu1 }
 0x2f6   :  { %v1024_v2 = vpop.f32.mrb[19].mxu1 }
 0x2f7   :  { %v669_v3 = vpop.f32.mrb[20].mxu0 }
 0x2f8   :  { %907 = vst.msk [vmem:[%s1352_s3 + $0x10] sm:$0xff] %vm55_vm0, %v669_v3  ;;  %v1029_v4 = vpop.f32.mrb[21].mxu0 }
 0x2f9   :  { %v672_v5 = vpop.f32.mrb[22].mxu0 }
 0x2fa   :  { %v1030_v6 = vpop.f32.mrb[23].mxu0 }
 0x2fb   :  { %v715_v7 = vpop.f32.mrb[20].mxu1 }
 0x2fc   :  { %908 = vst.msk [vmem:[%s1352_s3 + $0x18] sm:$0xff] %vm55_vm0, %v715_v7  ;;  %v1035_v8 = vpop.f32.mrb[21].mxu1 }
 0x2fd   :  { %v718_v9 = vpop.f32.mrb[22].mxu1 }
 0x2fe   :  { %v1036_v10 = vpop.f32.mrb[23].mxu1 }
 0x300   :  { %v761_v11 = vpop.f32.mrb[24].mxu0 }
 0x301   :  { %909 = vst.msk [vmem:[%s1352_s3 + $0x20] sm:$0xff] %vm55_vm0, %v761_v11  ;;  %v1041_v12 = vpop.f32.mrb[25].mxu0 }
 0x302   :  { %v764_v13 = vpop.f32.mrb[26].mxu0 }
 0x303   :  { %v1042_v14 = vpop.f32.mrb[27].mxu0  ;;  %v807_v15 = vpop.f32.mrb[24].mxu1 }
 0x304   :  { %910 = vst.msk [vmem:[%s1352_s3 + $0x28] sm:$0xff] %vm55_vm0, %v807_v15  ;;  %v1047_v16 = vpop.f32.mrb[25].mxu1 }
 0x305   :  { %v810_v17 = vpop.f32.mrb[26].mxu1 }
 0x306   :  { %v1048_v18 = vpop.f32.mrb[27].mxu1 }
 0x308   :  { %v853_v19 = vpop.f32.mrb[28].mxu0 }
 0x309   :  { %911 = vst.msk [vmem:[%s1352_s3 + $0x30] sm:$0xff] %vm55_vm0, %v853_v19  ;;  %v1053_v20 = vpop.f32.mrb[29].mxu0 }
 0x30a   :  { %v856_v21 = vpop.f32.mrb[30].mxu0 }
 0x30b   :  { %v1054_v22 = vpop.f32.mrb[31].mxu0  ;;  %v899_v23 = vpop.f32.mrb[28].mxu1 }
 0x30c   :  { %912 = vst.msk [vmem:[%s1352_s3 + $0x38] sm:$0xff] %vm55_vm0, %v899_v23  ;;  %v1059_v24 = vpop.f32.mrb[29].mxu1 }
 0x30d   :  { %v902_v25 = vpop.f32.mrb[30].mxu1 }
 0x30e   :  { %v1060_v26 = vpop.f32.mrb[31].mxu1 }

// kernel: talk_forward.38
= control target key start
LH: loop header
LB: loop body
LE: loop exit
PB: predicated region body
PF: predicated region fallthrough
CT: control target
= control target key end

     0   :  { %v192_v0 = vmov 0.0   ;;  %vm193_vm0 = vmmov 0   ;;  %vm137_vm1 = vcmask 261120   ;;  %s264_s1 = inlined_call_operand.vmem [shape: bf16[128,32], index: 1, kind: input, shape index: {}]   ;;  %s265_s0 = inlined_call_operand.vmem [shape: f32[16,128], index: 0, kind: input, shape index: {}]   ;;  %s266_s2 = inlined_call_operand.vmem [shape: f32[1,32], index: 2, kind: input, shape index: {}]   ;;  %s267_s3 = inlined_call_operand.vmem [shape: f32[16,32], index: 3, kind: input, shape index: {}]   ;;  %s268_s4 = inlined_call_operand.vmem [shape: f32[16,32], index: 4, kind: output, shape index: {}]  }
   0x1   :  { %162 = vmatprep.subr.bf16.mxu0 %v192_v0  ;;  %v184_v1 = vld [vmem:[%s264_s1] sm:$0xff]   ;;  %178 = vmatprep.mubr.msk.bf16.mxu0 %vm193_vm0, %v192_v0  ;;  %v185_v2 = vld [vmem:[%s264_s1 + $0x8] sm:$0xff]   ;;  %v186_v3 = vld [vmem:[%s264_s1 + $0x10] sm:$0xff]  }
   0x2   :  { %163 = vmatpush3.bf16.msra.mxu0 %v184_v1  ;;  %v187_v4 = vld [vmem:[%s264_s1 + $0x18] sm:$0xff]   ;;  %v188_v5 = vld [vmem:[%s264_s1 + $0x20] sm:$0xff]   ;;  %v189_v6 = vld [vmem:[%s264_s1 + $0x28] sm:$0xff]  }
   0x3   :  { %164 = vmatprep.subr.bf16.mxu0 %v192_v0  ;;  %v190_v7 = vld [vmem:[%s264_s1 + $0x30] sm:$0xff]   ;;  %v191_v8 = vld [vmem:[%s264_s1 + $0x38] sm:$0xff]   ;;  %v18_v9 = vld [vmem:[%s265_s0] sm:$0xff] }
   0x4   :  { %v19_v10 = vld [vmem:[%s265_s0 + $0x8] sm:$0xff]  ;;  %v144_v12 = vld [vmem:[%s266_s2] ss:$0 sm:$0xff] }
   0x5   :  { %v20_v11 = vpack.c.bf16 %v19_v10, %v18_v9  ;;  %v133_v14 = vld [vmem:[%s267_s3] sm:$0xff]  ;;  %v134_v18 = vld [vmem:[%s267_s3 + $0x8] sm:$0xff] }
   0x6   :  { %165 = vmatpush3.bf16.msra.mxu0 %v185_v2 }
   0x7   :  { %166 = vmatprep.subr.bf16.mxu0 %v192_v0 }
   0xa   :  { %167 = vmatpush3.bf16.msra.mxu0 %v186_v3 }
   0xb   :  { %168 = vmatprep.subr.bf16.mxu0 %v192_v0 }
   0xe   :  { %169 = vmatpush3.bf16.msra.mxu0 %v187_v4 }
   0xf   :  { %170 = vmatprep.subr.bf16.mxu0 %v192_v0 }
  0x12   :  { %171 = vmatpush3.bf16.msra.mxu0 %v188_v5 }
  0x13   :  { %172 = vmatprep.subr.bf16.mxu0 %v192_v0 }
  0x16   :  { %173 = vmatpush3.bf16.msra.mxu0 %v189_v6 }
  0x17   :  { %174 = vmatprep.subr.bf16.mxu0 %v192_v0 }
  0x1a   :  { %175 = vmatpush3.bf16.msra.mxu0 %v190_v7 }
  0x1b   :  { %176 = vmatprep.subr.bf16.mxu0 %v192_v0 }
  0x1e   :  { %177 = vmatpush3.bf16.msra.mxu0 %v191_v8 }
  0x21   :  { %179 = vmatmul.mubr.bf16.vlgmr.msra.gmra.mrb[0].mxu0 %v20_v11 }
  0xf4   :  { %v126_v13 = vpop.f32.mrb[0].mxu0 }
  0xf5   :  { %v127_v15 = vadd.f32 %v144_v12, %v126_v13  ;;  %v180_v16 = vpop.f32.mrb[1].mxu0 }
  0xf6   :  { %v129_v17 = vpop.f32.mrb[2].mxu0 }
  0xf7   :  { %v135_v19 = vadd.f32 %v133_v14, %v127_v15  ;;  %v130_v20 = vadd.f32 %v144_v12, %v129_v17  ;;  %v181_v21 = vpop.f32.mrb[3].mxu0 }
  0xf9   :  { %138 = vst.msk [vmem:[%s268_s4] sm:$0xff] %vm137_vm1, %v135_v19  ;;  %v136_v22 = vadd.f32 %v134_v18, %v130_v20 }
  0xfb   :  { %139 = vst.msk [vmem:[%s268_s4 + $0x8] sm:$0xff] %vm137_vm1, %v136_v22 }

// kernel: talk_forward.44
= control target key start
LH: loop header
LB: loop body
LE: loop exit
PB: predicated region body
PF: predicated region fallthrough
CT: control target
= control target key end

     0   :  { %vm16_vm0 = vcmask 261120   ;;  %s118_s0 = inlined_call_operand.vmem [shape: f32[16,32], index: 0, kind: input, shape index: {}]   ;;  %s119_s1 = inlined_call_operand.vmem [shape: f32[1,32], index: 1, kind: input, shape index: {}]   ;;  %s120_s2 = inlined_call_operand.vmem [shape: f32[1,32], index: 2, kind: input, shape index: {}]   ;;  %s121_s3 = inlined_call_operand.vmem [shape: f32[16,32], index: 3, kind: output, shape index: {}]  }
   0x1   :  { %v14_v0 = vld [vmem:[%s118_s0] sm:$0xff]  ;;  %v15_v1 = vld [vmem:[%s118_s0 + $0x8] sm:$0xff] }
   0x2   :  { %v17_v2 = vsel %vm16_vm0, %v14_v0, 0.0  ;;  %v20_v3 = vsel %vm16_vm0, %v15_v1, 0.0  ;;  %v68_v21 = vld [vmem:[%s119_s1] ss:$0 sm:$0xff] }
   0x3   :  { %18 = vadd.xlane.f32.xlu0 %v17_v2  ;;  %v69_v23 = vld [vmem:[%s120_s2] ss:$0 sm:$0xff] }
   0x7   :  { %21 = vadd.xlane.f32.xlu0 %v20_v3 }
  0x90   :  { %v19_v4 = vpop.xlane.xlu0 %18 }
  0x91   :  { %v24_v5 = vmul.f32 0.03125, %v19_v4 }
  0x93   :  { %v26_v6 = vsub.f32 %v14_v0, %v24_v5 }
  0x94   :  { %v22_v7 = vpop.xlane.xlu0 %21 }
  0x95   :  { %v25_v8 = vmul.f32 0.03125, %v22_v7  ;;  %v28_v9 = vmul.f32 %v26_v6, %v26_v6 }
  0x97   :  { %v27_v10 = vsub.f32 %v15_v1, %v25_v8  ;;  %v30_v11 = vsel %vm16_vm0, %v28_v9, 0.0 }
  0x98   :  { %31 = vadd.xlane.f32.xlu1 %v30_v11 }
  0x99   :  { %v29_v12 = vmul.f32 %v27_v10, %v27_v10 }
  0x9b   :  { %v33_v13 = vsel %vm16_vm0, %v29_v12, 0.0 }
  0x9c   :  { %34 = vadd.xlane.f32.xlu1 %v33_v13 }
 0x125   :  { %v32_v14 = vpop.xlane.xlu1 %31 }
 0x126   :  { %v36_v15 = vmul.f32 0.03125, %v32_v14 }
 0x128   :  { %v38_v16 = vadd.f32 1e-05, %v36_v15 }
 0x129   :  { %v35_v17 = vpop.xlane.xlu1 %34 }
 0x12a   :  { %70 = vrsqrt.f32 %v38_v16  ;;  %v37_v18 = vmul.f32 0.03125, %v35_v17 }
 0x12c   :  { %v39_v19 = vadd.f32 1e-05, %v37_v18 }
 0x12e   :  { %72 = vrsqrt.f32 %v39_v19 }
 0x134   :  { %v71_v20 = vpop.eup %70 }
 0x135   :  { %v42_v22 = vmul.f32 %v71_v20, %v26_v6 }
 0x137   :  { %v51_v24 = vmul.f32 %v68_v21, %v42_v22 }
 0x138   :  { %v73_v25 = vpop.eup %72 }
 0x139   :  { %v60_v26 = vadd.f32 %v69_v23, %v51_v24  ;;  %v43_v27 = vmul.f32 %v73_v25, %v27_v10 }
 0x13b   :  { %62 = vst.msk [vmem:[%s121_s3] sm:$0xff] %vm16_vm0, %v60_v26  ;;  %v52_v28 = vmul.f32 %v68_v21, %v43_v27 }
 0x13d   :  { %v61_v29 = vadd.f32 %v69_v23, %v52_v28 }
 0x13f   :  { %63 = vst.msk [vmem:[%s121_s3 + $0x8] sm:$0xff] %vm16_vm0, %v61_v29 }

// kernel: talk_forward.49
= control target key start
LH: loop header
LB: loop body
LE: loop exit
PB: predicated region body
PF: predicated region fallthrough
CT: control target
= control target key end

     0   :  { %v112_v0 = vmov 0.0   ;;  %vm113_vm0 = vmmov 0   ;;  %vm41_vm1 = vcmask 261120   ;;  %vm86_vm2 = vcmask 523264   ;;  %s155_s1 = inlined_call_operand.vmem [shape: bf16[32,64], index: 1, kind: input, shape index: {}]   ;;  %s156_s0 = inlined_call_operand.vmem [shape: f32[16,32], index: 0, kind: input, shape index: {}]   ;;  %s157_s2 = inlined_call_operand.vmem [shape: f32[1,64], index: 2, kind: input, shape index: {}]   ;;  %s158_s3 = inlined_call_operand.vmem [shape: f32[16,64], index: 3, kind: output, shape index: {}]  }
   0x1   :  { %100 = vmatprep.subr.bf16.mxu0 %v112_v0  ;;  %v110_v1 = vld [vmem:[%s155_s1] sm:$0xff]   ;;  %104 = vmatprep.mubr.msk.bf16.mxu0 %vm113_vm0, %v112_v0  ;;  %v111_v2 = vld [vmem:[%s155_s1 + $0x8] sm:$0xff]  }
   0x2   :  { %101 = vmatpush3.bf16.msra.mxu0 %v110_v1  ;;  %v15_v3 = vld [vmem:[%s156_s0] sm:$0xff]  ;;  %v16_v4 = vld [vmem:[%s156_s0 + $0x8] sm:$0xff] }
   0x3   :  { %102 = vmatprep.subr.bf16.mxu0 %v112_v0  ;;  %v17_v5 = vpack.c.bf16 %v16_v4, %v15_v3  ;;  %v93_v6 = vld [vmem:[%s157_s2] ss:$0 sm:$0xff] }
   0x6   :  { %103 = vmatpush3.bf16.msra.mxu0 %v111_v2 }
   0x9   :  { %105 = vmatmul.mubr.msk.bf16.vlgmr.msra.gmra.mrb[0].mxu0 %vm41_vm1, %v17_v5 }
  0xdc   :  { %v79_v7 = vpop.f32.mrb[0].mxu0 }
  0xdd   :  { %v80_v8 = vadd.f32 %v93_v6, %v79_v7  ;;  %v106_v9 = vpop.f32.mrb[1].mxu0 }
  0xde   :  { %v82_v10 = vpop.f32.mrb[2].mxu0 }
  0xdf   :  { %87 = vst.msk [vmem:[%s158_s3] sm:$0xff] %vm86_vm2, %v80_v8  ;;  %v83_v11 = vadd.f32 %v93_v6, %v82_v10  ;;  %v107_v12 = vpop.f32.mrb[3].mxu0 }
  0xe1   :  { %88 = vst.msk [vmem:[%s158_s3 + $0x8] sm:$0xff] %vm86_vm2, %v83_v11 }

// kernel: talk_forward.63
= control target key start
LH: loop header
LB: loop body
LE: loop exit
PB: predicated region body
PF: predicated region fallthrough
CT: control target
= control target key end

     0   :  { %vm24_vm0 = vcmask 261120   ;;  %s282_s0 = inlined_call_operand.vmem [shape: f32[16,32], index: 0, kind: input, shape index: {}]   ;;  %s283_s1 = inlined_call_operand.vmem [shape: bf16[32,64], index: 1, kind: input, shape index: {}]   ;;  %s284_s2 = inlined_call_operand.vmem [shape: f32[1,64], index: 2, kind: input, shape index: {}]   ;;  %s285_s3 = inlined_call_operand.vmem [shape: f32[1,32], index: 3, kind: input, shape index: {}]   ;;  %s286_s4 = inlined_call_operand.vmem [shape: f32[1,32], index: 4, kind: input, shape index: {}]   ;;  %s287_s5 = inlined_call_operand.hbm [shape: f32[16,64], index: 5, kind: output, shape index: {}]  }
   0x1   :  { %v22_v0 = vld [vmem:[%s282_s0] sm:$0xff]  ;;  %v23_v1 = vld [vmem:[%s282_s0 + $0x8] sm:$0xff] }
   0x2   :  { %v25_v2 = vsel %vm24_vm0, %v22_v0, 0.0 }
   0x3   :  { %26 = vadd.xlane.f32.xlu0 %v25_v2 }
   0x4   :  { %10 = vsyncpa [#allocation3], 0  ;;  %v28_v3 = vsel %vm24_vm0, %v23_v1, 0.0  ;;  %v179_v14 = vld [vmem:[%s283_s1] sm:$0xff]   ;;  %v209_v15 = vmov 0.0   ;;  %v180_v16 = vld [vmem:[%s283_s1 + $0x8] sm:$0xff]  }
   0x5   :  { %166 = vmatprep.subr.bf16.mxu0 %v209_v15  ;;  %vm210_vm1 = vmmov 0   ;;  %v157_v25 = vld [vmem:[%s285_s3] ss:$0 sm:$0xff]  ;;  %s211_s30 = smov [#allocation2]   ;;  %vm138_vm2 = vcmask 523264  }
   0x6   :  { %167 = vmatpush3.bf16.msra.mxu0 %v179_v14  ;;  %170 = vmatprep.mubr.msk.bf16.mxu0 %vm210_vm1, %v209_v15  ;;  %v158_v29 = vld [vmem:[%s286_s4] ss:$0 sm:$0xff]  ;;  %s146_s6 = sshll.u32 %s211_s30, 4  ;;  %s147_s6 = int_to_ptr.vmem [resolvable:$true] %s146_s6 }
   0x7   :  { %29 = vadd.xlane.f32.xlu0 %v28_v3  ;;  %168 = vmatprep.subr.bf16.mxu0 %v209_v15  ;;  %v159_v34 = vld [vmem:[%s284_s2] ss:$0 sm:$0xff]  ;;  %s185_s3 = scalar_lea.vmem %s147_s6, 256  ;;  %p190_p1 = scmp.lt.s32.totalorder %s147_s6, %s147_s6 }
   0x8   :  { %p186_p0 = scmp.ne.s32.totalorder %s147_s6, %s185_s3  ;;  %p191_p2 = scmp.lt.s32.totalorder %s185_s3, %s185_s3 }
   0xa   :  { %169 = vmatpush3.bf16.msra.mxu0 %v180_v16  ;;  %p192_p3 = por %p191_p2, %p190_p1 }
   0xc   :  { %p193_p4 = pnand %p192_p3, %p186_p0 }
  0x90   :  { %v27_v4 = vpop.xlane.xlu0 %26 }
  0x91   :  { %v32_v5 = vmul.f32 0.03125, %v27_v4 }
  0x93   :  { %v34_v6 = vsub.f32 %v22_v0, %v32_v5 }
  0x94   :  { %v30_v7 = vpop.xlane.xlu0 %29 }
  0x95   :  { %v33_v8 = vmul.f32 0.03125, %v30_v7  ;;  %v36_v9 = vmul.f32 %v34_v6, %v34_v6 }
  0x97   :  { %v35_v10 = vsub.f32 %v23_v1, %v33_v8  ;;  %v38_v11 = vsel %vm24_vm0, %v36_v9, 0.0 }
  0x98   :  { %39 = vadd.xlane.f32.xlu1 %v38_v11 }
  0x99   :  { %v37_v12 = vmul.f32 %v35_v10, %v35_v10 }
  0x9b   :  { %v41_v13 = vsel %vm24_vm0, %v37_v12, 0.0 }
  0x9c   :  { %42 = vadd.xlane.f32.xlu1 %v41_v13 }
 0x125   :  { %v40_v17 = vpop.xlane.xlu1 %39 }
 0x126   :  { %v44_v18 = vmul.f32 0.03125, %v40_v17 }
 0x128   :  { %v46_v19 = vadd.f32 1e-05, %v44_v18 }
 0x129   :  { %v43_v20 = vpop.xlane.xlu1 %42 }
 0x12a   :  { %181 = vrsqrt.f32 %v46_v19  ;;  %v45_v21 = vmul.f32 0.03125, %v43_v20 }
 0x12c   :  { %v47_v22 = vadd.f32 1e-05, %v45_v21 }
 0x12e   :  { %183 = vrsqrt.f32 %v47_v22 }
 0x134   :  { %v182_v23 = vpop.eup %181 }
 0x135   :  { %v50_v24 = vmul.f32 %v182_v23, %v34_v6 }
 0x137   :  { %v59_v28 = vmul.f32 %v157_v25, %v50_v24 }
 0x138   :  { %v184_v26 = vpop.eup %183 }
 0x139   :  { %v51_v27 = vmul.f32 %v184_v26, %v35_v10  ;;  %v68_v31 = vadd.f32 %v158_v29, %v59_v28 }
 0x13b   :  { %v60_v30 = vmul.f32 %v157_v25, %v51_v27 }
 0x13d   :  { %v69_v32 = vadd.f32 %v158_v29, %v60_v30 }
 0x13f   :  { %v70_v33 = vpack.c.bf16 %v69_v32, %v68_v31 }
 0x141   :  { %171 = vmatmul.mubr.msk.bf16.vlgmr.msra.gmra.mrb[0].mxu0 %vm24_vm0, %v70_v33 }
 0x214   :  { %v131_v35 = vpop.f32.mrb[0].mxu0 }
 0x215   :  { %v132_v36 = vadd.f32 %v159_v34, %v131_v35  ;;  %v172_v37 = vpop.f32.mrb[1].mxu0 }
 0x216   :  { %v134_v38 = vpop.f32.mrb[2].mxu0 }
 0x217   :  { %139 = vst.msk [vmem:[#allocation2] sm:$0xff] %vm138_vm2, %v132_v36  ;;  %v135_v39 = vadd.f32 %v159_v34, %v134_v38  ;;  %v173_v40 = vpop.f32.mrb[3].mxu0 }
 0x219   :  { %140 = vst.msk [vmem:[#allocation2 + $0x8] sm:$0xff] %vm138_vm2, %v135_v39 }
 0x21a   :  { %196 = shalt.err (!%p193_p4)
}
 0x21b   :  { %s197_s7 = scalar_lea.hbm %s287_s5, 256 }
 0x21c   :  { %p198_p5 = scmp.ne.s32.totalorder %s287_s5, %s197_s7  ;;  %p201_p6 = scmp.lt.u32.totalorder %s197_s7, %s287_s5 }
 0x21e   :  { %p203_p7 = pnand %p201_p6, %p198_p5 }
 0x220   :  { %206 = shalt.err (!%p203_p7)
}
 0x221   :  { %s212_s12 = smov 128   ;;  %s213_s13 = smov 8  }
 0x222   :  { %152 = dma.vmem_to_hbm [thread:$0]  %s147_s6, 256, %s287_s5, [#allocation3], %s212_s12, %s212_s12, %s213_s13  }
 0x223   :  { %207 = dma.done.wait [#allocation3], 256  }
 0x224   :  { %208 = vsyncadd [#allocation3], 4294967040 }
 0x225   :  { %156 = vsyncpa [#allocation3], 1 }

</bundles_post_ra>
